<compile_context>
chip_gen: v7x
topology: tpu7x:2x2x1
jax: 0.10.0
libtpu: 0.0.40
codegen_flags: <defaults>
</compile_context>

<pallas_src>
import jax
import jax.numpy as jnp
from jax import lax
from jax.experimental import pallas as pl
from jax.experimental.pallas import tpu as pltpu


def _round_up(x, m):
    return ((x + m - 1) // m) * m


# --------------------------------- kernel -----------------------------------

def seq2seq_kernel(
        tf_ref,                                    # SMEM (T,) int32
        enc_x_ref,                                 # VMEM (S, Bp, Kp) f32
        w_enc_ref,                                 # VMEM (Kp, 4Kp)  bf16
        b_enc_ref,                                 # VMEM (Bp, 4Kp)  f32
        trg_emb_hbm, temb_hbm,                     # ANY  (T,Bp,Kp) f32, (Vp,Kp) bf16
        w_dec_hbm, b_dec_hbm,                      # ANY  (Kp,4Kp) bf16, (Bp,4Kp) f32
        wfc_hbm, bfc_hbm,                          # ANY  (Kp,Vp) bf16, (Bp,Vp) f32
        out_ref,                                   # VMEM (T, Bp, Vp) f32
        trg_emb_v, temb_v, w_dec_v, b_dec_v, wfc_v, bfc_v,   # VMEM scratch
        sem):                                      # DMA semaphores (6,)
    S, Bp, Kp = enc_x_ref.shape
    T = out_ref.shape[0]
    Gp = b_enc_ref.shape[1] // 4                   # gate block width (== Kp)
    Vp = out_ref.shape[-1]

    # Prefetch every decoder-side operand under the serialized encoder steps.
    # (No grid => no auto-pipelining; without this these bytes are exposed
    # DMA latency before any compute starts.)
    copies = (
        pltpu.make_async_copy(trg_emb_hbm, trg_emb_v, sem.at[0]),
        pltpu.make_async_copy(temb_hbm, temb_v, sem.at[1]),
        pltpu.make_async_copy(w_dec_hbm, w_dec_v, sem.at[2]),
        pltpu.make_async_copy(b_dec_hbm, b_dec_v, sem.at[3]),
        pltpu.make_async_copy(wfc_hbm, wfc_v, sem.at[4]),
        pltpu.make_async_copy(bfc_hbm, bfc_v, sem.at[5]),
    )
    for cp in copies:
        cp.start()

    def lstm_step(xh, c, w_ref, b_ref):
        # Packed recurrence dot: (Bp, Kp) @ (Kp, 4Kp), bf16 operands, f32 acc.
        gates = jnp.dot(xh.astype(jnp.bfloat16), w_ref[...],
                        preferred_element_type=jnp.float32) + b_ref[...]
        i = jax.nn.sigmoid(gates[:, 0 * Gp:1 * Gp])
        f = jax.nn.sigmoid(gates[:, 1 * Gp:2 * Gp])
        g = jnp.tanh(gates[:, 2 * Gp:3 * Gp])
        o = jax.nn.sigmoid(gates[:, 3 * Gp:4 * Gp])
        c_new = f * c + i * g
        h_new = o * jnp.tanh(c_new)
        return h_new, c_new

    # ---- Encoder: h/c live pre-shifted at lanes [E, E+H); x occupies lanes
    # [0, E) and is zero elsewhere, so the packed slab is just `x + h`.
    h = jnp.zeros((Bp, Gp), jnp.float32)
    c = jnp.zeros((Bp, Gp), jnp.float32)

    def enc_body(t, carry):
        h, c = carry
        return lstm_step(enc_x_ref[t] + h, c, w_enc_ref, b_enc_ref)

    h, c = lax.fori_loop(0, S, enc_body, (h, c), unroll=True)

    # Decoder operands must be resident from here on.
    for cp in copies:
        cp.wait()

    # ---- Decoder (t = 1 .. T-1); row 0 of the output stays zero.
    out_ref[0] = jnp.zeros((Bp, Vp), jnp.float32)

    # Hoisted once: iota reused by argmax + one-hot on every decoder step, and
    # the bf16 re-embed table.
    vocab_ids = lax.broadcasted_iota(jnp.int32, (Bp, Vp), 1)
    temb = temb_v[...]

    def greedy_embed(logits):
        # torch.argmax semantics (first maximal index) + one-hot re-embed.
        # Padded logit lanes carry a -1e9 bias so they can never be selected.
        m = jnp.max(logits, axis=-1, keepdims=True)
        cand = jnp.where(logits == m, vocab_ids, jnp.full_like(vocab_ids, Vp))
        tok = jnp.min(cand, axis=-1, keepdims=True)
        onehot = (vocab_ids == tok).astype(jnp.bfloat16)
        return jnp.dot(onehot, temb, preferred_element_type=jnp.float32)

    x0 = trg_emb_v[0]                    # embedding of trg[:, 0] (<SOS>)

    def dec_body(t, carry):
        h, c, x = carry
        h, c = lstm_step(x + h, c, w_dec_v, b_dec_v)
        logits = jnp.dot(h.astype(jnp.bfloat16), wfc_v[...],
                         preferred_element_type=jnp.float32) + bfc_v[...]
        out_ref[t] = logits
        x_tf = trg_emb_v[t]
        # argmax + re-embed only runs on non-teacher-forced steps.
        next_x = lax.cond(tf_ref[t] != 0,
                          lambda: x_tf,
                          lambda: greedy_embed(logits))
        return h, c, next_x

    lax.fori_loop(1, T, dec_body, (h, c, x0), unroll=True)


# ---------------------- one-time weight preparation --------------------------

def prepare_params(params, batch_size):
    """Pad / fuse / lane-shift / bf16-cast the weights once, outside the
    per-call jit, so per-forward HBM traffic is activations only."""
    E = params["semb"].shape[1]
    H = params["whh_e"].shape[0]
    Vt = params["temb"].shape[0]

    Kp = _round_up(E + H, 128)        # packed recurrence contraction depth
    Vp = _round_up(Vt, 128)
    Bp = _round_up(batch_size, 8)     # f32 sublane tile

    def pad_gate_cols(w):
        # (rows, 4H) -> (rows, 4Kp); each gate's H real columns are placed at
        # lane offset E inside its Kp-wide block so h_new comes out pre-shifted
        # to lanes [E, E+H).  Padding is exactly zero (see invariant above).
        return jnp.concatenate(
            [jnp.pad(w[:, g * H:(g + 1) * H], ((0, 0), (E, Kp - E - H)))
             for g in range(4)], axis=1)

    def fuse(wih, whh):
        # rows [0,E): x rows; rows [E,E+H): h rows; rest zero.  -> (Kp, 4Kp)
        w = jnp.concatenate([pad_gate_cols(wih), pad_gate_cols(whh)], axis=0)
        return jnp.pad(w, ((0, Kp - E - H), (0, 0)))

    w_enc = fuse(params["wih_e"], params["whh_e"]).astype(jnp.bfloat16)
    w_dec = fuse(params["wih_d"], params["whh_d"]).astype(jnp.bfloat16)
    b_enc = jnp.broadcast_to(pad_gate_cols(params["b_e"]), (Bp, 4 * Kp))
    b_dec = jnp.broadcast_to(pad_gate_cols(params["b_d"]), (Bp, 4 * Kp))

    # FC rows line up with h's packed lane offset E; padded logit lanes get a
    # -1e9 bias so the in-kernel argmax never picks them (sliced off outside).
    wfc = jnp.pad(params["wfc"],
                  ((E, Kp - E - H), (0, Vp - Vt))).astype(jnp.bfloat16)
    bfc = jnp.broadcast_to(
        jnp.concatenate([params["bfc"],
                         jnp.full((1, Vp - Vt), -1e9, jnp.float32)], axis=1),
        (Bp, Vp))

    # f32 gather tables (lane-padded to Kp) and the bf16 re-embed table.
    semb_g = jnp.pad(params["semb"], ((0, 0), (0, Kp - E)))
    temb_g = jnp.pad(params["temb"], ((0, 0), (0, Kp - E)))
    temb_mm = jnp.pad(params["temb"],
                      ((0, Vp - Vt), (0, Kp - E))).astype(jnp.bfloat16)

    return dict(w_enc=w_enc, b_enc=b_enc, w_dec=w_dec, b_dec=b_dec,
                wfc=wfc, bfc=bfc, semb_g=semb_g, temb_g=temb_g,
                temb_mm=temb_mm)


# -------------------------------- wrapper ------------------------------------

@jax.jit
def seq2seq_forward(src, trg, prep, tf_flags):
    """src: (B,S) int32, trg: (B,T) int32, tf_flags: (T,) int32.
    Returns (B, T, trg_vocab) float32, matching the PyTorch forward."""
    B, S = src.shape
    _, T = trg.shape
    Bp = prep["b_enc"].shape[0]
    Kp = prep["w_enc"].shape[0]
    Vp = prep["wfc"].shape[1]
    Vt = prep["temb_g"].shape[0]

    # Per-call work: only the embedding gathers (+ time-major & batch pad).
    enc_x = jnp.pad(jnp.transpose(prep["semb_g"][src], (1, 0, 2)),
                    ((0, 0), (0, Bp - B), (0, 0)))            # (S, Bp, Kp) f32
    trg_emb = jnp.pad(jnp.transpose(prep["temb_g"][trg], (1, 0, 2)),
                      ((0, 0), (0, Bp - B), (0, 0)))          # (T, Bp, Kp) f32

    vmem = pl.BlockSpec(memory_space=pltpu.MemorySpace.VMEM)
    smem = pl.BlockSpec(memory_space=pltpu.MemorySpace.SMEM)
    anysp = pl.BlockSpec(memory_space=pl.ANY)

    out_tmajor = pl.pallas_call(
        seq2seq_kernel,
        out_shape=jax.ShapeDtypeStruct((T, Bp, Vp), jnp.float32),
        in_specs=[smem, vmem, vmem, vmem] + [anysp] * 6,
        out_specs=vmem,
        scratch_shapes=[
            pltpu.VMEM((T, Bp, Kp), jnp.float32),      # trg_emb
            pltpu.VMEM((Vp, Kp), jnp.bfloat16),        # temb (re-embed)
            pltpu.VMEM((Kp, 4 * Kp), jnp.bfloat16),    # w_dec
            pltpu.VMEM((Bp, 4 * Kp), jnp.float32),     # b_dec
            pltpu.VMEM((Kp, Vp), jnp.bfloat16),        # wfc
            pltpu.VMEM((Bp, Vp), jnp.float32),         # bfc
            pltpu.SemaphoreType.DMA((6,)),
        ],
    )(tf_flags.astype(jnp.int32), enc_x, prep["w_enc"], prep["b_enc"],
      trg_emb, prep["temb_mm"], prep["w_dec"], prep["b_dec"],
      prep["wfc"], prep["bfc"])

    # (T, Bp, Vp) -> (B, T, Vt): drop batch pad, padded vocab lanes (-1e9).
    return jnp.transpose(out_tmajor[:, :B, :Vt], (1, 0, 2))


# --------------------------- pure-JAX reference ------------------------------

def seq2seq_reference(src, trg, params, tf_flags):
    """Reference forward with the same bf16-operand / f32-accumulate matmul
    numerics the kernel uses (so greedy-decode argmax decisions match)."""
    B, S = src.shape
    _, T = trg.shape
    Vt = params["temb"].shape[0]
    H = params["whh_e"].shape[0]

    def mm(a, b):
        return jnp.dot(a.astype(jnp.bfloat16), b.astype(jnp.bfloat16),
                       preferred_element_type=jnp.float32)

    def lstm_step(x, h, c, w_ih, w_hh, b):
        g = mm(x, w_ih) + mm(h, w_hh) + b
        i = jax.nn.sigmoid(g[:, 0 * H:1 * H])
        f = jax.nn.sigmoid(g[:, 1 * H:2 * H])
        gg = jnp.tanh(g[:, 2 * H:3 * H])
        o = jax.nn.sigmoid(g[:, 3 * H:4 * H])
        c = f * c + i * gg
        h = o * jnp.tanh(c)
        return h, c

    h = jnp.zeros((B, H), jnp.float32)
    c = jnp.zeros((B, H), jnp.float32)
    for t in range(S):
        h, c = lstm_step(params["semb"][src[:, t]], h, c,
                         params["wih_e"], params["whh_e"], params["b_e"])

    outputs = jnp.zeros((B, T, Vt), jnp.float32)
    temb_bf = params["temb"].astype(jnp.bfloat16).astype(jnp.float32)
    x = params["temb"][trg[:, 0]]
    for t in range(1, T):
        h, c = lstm_step(x, h, c, params["wih_d"], params["whh_d"],
                         params["b_d"])
        logits = mm(h, params["wfc"]) + params["bfc"]
        outputs = outputs.at[:, t].set(logits)
        tok = jnp.argmax(logits, axis=-1)
        x = jnp.where(tf_flags[t] != 0, params["temb"][trg[:, t]], temb_bf[tok])
    return outputs


# ----------------------------------- main ------------------------------------

def make_params(key, src_vocab, trg_vocab, embed_dim, hidden_dim):
    ks = jax.random.split(key, 10)
    s = 0.1
    return {
        "semb":  s * jax.random.normal(ks[0], (src_vocab, embed_dim), jnp.float32),
        "temb":  s * jax.random.normal(ks[1], (trg_vocab, embed_dim), jnp.float32),
        # LSTM weights kept transposed: (in, 4H) / (H, 4H); biases fused.
        "wih_e": s * jax.random.normal(ks[2], (embed_dim, 4 * hidden_dim), jnp.float32),
        "whh_e": s * jax.random.normal(ks[3], (hidden_dim, 4 * hidden_dim), jnp.float32),
        "b_e":   s * jax.random.normal(ks[4], (1, 4 * hidden_dim), jnp.float32),
        "wih_d": s * jax.random.normal(ks[5], (embed_dim, 4 * hidden_dim), jnp.float32),
        "whh_d": s * jax.random.normal(ks[6], (hidden_dim, 4 * hidden_dim), jnp.float32),
        "b_d":   s * jax.random.normal(ks[7], (1, 4 * hidden_dim), jnp.float32),
        "wfc":   s * jax.random.normal(ks[8], (hidden_dim, trg_vocab), jnp.float32),
        "bfc":   s * jax.random.normal(ks[9], (1, trg_vocab), jnp.float32),
    }


if __name__ == "__main__":
    B, S, T = 2, 8, 8          # batch, src_len, trg_len
    E, H = 32, 64              # embed_dim, hidden_dim (Encoder/Decoder(…, 32, 64))
    Vs, Vt = 20, 24            # small vocab sizes

    key = jax.random.PRNGKey(0)
    k_src, k_trg, k_tf, k_par = jax.random.split(key, 4)

    src = jax.random.randint(k_src, (B, S), 0, Vs, dtype=jnp.int32)
    trg = jax.random.randint(k_trg, (B, T), 0, Vt, dtype=jnp.int32)
    # deterministic stand-in for `random.random() < teacher_forcing_ratio`
    tf_flags = jax.random.bernoulli(k_tf, 0.5, (T,)).astype(jnp.int32)

    params = make_params(k_par, Vs, Vt, E, H)
    prep = prepare_params(params, B)           # one-time weight prep

    out = seq2seq_forward(src, trg, prep, tf_flags)
    out = jax.block_until_ready(out)

    ref = seq2seq_reference(src, trg, params, tf_flags)
    assert out.shape == (B, T, Vt)
    assert jnp.allclose(out, ref, atol=2e-3, rtol=2e-3), "mismatch vs reference"

    print("KERNEL_OK")
</pallas_src>

<mosaic_0001>
module attributes {stable_mosaic.version = 11 : i64} {
  func.func @seq2seq_kernel(%arg0: memref<8xi32, #tpu.memory_space<smem>>, %arg1: memref<8x8x128xf32, #tpu.memory_space<vmem>>, %arg2: memref<128x512xbf16, #tpu.memory_space<vmem>>, %arg3: memref<8x512xf32, #tpu.memory_space<vmem>>, %arg4: memref<8x8x128xf32, #tpu.memory_space<any>>, %arg5: memref<128x128xbf16, #tpu.memory_space<any>>, %arg6: memref<128x512xbf16, #tpu.memory_space<any>>, %arg7: memref<8x512xf32, #tpu.memory_space<any>>, %arg8: memref<128x128xbf16, #tpu.memory_space<any>>, %arg9: memref<8x128xf32, #tpu.memory_space<any>>, %arg10: memref<8x8x128xf32, #tpu.memory_space<vmem>>, %arg11: memref<8x8x128xf32, #tpu.memory_space<vmem>>, %arg12: memref<128x128xbf16, #tpu.memory_space<vmem>>, %arg13: memref<128x512xbf16, #tpu.memory_space<vmem>>, %arg14: memref<8x512xf32, #tpu.memory_space<vmem>>, %arg15: memref<128x128xbf16, #tpu.memory_space<vmem>>, %arg16: memref<8x128xf32, #tpu.memory_space<vmem>>, %arg17: memref<6x!tpu.dma_semaphore, #tpu.memory_space<semaphore_mem>>) attributes {dimension_semantics = [], scalar_prefetch = 0 : i64, scratch_operands = 7 : i64, tpu.core_type = #tpu.core_type<tc>} {
    %c0_i32 = arith.constant 0 : i32
    %0 = tpu.memref_slice %arg17[%c0_i32] : memref<6x!tpu.dma_semaphore, #tpu.memory_space<semaphore_mem>> -> memref<1x!tpu.dma_semaphore, #tpu.memory_space<semaphore_mem>>
    %1 = tpu.memref_squeeze %0 : memref<1x!tpu.dma_semaphore, #tpu.memory_space<semaphore_mem>> -> memref<!tpu.dma_semaphore, #tpu.memory_space<semaphore_mem>>
    tpu.enqueue_dma source(%arg4 : memref<8x8x128xf32, #tpu.memory_space<any>>) target(%arg11 : memref<8x8x128xf32, #tpu.memory_space<vmem>>) target_semaphore(%1 : memref<!tpu.dma_semaphore, #tpu.memory_space<semaphore_mem>>)
    %c1_i32 = arith.constant 1 : i32
    %2 = tpu.memref_slice %arg17[%c1_i32] : memref<6x!tpu.dma_semaphore, #tpu.memory_space<semaphore_mem>> -> memref<1x!tpu.dma_semaphore, #tpu.memory_space<semaphore_mem>>
    %3 = tpu.memref_squeeze %2 : memref<1x!tpu.dma_semaphore, #tpu.memory_space<semaphore_mem>> -> memref<!tpu.dma_semaphore, #tpu.memory_space<semaphore_mem>>
    tpu.enqueue_dma source(%arg5 : memref<128x128xbf16, #tpu.memory_space<any>>) target(%arg12 : memref<128x128xbf16, #tpu.memory_space<vmem>>) target_semaphore(%3 : memref<!tpu.dma_semaphore, #tpu.memory_space<semaphore_mem>>)
    %c2_i32 = arith.constant 2 : i32
    %4 = tpu.memref_slice %arg17[%c2_i32] : memref<6x!tpu.dma_semaphore, #tpu.memory_space<semaphore_mem>> -> memref<1x!tpu.dma_semaphore, #tpu.memory_space<semaphore_mem>>
    %5 = tpu.memref_squeeze %4 : memref<1x!tpu.dma_semaphore, #tpu.memory_space<semaphore_mem>> -> memref<!tpu.dma_semaphore, #tpu.memory_space<semaphore_mem>>
    tpu.enqueue_dma source(%arg6 : memref<128x512xbf16, #tpu.memory_space<any>>) target(%arg13 : memref<128x512xbf16, #tpu.memory_space<vmem>>) target_semaphore(%5 : memref<!tpu.dma_semaphore, #tpu.memory_space<semaphore_mem>>)
    %c3_i32 = arith.constant 3 : i32
    %6 = tpu.memref_slice %arg17[%c3_i32] : memref<6x!tpu.dma_semaphore, #tpu.memory_space<semaphore_mem>> -> memref<1x!tpu.dma_semaphore, #tpu.memory_space<semaphore_mem>>
    %7 = tpu.memref_squeeze %6 : memref<1x!tpu.dma_semaphore, #tpu.memory_space<semaphore_mem>> -> memref<!tpu.dma_semaphore, #tpu.memory_space<semaphore_mem>>
    tpu.enqueue_dma source(%arg7 : memref<8x512xf32, #tpu.memory_space<any>>) target(%arg14 : memref<8x512xf32, #tpu.memory_space<vmem>>) target_semaphore(%7 : memref<!tpu.dma_semaphore, #tpu.memory_space<semaphore_mem>>)
    %c4_i32 = arith.constant 4 : i32
    %8 = tpu.memref_slice %arg17[%c4_i32] : memref<6x!tpu.dma_semaphore, #tpu.memory_space<semaphore_mem>> -> memref<1x!tpu.dma_semaphore, #tpu.memory_space<semaphore_mem>>
    %9 = tpu.memref_squeeze %8 : memref<1x!tpu.dma_semaphore, #tpu.memory_space<semaphore_mem>> -> memref<!tpu.dma_semaphore, #tpu.memory_space<semaphore_mem>>
    tpu.enqueue_dma source(%arg8 : memref<128x128xbf16, #tpu.memory_space<any>>) target(%arg15 : memref<128x128xbf16, #tpu.memory_space<vmem>>) target_semaphore(%9 : memref<!tpu.dma_semaphore, #tpu.memory_space<semaphore_mem>>)
    %c5_i32 = arith.constant 5 : i32
    %10 = tpu.memref_slice %arg17[%c5_i32] : memref<6x!tpu.dma_semaphore, #tpu.memory_space<semaphore_mem>> -> memref<1x!tpu.dma_semaphore, #tpu.memory_space<semaphore_mem>>
    %11 = tpu.memref_squeeze %10 : memref<1x!tpu.dma_semaphore, #tpu.memory_space<semaphore_mem>> -> memref<!tpu.dma_semaphore, #tpu.memory_space<semaphore_mem>>
    tpu.enqueue_dma source(%arg9 : memref<8x128xf32, #tpu.memory_space<any>>) target(%arg16 : memref<8x128xf32, #tpu.memory_space<vmem>>) target_semaphore(%11 : memref<!tpu.dma_semaphore, #tpu.memory_space<semaphore_mem>>)
    %cst = arith.constant 0.000000e+00 : f32
    %12 = vector.broadcast %cst : f32 to vector<8x128xf32>
    %cst_0 = arith.constant 0.000000e+00 : f32
    %13 = vector.broadcast %cst_0 : f32 to vector<8x128xf32>
    %c0_i32_1 = arith.constant 0 : i32
    %14 = arith.index_cast %c0_i32_1 : i32 to index
    %c0 = arith.constant 0 : index
    %c0_2 = arith.constant 0 : index
    %15 = vector.load %arg1[%14, %c0, %c0_2] : memref<8x8x128xf32, #tpu.memory_space<vmem>>, vector<1x8x128xf32>
    %16 = vector.shape_cast %15 : vector<1x8x128xf32> to vector<8x128xf32>
    %17 = arith.addf %16, %12 : vector<8x128xf32>
    %18 = arith.truncf %17 : vector<8x128xf32> to vector<8x128xbf16>
    %c0_3 = arith.constant 0 : index
    %c0_4 = arith.constant 0 : index
    %19 = vector.load %arg2[%c0_3, %c0_4] : memref<128x512xbf16, #tpu.memory_space<vmem>>, vector<128x512xbf16>
    %cst_5 = arith.constant dense<0.000000e+00> : vector<8x512xf32>
    %20 = tpu.matmul %18, %19, %cst_5 {dimension_numbers = #tpu.dot_dimension_numbers<[1], [0], [0], [1], [0, 0, 1, 1], [], []>} : vector<8x128xbf16>, vector<128x512xbf16>, vector<8x512xf32> -> vector<8x512xf32>
    %c0_6 = arith.constant 0 : index
    %c0_7 = arith.constant 0 : index
    %21 = vector.load %arg3[%c0_6, %c0_7] : memref<8x512xf32, #tpu.memory_space<vmem>>, vector<8x512xf32>
    %22 = arith.addf %20, %21 : vector<8x512xf32>
    %23 = vector.extract_strided_slice %22 {offsets = [0, 0], sizes = [8, 128], strides = [1, 1]} : vector<8x512xf32> to vector<8x128xf32>
    %24 = arith.negf %23 : vector<8x128xf32>
    %25 = math.exp %24 : vector<8x128xf32>
    %cst_8 = arith.constant 1.000000e+00 : f32
    %26 = vector.broadcast %cst_8 : f32 to vector<8x128xf32>
    %27 = arith.addf %26, %25 : vector<8x128xf32>
    %28 = arith.divf %26, %27 : vector<8x128xf32>
    %29 = vector.extract_strided_slice %22 {offsets = [0, 128], sizes = [8, 128], strides = [1, 1]} : vector<8x512xf32> to vector<8x128xf32>
    %30 = arith.negf %29 : vector<8x128xf32>
    %31 = math.exp %30 : vector<8x128xf32>
    %cst_9 = arith.constant 1.000000e+00 : f32
    %32 = vector.broadcast %cst_9 : f32 to vector<8x128xf32>
    %33 = arith.addf %32, %31 : vector<8x128xf32>
    %34 = arith.divf %32, %33 : vector<8x128xf32>
    %35 = vector.extract_strided_slice %22 {offsets = [0, 256], sizes = [8, 128], strides = [1, 1]} : vector<8x512xf32> to vector<8x128xf32>
    %36 = math.tanh %35 : vector<8x128xf32>
    %37 = vector.extract_strided_slice %22 {offsets = [0, 384], sizes = [8, 128], strides = [1, 1]} : vector<8x512xf32> to vector<8x128xf32>
    %38 = arith.negf %37 : vector<8x128xf32>
    %39 = math.exp %38 : vector<8x128xf32>
    %cst_10 = arith.constant 1.000000e+00 : f32
    %40 = vector.broadcast %cst_10 : f32 to vector<8x128xf32>
    %41 = arith.addf %40, %39 : vector<8x128xf32>
    %42 = arith.divf %40, %41 : vector<8x128xf32>
    %43 = arith.mulf %34, %13 : vector<8x128xf32>
    %44 = arith.mulf %28, %36 : vector<8x128xf32>
    %45 = arith.addf %43, %44 : vector<8x128xf32>
    %46 = math.tanh %45 : vector<8x128xf32>
    %47 = arith.mulf %42, %46 : vector<8x128xf32>
    %c1_i32_11 = arith.constant 1 : i32
    %48 = arith.index_cast %c1_i32_11 : i32 to index
    %c0_12 = arith.constant 0 : index
    %c0_13 = arith.constant 0 : index
    %49 = vector.load %arg1[%48, %c0_12, %c0_13] : memref<8x8x128xf32, #tpu.memory_space<vmem>>, vector<1x8x128xf32>
    %50 = vector.shape_cast %49 : vector<1x8x128xf32> to vector<8x128xf32>
    %51 = arith.addf %50, %47 : vector<8x128xf32>
    %52 = arith.truncf %51 : vector<8x128xf32> to vector<8x128xbf16>
    %c0_14 = arith.constant 0 : index
    %c0_15 = arith.constant 0 : index
    %53 = vector.load %arg2[%c0_14, %c0_15] : memref<128x512xbf16, #tpu.memory_space<vmem>>, vector<128x512xbf16>
    %cst_16 = arith.constant dense<0.000000e+00> : vector<8x512xf32>
    %54 = tpu.matmul %52, %53, %cst_16 {dimension_numbers = #tpu.dot_dimension_numbers<[1], [0], [0], [1], [0, 0, 1, 1], [], []>} : vector<8x128xbf16>, vector<128x512xbf16>, vector<8x512xf32> -> vector<8x512xf32>
    %c0_17 = arith.constant 0 : index
    %c0_18 = arith.constant 0 : index
    %55 = vector.load %arg3[%c0_17, %c0_18] : memref<8x512xf32, #tpu.memory_space<vmem>>, vector<8x512xf32>
    %56 = arith.addf %54, %55 : vector<8x512xf32>
    %57 = vector.extract_strided_slice %56 {offsets = [0, 0], sizes = [8, 128], strides = [1, 1]} : vector<8x512xf32> to vector<8x128xf32>
    %58 = arith.negf %57 : vector<8x128xf32>
    %59 = math.exp %58 : vector<8x128xf32>
    %cst_19 = arith.constant 1.000000e+00 : f32
    %60 = vector.broadcast %cst_19 : f32 to vector<8x128xf32>
    %61 = arith.addf %60, %59 : vector<8x128xf32>
    %62 = arith.divf %60, %61 : vector<8x128xf32>
    %63 = vector.extract_strided_slice %56 {offsets = [0, 128], sizes = [8, 128], strides = [1, 1]} : vector<8x512xf32> to vector<8x128xf32>
    %64 = arith.negf %63 : vector<8x128xf32>
    %65 = math.exp %64 : vector<8x128xf32>
    %cst_20 = arith.constant 1.000000e+00 : f32
    %66 = vector.broadcast %cst_20 : f32 to vector<8x128xf32>
    %67 = arith.addf %66, %65 : vector<8x128xf32>
    %68 = arith.divf %66, %67 : vector<8x128xf32>
    %69 = vector.extract_strided_slice %56 {offsets = [0, 256], sizes = [8, 128], strides = [1, 1]} : vector<8x512xf32> to vector<8x128xf32>
    %70 = math.tanh %69 : vector<8x128xf32>
    %71 = vector.extract_strided_slice %56 {offsets = [0, 384], sizes = [8, 128], strides = [1, 1]} : vector<8x512xf32> to vector<8x128xf32>
    %72 = arith.negf %71 : vector<8x128xf32>
    %73 = math.exp %72 : vector<8x128xf32>
    %cst_21 = arith.constant 1.000000e+00 : f32
    %74 = vector.broadcast %cst_21 : f32 to vector<8x128xf32>
    %75 = arith.addf %74, %73 : vector<8x128xf32>
    %76 = arith.divf %74, %75 : vector<8x128xf32>
    %77 = arith.mulf %68, %45 : vector<8x128xf32>
    %78 = arith.mulf %62, %70 : vector<8x128xf32>
    %79 = arith.addf %77, %78 : vector<8x128xf32>
    %80 = math.tanh %79 : vector<8x128xf32>
    %81 = arith.mulf %76, %80 : vector<8x128xf32>
    %c2_i32_22 = arith.constant 2 : i32
    %82 = arith.index_cast %c2_i32_22 : i32 to index
    %c0_23 = arith.constant 0 : index
    %c0_24 = arith.constant 0 : index
    %83 = vector.load %arg1[%82, %c0_23, %c0_24] : memref<8x8x128xf32, #tpu.memory_space<vmem>>, vector<1x8x128xf32>
    %84 = vector.shape_cast %83 : vector<1x8x128xf32> to vector<8x128xf32>
    %85 = arith.addf %84, %81 : vector<8x128xf32>
    %86 = arith.truncf %85 : vector<8x128xf32> to vector<8x128xbf16>
    %c0_25 = arith.constant 0 : index
    %c0_26 = arith.constant 0 : index
    %87 = vector.load %arg2[%c0_25, %c0_26] : memref<128x512xbf16, #tpu.memory_space<vmem>>, vector<128x512xbf16>
    %cst_27 = arith.constant dense<0.000000e+00> : vector<8x512xf32>
    %88 = tpu.matmul %86, %87, %cst_27 {dimension_numbers = #tpu.dot_dimension_numbers<[1], [0], [0], [1], [0, 0, 1, 1], [], []>} : vector<8x128xbf16>, vector<128x512xbf16>, vector<8x512xf32> -> vector<8x512xf32>
    %c0_28 = arith.constant 0 : index
    %c0_29 = arith.constant 0 : index
    %89 = vector.load %arg3[%c0_28, %c0_29] : memref<8x512xf32, #tpu.memory_space<vmem>>, vector<8x512xf32>
    %90 = arith.addf %88, %89 : vector<8x512xf32>
    %91 = vector.extract_strided_slice %90 {offsets = [0, 0], sizes = [8, 128], strides = [1, 1]} : vector<8x512xf32> to vector<8x128xf32>
    %92 = arith.negf %91 : vector<8x128xf32>
    %93 = math.exp %92 : vector<8x128xf32>
    %cst_30 = arith.constant 1.000000e+00 : f32
    %94 = vector.broadcast %cst_30 : f32 to vector<8x128xf32>
    %95 = arith.addf %94, %93 : vector<8x128xf32>
    %96 = arith.divf %94, %95 : vector<8x128xf32>
    %97 = vector.extract_strided_slice %90 {offsets = [0, 128], sizes = [8, 128], strides = [1, 1]} : vector<8x512xf32> to vector<8x128xf32>
    %98 = arith.negf %97 : vector<8x128xf32>
    %99 = math.exp %98 : vector<8x128xf32>
    %cst_31 = arith.constant 1.000000e+00 : f32
    %100 = vector.broadcast %cst_31 : f32 to vector<8x128xf32>
    %101 = arith.addf %100, %99 : vector<8x128xf32>
    %102 = arith.divf %100, %101 : vector<8x128xf32>
    %103 = vector.extract_strided_slice %90 {offsets = [0, 256], sizes = [8, 128], strides = [1, 1]} : vector<8x512xf32> to vector<8x128xf32>
    %104 = math.tanh %103 : vector<8x128xf32>
    %105 = vector.extract_strided_slice %90 {offsets = [0, 384], sizes = [8, 128], strides = [1, 1]} : vector<8x512xf32> to vector<8x128xf32>
    %106 = arith.negf %105 : vector<8x128xf32>
    %107 = math.exp %106 : vector<8x128xf32>
    %cst_32 = arith.constant 1.000000e+00 : f32
    %108 = vector.broadcast %cst_32 : f32 to vector<8x128xf32>
    %109 = arith.addf %108, %107 : vector<8x128xf32>
    %110 = arith.divf %108, %109 : vector<8x128xf32>
    %111 = arith.mulf %102, %79 : vector<8x128xf32>
    %112 = arith.mulf %96, %104 : vector<8x128xf32>
    %113 = arith.addf %111, %112 : vector<8x128xf32>
    %114 = math.tanh %113 : vector<8x128xf32>
    %115 = arith.mulf %110, %114 : vector<8x128xf32>
    %c3_i32_33 = arith.constant 3 : i32
    %116 = arith.index_cast %c3_i32_33 : i32 to index
    %c0_34 = arith.constant 0 : index
    %c0_35 = arith.constant 0 : index
    %117 = vector.load %arg1[%116, %c0_34, %c0_35] : memref<8x8x128xf32, #tpu.memory_space<vmem>>, vector<1x8x128xf32>
    %118 = vector.shape_cast %117 : vector<1x8x128xf32> to vector<8x128xf32>
    %119 = arith.addf %118, %115 : vector<8x128xf32>
    %120 = arith.truncf %119 : vector<8x128xf32> to vector<8x128xbf16>
    %c0_36 = arith.constant 0 : index
    %c0_37 = arith.constant 0 : index
    %121 = vector.load %arg2[%c0_36, %c0_37] : memref<128x512xbf16, #tpu.memory_space<vmem>>, vector<128x512xbf16>
    %cst_38 = arith.constant dense<0.000000e+00> : vector<8x512xf32>
    %122 = tpu.matmul %120, %121, %cst_38 {dimension_numbers = #tpu.dot_dimension_numbers<[1], [0], [0], [1], [0, 0, 1, 1], [], []>} : vector<8x128xbf16>, vector<128x512xbf16>, vector<8x512xf32> -> vector<8x512xf32>
    %c0_39 = arith.constant 0 : index
    %c0_40 = arith.constant 0 : index
    %123 = vector.load %arg3[%c0_39, %c0_40] : memref<8x512xf32, #tpu.memory_space<vmem>>, vector<8x512xf32>
    %124 = arith.addf %122, %123 : vector<8x512xf32>
    %125 = vector.extract_strided_slice %124 {offsets = [0, 0], sizes = [8, 128], strides = [1, 1]} : vector<8x512xf32> to vector<8x128xf32>
    %126 = arith.negf %125 : vector<8x128xf32>
    %127 = math.exp %126 : vector<8x128xf32>
    %cst_41 = arith.constant 1.000000e+00 : f32
    %128 = vector.broadcast %cst_41 : f32 to vector<8x128xf32>
    %129 = arith.addf %128, %127 : vector<8x128xf32>
    %130 = arith.divf %128, %129 : vector<8x128xf32>
    %131 = vector.extract_strided_slice %124 {offsets = [0, 128], sizes = [8, 128], strides = [1, 1]} : vector<8x512xf32> to vector<8x128xf32>
    %132 = arith.negf %131 : vector<8x128xf32>
    %133 = math.exp %132 : vector<8x128xf32>
    %cst_42 = arith.constant 1.000000e+00 : f32
    %134 = vector.broadcast %cst_42 : f32 to vector<8x128xf32>
    %135 = arith.addf %134, %133 : vector<8x128xf32>
    %136 = arith.divf %134, %135 : vector<8x128xf32>
    %137 = vector.extract_strided_slice %124 {offsets = [0, 256], sizes = [8, 128], strides = [1, 1]} : vector<8x512xf32> to vector<8x128xf32>
    %138 = math.tanh %137 : vector<8x128xf32>
    %139 = vector.extract_strided_slice %124 {offsets = [0, 384], sizes = [8, 128], strides = [1, 1]} : vector<8x512xf32> to vector<8x128xf32>
    %140 = arith.negf %139 : vector<8x128xf32>
    %141 = math.exp %140 : vector<8x128xf32>
    %cst_43 = arith.constant 1.000000e+00 : f32
    %142 = vector.broadcast %cst_43 : f32 to vector<8x128xf32>
    %143 = arith.addf %142, %141 : vector<8x128xf32>
    %144 = arith.divf %142, %143 : vector<8x128xf32>
    %145 = arith.mulf %136, %113 : vector<8x128xf32>
    %146 = arith.mulf %130, %138 : vector<8x128xf32>
    %147 = arith.addf %145, %146 : vector<8x128xf32>
    %148 = math.tanh %147 : vector<8x128xf32>
    %149 = arith.mulf %144, %148 : vector<8x128xf32>
    %c4_i32_44 = arith.constant 4 : i32
    %150 = arith.index_cast %c4_i32_44 : i32 to index
    %c0_45 = arith.constant 0 : index
    %c0_46 = arith.constant 0 : index
    %151 = vector.load %arg1[%150, %c0_45, %c0_46] : memref<8x8x128xf32, #tpu.memory_space<vmem>>, vector<1x8x128xf32>
    %152 = vector.shape_cast %151 : vector<1x8x128xf32> to vector<8x128xf32>
    %153 = arith.addf %152, %149 : vector<8x128xf32>
    %154 = arith.truncf %153 : vector<8x128xf32> to vector<8x128xbf16>
    %c0_47 = arith.constant 0 : index
    %c0_48 = arith.constant 0 : index
    %155 = vector.load %arg2[%c0_47, %c0_48] : memref<128x512xbf16, #tpu.memory_space<vmem>>, vector<128x512xbf16>
    %cst_49 = arith.constant dense<0.000000e+00> : vector<8x512xf32>
    %156 = tpu.matmul %154, %155, %cst_49 {dimension_numbers = #tpu.dot_dimension_numbers<[1], [0], [0], [1], [0, 0, 1, 1], [], []>} : vector<8x128xbf16>, vector<128x512xbf16>, vector<8x512xf32> -> vector<8x512xf32>
    %c0_50 = arith.constant 0 : index
    %c0_51 = arith.constant 0 : index
    %157 = vector.load %arg3[%c0_50, %c0_51] : memref<8x512xf32, #tpu.memory_space<vmem>>, vector<8x512xf32>
    %158 = arith.addf %156, %157 : vector<8x512xf32>
    %159 = vector.extract_strided_slice %158 {offsets = [0, 0], sizes = [8, 128], strides = [1, 1]} : vector<8x512xf32> to vector<8x128xf32>
    %160 = arith.negf %159 : vector<8x128xf32>
    %161 = math.exp %160 : vector<8x128xf32>
    %cst_52 = arith.constant 1.000000e+00 : f32
    %162 = vector.broadcast %cst_52 : f32 to vector<8x128xf32>
    %163 = arith.addf %162, %161 : vector<8x128xf32>
    %164 = arith.divf %162, %163 : vector<8x128xf32>
    %165 = vector.extract_strided_slice %158 {offsets = [0, 128], sizes = [8, 128], strides = [1, 1]} : vector<8x512xf32> to vector<8x128xf32>
    %166 = arith.negf %165 : vector<8x128xf32>
    %167 = math.exp %166 : vector<8x128xf32>
    %cst_53 = arith.constant 1.000000e+00 : f32
    %168 = vector.broadcast %cst_53 : f32 to vector<8x128xf32>
    %169 = arith.addf %168, %167 : vector<8x128xf32>
    %170 = arith.divf %168, %169 : vector<8x128xf32>
    %171 = vector.extract_strided_slice %158 {offsets = [0, 256], sizes = [8, 128], strides = [1, 1]} : vector<8x512xf32> to vector<8x128xf32>
    %172 = math.tanh %171 : vector<8x128xf32>
    %173 = vector.extract_strided_slice %158 {offsets = [0, 384], sizes = [8, 128], strides = [1, 1]} : vector<8x512xf32> to vector<8x128xf32>
    %174 = arith.negf %173 : vector<8x128xf32>
    %175 = math.exp %174 : vector<8x128xf32>
    %cst_54 = arith.constant 1.000000e+00 : f32
    %176 = vector.broadcast %cst_54 : f32 to vector<8x128xf32>
    %177 = arith.addf %176, %175 : vector<8x128xf32>
    %178 = arith.divf %176, %177 : vector<8x128xf32>
    %179 = arith.mulf %170, %147 : vector<8x128xf32>
    %180 = arith.mulf %164, %172 : vector<8x128xf32>
    %181 = arith.addf %179, %180 : vector<8x128xf32>
    %182 = math.tanh %181 : vector<8x128xf32>
    %183 = arith.mulf %178, %182 : vector<8x128xf32>
    %c5_i32_55 = arith.constant 5 : i32
    %184 = arith.index_cast %c5_i32_55 : i32 to index
    %c0_56 = arith.constant 0 : index
    %c0_57 = arith.constant 0 : index
    %185 = vector.load %arg1[%184, %c0_56, %c0_57] : memref<8x8x128xf32, #tpu.memory_space<vmem>>, vector<1x8x128xf32>
    %186 = vector.shape_cast %185 : vector<1x8x128xf32> to vector<8x128xf32>
    %187 = arith.addf %186, %183 : vector<8x128xf32>
    %188 = arith.truncf %187 : vector<8x128xf32> to vector<8x128xbf16>
    %c0_58 = arith.constant 0 : index
    %c0_59 = arith.constant 0 : index
    %189 = vector.load %arg2[%c0_58, %c0_59] : memref<128x512xbf16, #tpu.memory_space<vmem>>, vector<128x512xbf16>
    %cst_60 = arith.constant dense<0.000000e+00> : vector<8x512xf32>
    %190 = tpu.matmul %188, %189, %cst_60 {dimension_numbers = #tpu.dot_dimension_numbers<[1], [0], [0], [1], [0, 0, 1, 1], [], []>} : vector<8x128xbf16>, vector<128x512xbf16>, vector<8x512xf32> -> vector<8x512xf32>
    %c0_61 = arith.constant 0 : index
    %c0_62 = arith.constant 0 : index
    %191 = vector.load %arg3[%c0_61, %c0_62] : memref<8x512xf32, #tpu.memory_space<vmem>>, vector<8x512xf32>
    %192 = arith.addf %190, %191 : vector<8x512xf32>
    %193 = vector.extract_strided_slice %192 {offsets = [0, 0], sizes = [8, 128], strides = [1, 1]} : vector<8x512xf32> to vector<8x128xf32>
    %194 = arith.negf %193 : vector<8x128xf32>
    %195 = math.exp %194 : vector<8x128xf32>
    %cst_63 = arith.constant 1.000000e+00 : f32
    %196 = vector.broadcast %cst_63 : f32 to vector<8x128xf32>
    %197 = arith.addf %196, %195 : vector<8x128xf32>
    %198 = arith.divf %196, %197 : vector<8x128xf32>
    %199 = vector.extract_strided_slice %192 {offsets = [0, 128], sizes = [8, 128], strides = [1, 1]} : vector<8x512xf32> to vector<8x128xf32>
    %200 = arith.negf %199 : vector<8x128xf32>
    %201 = math.exp %200 : vector<8x128xf32>
    %cst_64 = arith.constant 1.000000e+00 : f32
    %202 = vector.broadcast %cst_64 : f32 to vector<8x128xf32>
    %203 = arith.addf %202, %201 : vector<8x128xf32>
    %204 = arith.divf %202, %203 : vector<8x128xf32>
    %205 = vector.extract_strided_slice %192 {offsets = [0, 256], sizes = [8, 128], strides = [1, 1]} : vector<8x512xf32> to vector<8x128xf32>
    %206 = math.tanh %205 : vector<8x128xf32>
    %207 = vector.extract_strided_slice %192 {offsets = [0, 384], sizes = [8, 128], strides = [1, 1]} : vector<8x512xf32> to vector<8x128xf32>
    %208 = arith.negf %207 : vector<8x128xf32>
    %209 = math.exp %208 : vector<8x128xf32>
    %cst_65 = arith.constant 1.000000e+00 : f32
    %210 = vector.broadcast %cst_65 : f32 to vector<8x128xf32>
    %211 = arith.addf %210, %209 : vector<8x128xf32>
    %212 = arith.divf %210, %211 : vector<8x128xf32>
    %213 = arith.mulf %204, %181 : vector<8x128xf32>
    %214 = arith.mulf %198, %206 : vector<8x128xf32>
    %215 = arith.addf %213, %214 : vector<8x128xf32>
    %216 = math.tanh %215 : vector<8x128xf32>
    %217 = arith.mulf %212, %216 : vector<8x128xf32>
    %c6_i32 = arith.constant 6 : i32
    %218 = arith.index_cast %c6_i32 : i32 to index
    %c0_66 = arith.constant 0 : index
    %c0_67 = arith.constant 0 : index
    %219 = vector.load %arg1[%218, %c0_66, %c0_67] : memref<8x8x128xf32, #tpu.memory_space<vmem>>, vector<1x8x128xf32>
    %220 = vector.shape_cast %219 : vector<1x8x128xf32> to vector<8x128xf32>
    %221 = arith.addf %220, %217 : vector<8x128xf32>
    %222 = arith.truncf %221 : vector<8x128xf32> to vector<8x128xbf16>
    %c0_68 = arith.constant 0 : index
    %c0_69 = arith.constant 0 : index
    %223 = vector.load %arg2[%c0_68, %c0_69] : memref<128x512xbf16, #tpu.memory_space<vmem>>, vector<128x512xbf16>
    %cst_70 = arith.constant dense<0.000000e+00> : vector<8x512xf32>
    %224 = tpu.matmul %222, %223, %cst_70 {dimension_numbers = #tpu.dot_dimension_numbers<[1], [0], [0], [1], [0, 0, 1, 1], [], []>} : vector<8x128xbf16>, vector<128x512xbf16>, vector<8x512xf32> -> vector<8x512xf32>
    %c0_71 = arith.constant 0 : index
    %c0_72 = arith.constant 0 : index
    %225 = vector.load %arg3[%c0_71, %c0_72] : memref<8x512xf32, #tpu.memory_space<vmem>>, vector<8x512xf32>
    %226 = arith.addf %224, %225 : vector<8x512xf32>
    %227 = vector.extract_strided_slice %226 {offsets = [0, 0], sizes = [8, 128], strides = [1, 1]} : vector<8x512xf32> to vector<8x128xf32>
    %228 = arith.negf %227 : vector<8x128xf32>
    %229 = math.exp %228 : vector<8x128xf32>
    %cst_73 = arith.constant 1.000000e+00 : f32
    %230 = vector.broadcast %cst_73 : f32 to vector<8x128xf32>
    %231 = arith.addf %230, %229 : vector<8x128xf32>
    %232 = arith.divf %230, %231 : vector<8x128xf32>
    %233 = vector.extract_strided_slice %226 {offsets = [0, 128], sizes = [8, 128], strides = [1, 1]} : vector<8x512xf32> to vector<8x128xf32>
    %234 = arith.negf %233 : vector<8x128xf32>
    %235 = math.exp %234 : vector<8x128xf32>
    %cst_74 = arith.constant 1.000000e+00 : f32
    %236 = vector.broadcast %cst_74 : f32 to vector<8x128xf32>
    %237 = arith.addf %236, %235 : vector<8x128xf32>
    %238 = arith.divf %236, %237 : vector<8x128xf32>
    %239 = vector.extract_strided_slice %226 {offsets = [0, 256], sizes = [8, 128], strides = [1, 1]} : vector<8x512xf32> to vector<8x128xf32>
    %240 = math.tanh %239 : vector<8x128xf32>
    %241 = vector.extract_strided_slice %226 {offsets = [0, 384], sizes = [8, 128], strides = [1, 1]} : vector<8x512xf32> to vector<8x128xf32>
    %242 = arith.negf %241 : vector<8x128xf32>
    %243 = math.exp %242 : vector<8x128xf32>
    %cst_75 = arith.constant 1.000000e+00 : f32
    %244 = vector.broadcast %cst_75 : f32 to vector<8x128xf32>
    %245 = arith.addf %244, %243 : vector<8x128xf32>
    %246 = arith.divf %244, %245 : vector<8x128xf32>
    %247 = arith.mulf %238, %215 : vector<8x128xf32>
    %248 = arith.mulf %232, %240 : vector<8x128xf32>
    %249 = arith.addf %247, %248 : vector<8x128xf32>
    %250 = math.tanh %249 : vector<8x128xf32>
    %251 = arith.mulf %246, %250 : vector<8x128xf32>
    %c7_i32 = arith.constant 7 : i32
    %252 = arith.index_cast %c7_i32 : i32 to index
    %c0_76 = arith.constant 0 : index
    %c0_77 = arith.constant 0 : index
    %253 = vector.load %arg1[%252, %c0_76, %c0_77] : memref<8x8x128xf32, #tpu.memory_space<vmem>>, vector<1x8x128xf32>
    %254 = vector.shape_cast %253 : vector<1x8x128xf32> to vector<8x128xf32>
    %255 = arith.addf %254, %251 : vector<8x128xf32>
    %256 = arith.truncf %255 : vector<8x128xf32> to vector<8x128xbf16>
    %c0_78 = arith.constant 0 : index
    %c0_79 = arith.constant 0 : index
    %257 = vector.load %arg2[%c0_78, %c0_79] : memref<128x512xbf16, #tpu.memory_space<vmem>>, vector<128x512xbf16>
    %cst_80 = arith.constant dense<0.000000e+00> : vector<8x512xf32>
    %258 = tpu.matmul %256, %257, %cst_80 {dimension_numbers = #tpu.dot_dimension_numbers<[1], [0], [0], [1], [0, 0, 1, 1], [], []>} : vector<8x128xbf16>, vector<128x512xbf16>, vector<8x512xf32> -> vector<8x512xf32>
    %c0_81 = arith.constant 0 : index
    %c0_82 = arith.constant 0 : index
    %259 = vector.load %arg3[%c0_81, %c0_82] : memref<8x512xf32, #tpu.memory_space<vmem>>, vector<8x512xf32>
    %260 = arith.addf %258, %259 : vector<8x512xf32>
    %261 = vector.extract_strided_slice %260 {offsets = [0, 0], sizes = [8, 128], strides = [1, 1]} : vector<8x512xf32> to vector<8x128xf32>
    %262 = arith.negf %261 : vector<8x128xf32>
    %263 = math.exp %262 : vector<8x128xf32>
    %cst_83 = arith.constant 1.000000e+00 : f32
    %264 = vector.broadcast %cst_83 : f32 to vector<8x128xf32>
    %265 = arith.addf %264, %263 : vector<8x128xf32>
    %266 = arith.divf %264, %265 : vector<8x128xf32>
    %267 = vector.extract_strided_slice %260 {offsets = [0, 128], sizes = [8, 128], strides = [1, 1]} : vector<8x512xf32> to vector<8x128xf32>
    %268 = arith.negf %267 : vector<8x128xf32>
    %269 = math.exp %268 : vector<8x128xf32>
    %cst_84 = arith.constant 1.000000e+00 : f32
    %270 = vector.broadcast %cst_84 : f32 to vector<8x128xf32>
    %271 = arith.addf %270, %269 : vector<8x128xf32>
    %272 = arith.divf %270, %271 : vector<8x128xf32>
    %273 = vector.extract_strided_slice %260 {offsets = [0, 256], sizes = [8, 128], strides = [1, 1]} : vector<8x512xf32> to vector<8x128xf32>
    %274 = math.tanh %273 : vector<8x128xf32>
    %275 = vector.extract_strided_slice %260 {offsets = [0, 384], sizes = [8, 128], strides = [1, 1]} : vector<8x512xf32> to vector<8x128xf32>
    %276 = arith.negf %275 : vector<8x128xf32>
    %277 = math.exp %276 : vector<8x128xf32>
    %cst_85 = arith.constant 1.000000e+00 : f32
    %278 = vector.broadcast %cst_85 : f32 to vector<8x128xf32>
    %279 = arith.addf %278, %277 : vector<8x128xf32>
    %280 = arith.divf %278, %279 : vector<8x128xf32>
    %281 = arith.mulf %272, %249 : vector<8x128xf32>
    %282 = arith.mulf %266, %274 : vector<8x128xf32>
    %283 = arith.addf %281, %282 : vector<8x128xf32>
    %284 = math.tanh %283 : vector<8x128xf32>
    %285 = arith.mulf %280, %284 : vector<8x128xf32>
    %c8_i32 = arith.constant 8 : i32
    %c0_i32_86 = arith.constant 0 : i32
    %286 = tpu.memref_slice %arg17[%c0_i32_86] : memref<6x!tpu.dma_semaphore, #tpu.memory_space<semaphore_mem>> -> memref<1x!tpu.dma_semaphore, #tpu.memory_space<semaphore_mem>>
    %287 = tpu.memref_squeeze %286 : memref<1x!tpu.dma_semaphore, #tpu.memory_space<semaphore_mem>> -> memref<!tpu.dma_semaphore, #tpu.memory_space<semaphore_mem>>
    tpu.wait_dma2 semaphore(%287 : memref<!tpu.dma_semaphore, #tpu.memory_space<semaphore_mem>>) src(%arg4 : memref<8x8x128xf32, #tpu.memory_space<any>>) dst(%arg11 : memref<8x8x128xf32, #tpu.memory_space<vmem>>)
    %c1_i32_87 = arith.constant 1 : i32
    %288 = tpu.memref_slice %arg17[%c1_i32_87] : memref<6x!tpu.dma_semaphore, #tpu.memory_space<semaphore_mem>> -> memref<1x!tpu.dma_semaphore, #tpu.memory_space<semaphore_mem>>
    %289 = tpu.memref_squeeze %288 : memref<1x!tpu.dma_semaphore, #tpu.memory_space<semaphore_mem>> -> memref<!tpu.dma_semaphore, #tpu.memory_space<semaphore_mem>>
    tpu.wait_dma2 semaphore(%289 : memref<!tpu.dma_semaphore, #tpu.memory_space<semaphore_mem>>) src(%arg5 : memref<128x128xbf16, #tpu.memory_space<any>>) dst(%arg12 : memref<128x128xbf16, #tpu.memory_space<vmem>>)
    %c2_i32_88 = arith.constant 2 : i32
    %290 = tpu.memref_slice %arg17[%c2_i32_88] : memref<6x!tpu.dma_semaphore, #tpu.memory_space<semaphore_mem>> -> memref<1x!tpu.dma_semaphore, #tpu.memory_space<semaphore_mem>>
    %291 = tpu.memref_squeeze %290 : memref<1x!tpu.dma_semaphore, #tpu.memory_space<semaphore_mem>> -> memref<!tpu.dma_semaphore, #tpu.memory_space<semaphore_mem>>
    tpu.wait_dma2 semaphore(%291 : memref<!tpu.dma_semaphore, #tpu.memory_space<semaphore_mem>>) src(%arg6 : memref<128x512xbf16, #tpu.memory_space<any>>) dst(%arg13 : memref<128x512xbf16, #tpu.memory_space<vmem>>)
    %c3_i32_89 = arith.constant 3 : i32
    %292 = tpu.memref_slice %arg17[%c3_i32_89] : memref<6x!tpu.dma_semaphore, #tpu.memory_space<semaphore_mem>> -> memref<1x!tpu.dma_semaphore, #tpu.memory_space<semaphore_mem>>
    %293 = tpu.memref_squeeze %292 : memref<1x!tpu.dma_semaphore, #tpu.memory_space<semaphore_mem>> -> memref<!tpu.dma_semaphore, #tpu.memory_space<semaphore_mem>>
    tpu.wait_dma2 semaphore(%293 : memref<!tpu.dma_semaphore, #tpu.memory_space<semaphore_mem>>) src(%arg7 : memref<8x512xf32, #tpu.memory_space<any>>) dst(%arg14 : memref<8x512xf32, #tpu.memory_space<vmem>>)
    %c4_i32_90 = arith.constant 4 : i32
    %294 = tpu.memref_slice %arg17[%c4_i32_90] : memref<6x!tpu.dma_semaphore, #tpu.memory_space<semaphore_mem>> -> memref<1x!tpu.dma_semaphore, #tpu.memory_space<semaphore_mem>>
    %295 = tpu.memref_squeeze %294 : memref<1x!tpu.dma_semaphore, #tpu.memory_space<semaphore_mem>> -> memref<!tpu.dma_semaphore, #tpu.memory_space<semaphore_mem>>
    tpu.wait_dma2 semaphore(%295 : memref<!tpu.dma_semaphore, #tpu.memory_space<semaphore_mem>>) src(%arg8 : memref<128x128xbf16, #tpu.memory_space<any>>) dst(%arg15 : memref<128x128xbf16, #tpu.memory_space<vmem>>)
    %c5_i32_91 = arith.constant 5 : i32
    %296 = tpu.memref_slice %arg17[%c5_i32_91] : memref<6x!tpu.dma_semaphore, #tpu.memory_space<semaphore_mem>> -> memref<1x!tpu.dma_semaphore, #tpu.memory_space<semaphore_mem>>
    %297 = tpu.memref_squeeze %296 : memref<1x!tpu.dma_semaphore, #tpu.memory_space<semaphore_mem>> -> memref<!tpu.dma_semaphore, #tpu.memory_space<semaphore_mem>>
    tpu.wait_dma2 semaphore(%297 : memref<!tpu.dma_semaphore, #tpu.memory_space<semaphore_mem>>) src(%arg9 : memref<8x128xf32, #tpu.memory_space<any>>) dst(%arg16 : memref<8x128xf32, #tpu.memory_space<vmem>>)
    %cst_92 = arith.constant 0.000000e+00 : f32
    %298 = vector.broadcast %cst_92 : f32 to vector<8x128xf32>
    %c0_93 = arith.constant 0 : index
    %c0_94 = arith.constant 0 : index
    %c0_95 = arith.constant 0 : index
    %299 = vector.load %arg10[%c0_93, %c0_94, %c0_95] : memref<8x8x128xf32, #tpu.memory_space<vmem>>, vector<1x8x128xf32>
    %300 = vector.shape_cast %299 : vector<1x8x128xf32> to vector<8x128xf32>
    %301 = vector.shape_cast %298 : vector<8x128xf32> to vector<1x8x128xf32>
    tpu.vector_store %arg10[%c0_93, %c0_94, %c0_95], %301 {strides = array<i32>} : memref<8x8x128xf32, #tpu.memory_space<vmem>>, vector<1x8x128xf32>,
    %302 = tpu.iota {dimensions = array<i32: 1>} : vector<8x128xi32>
    %c0_96 = arith.constant 0 : index
    %c0_97 = arith.constant 0 : index
    %303 = vector.load %arg12[%c0_96, %c0_97] : memref<128x128xbf16, #tpu.memory_space<vmem>>, vector<128x128xbf16>
    %c0_98 = arith.constant 0 : index
    %c0_99 = arith.constant 0 : index
    %c0_100 = arith.constant 0 : index
    %304 = vector.load %arg11[%c0_98, %c0_99, %c0_100] : memref<8x8x128xf32, #tpu.memory_space<vmem>>, vector<1x8x128xf32>
    %305 = vector.shape_cast %304 : vector<1x8x128xf32> to vector<8x128xf32>
    %c1_i32_101 = arith.constant 1 : i32
    %306 = arith.addf %305, %285 : vector<8x128xf32>
    %307 = arith.truncf %306 : vector<8x128xf32> to vector<8x128xbf16>
    %c0_102 = arith.constant 0 : index
    %c0_103 = arith.constant 0 : index
    %308 = vector.load %arg13[%c0_102, %c0_103] : memref<128x512xbf16, #tpu.memory_space<vmem>>, vector<128x512xbf16>
    %cst_104 = arith.constant dense<0.000000e+00> : vector<8x512xf32>
    %309 = tpu.matmul %307, %308, %cst_104 {dimension_numbers = #tpu.dot_dimension_numbers<[1], [0], [0], [1], [0, 0, 1, 1], [], []>} : vector<8x128xbf16>, vector<128x512xbf16>, vector<8x512xf32> -> vector<8x512xf32>
    %c0_105 = arith.constant 0 : index
    %c0_106 = arith.constant 0 : index
    %310 = vector.load %arg14[%c0_105, %c0_106] : memref<8x512xf32, #tpu.memory_space<vmem>>, vector<8x512xf32>
    %311 = arith.addf %309, %310 : vector<8x512xf32>
    %312 = vector.extract_strided_slice %311 {offsets = [0, 0], sizes = [8, 128], strides = [1, 1]} : vector<8x512xf32> to vector<8x128xf32>
    %313 = arith.negf %312 : vector<8x128xf32>
    %314 = math.exp %313 : vector<8x128xf32>
    %cst_107 = arith.constant 1.000000e+00 : f32
    %315 = vector.broadcast %cst_107 : f32 to vector<8x128xf32>
    %316 = arith.addf %315, %314 : vector<8x128xf32>
    %317 = arith.divf %315, %316 : vector<8x128xf32>
    %318 = vector.extract_strided_slice %311 {offsets = [0, 128], sizes = [8, 128], strides = [1, 1]} : vector<8x512xf32> to vector<8x128xf32>
    %319 = arith.negf %318 : vector<8x128xf32>
    %320 = math.exp %319 : vector<8x128xf32>
    %cst_108 = arith.constant 1.000000e+00 : f32
    %321 = vector.broadcast %cst_108 : f32 to vector<8x128xf32>
    %322 = arith.addf %321, %320 : vector<8x128xf32>
    %323 = arith.divf %321, %322 : vector<8x128xf32>
    %324 = vector.extract_strided_slice %311 {offsets = [0, 256], sizes = [8, 128], strides = [1, 1]} : vector<8x512xf32> to vector<8x128xf32>
    %325 = math.tanh %324 : vector<8x128xf32>
    %326 = vector.extract_strided_slice %311 {offsets = [0, 384], sizes = [8, 128], strides = [1, 1]} : vector<8x512xf32> to vector<8x128xf32>
    %327 = arith.negf %326 : vector<8x128xf32>
    %328 = math.exp %327 : vector<8x128xf32>
    %cst_109 = arith.constant 1.000000e+00 : f32
    %329 = vector.broadcast %cst_109 : f32 to vector<8x128xf32>
    %330 = arith.addf %329, %328 : vector<8x128xf32>
    %331 = arith.divf %329, %330 : vector<8x128xf32>
    %332 = arith.mulf %323, %283 : vector<8x128xf32>
    %333 = arith.mulf %317, %325 : vector<8x128xf32>
    %334 = arith.addf %332, %333 : vector<8x128xf32>
    %335 = math.tanh %334 : vector<8x128xf32>
    %336 = arith.mulf %331, %335 : vector<8x128xf32>
    %337 = arith.truncf %336 : vector<8x128xf32> to vector<8x128xbf16>
    %c0_110 = arith.constant 0 : index
    %c0_111 = arith.constant 0 : index
    %338 = vector.load %arg15[%c0_110, %c0_111] : memref<128x128xbf16, #tpu.memory_space<vmem>>, vector<128x128xbf16>
    %cst_112 = arith.constant dense<0.000000e+00> : vector<8x128xf32>
    %339 = tpu.matmul %337, %338, %cst_112 {dimension_numbers = #tpu.dot_dimension_numbers<[1], [0], [0], [1], [0, 0, 1, 1], [], []>} : vector<8x128xbf16>, vector<128x128xbf16>, vector<8x128xf32> -> vector<8x128xf32>
    %c0_113 = arith.constant 0 : index
    %c0_114 = arith.constant 0 : index
    %340 = vector.load %arg16[%c0_113, %c0_114] : memref<8x128xf32, #tpu.memory_space<vmem>>, vector<8x128xf32>
    %341 = arith.addf %339, %340 : vector<8x128xf32>
    %342 = arith.index_cast %c1_i32_101 : i32 to index
    %c0_115 = arith.constant 0 : index
    %c0_116 = arith.constant 0 : index
    %343 = vector.load %arg10[%342, %c0_115, %c0_116] : memref<8x8x128xf32, #tpu.memory_space<vmem>>, vector<1x8x128xf32>
    %344 = vector.shape_cast %343 : vector<1x8x128xf32> to vector<8x128xf32>
    %345 = vector.shape_cast %341 : vector<8x128xf32> to vector<1x8x128xf32>
    tpu.vector_store %arg10[%342, %c0_115, %c0_116], %345 {strides = array<i32>} : memref<8x8x128xf32, #tpu.memory_space<vmem>>, vector<1x8x128xf32>,
    %346 = arith.index_cast %c1_i32_101 : i32 to index
    %c0_117 = arith.constant 0 : index
    %c0_118 = arith.constant 0 : index
    %347 = vector.load %arg11[%346, %c0_117, %c0_118] : memref<8x8x128xf32, #tpu.memory_space<vmem>>, vector<1x8x128xf32>
    %348 = vector.shape_cast %347 : vector<1x8x128xf32> to vector<8x128xf32>
    %349 = arith.index_cast %c1_i32_101 : i32 to index
    %350 = memref.load %arg0[%349] : memref<8xi32, #tpu.memory_space<smem>>
    %c0_i32_119 = arith.constant 0 : i32
    %351 = arith.cmpi ne, %350, %c0_i32_119 : i32
    %352 = arith.extui %351 : i1 to i32
    %c0_i32_120 = arith.constant 0 : i32
    %353 = arith.cmpi ne, %352, %c0_i32_120 : i32
    %354 = scf.if %353 -> (vector<8x128xf32>) {
      scf.yield %348 : vector<8x128xf32>
    } else {
      %cst_242 = arith.constant dense<0xFF800000> : vector<8xf32>
      %649 = vector.multi_reduction <maximumf>, %341, %cst_242 [1] : vector<8x128xf32> to vector<8xf32>
      %650 = vector.shape_cast %649 : vector<8xf32> to vector<8x1xf32>
      %651 = vector.broadcast %650 : vector<8x1xf32> to vector<8x128xf32>
      %652 = arith.cmpf oeq, %341, %651 : vector<8x128xf32>
      %c128_i32 = arith.constant 128 : i32
      %653 = vector.broadcast %c128_i32 : i32 to vector<8x128xi32>
      %654 = arith.select %652, %302, %653 : vector<8x128xi1>, vector<8x128xi32>
      %cst_243 = arith.constant dense<2147483647> : vector<8xi32>
      %655 = vector.multi_reduction <minsi>, %654, %cst_243 [1] : vector<8x128xi32> to vector<8xi32>
      %656 = vector.shape_cast %655 : vector<8xi32> to vector<8x1xi32>
      %657 = vector.broadcast %656 : vector<8x1xi32> to vector<8x128xi32>
      %658 = arith.cmpi eq, %302, %657 : vector<8x128xi32>
      %659 = arith.extui %658 : vector<8x128xi1> to vector<8x128xi32>
      %660 = arith.sitofp %659 : vector<8x128xi32> to vector<8x128xf32>
      %661 = arith.truncf %660 : vector<8x128xf32> to vector<8x128xbf16>
      %cst_244 = arith.constant dense<0.000000e+00> : vector<8x128xf32>
      %662 = tpu.matmul %661, %303, %cst_244 {dimension_numbers = #tpu.dot_dimension_numbers<[1], [0], [0], [1], [0, 0, 1, 1], [], []>} : vector<8x128xbf16>, vector<128x128xbf16>, vector<8x128xf32> -> vector<8x128xf32>
      scf.yield %662 : vector<8x128xf32>
    }
    %c2_i32_121 = arith.constant 2 : i32
    %355 = arith.addf %354, %336 : vector<8x128xf32>
    %356 = arith.truncf %355 : vector<8x128xf32> to vector<8x128xbf16>
    %c0_122 = arith.constant 0 : index
    %c0_123 = arith.constant 0 : index
    %357 = vector.load %arg13[%c0_122, %c0_123] : memref<128x512xbf16, #tpu.memory_space<vmem>>, vector<128x512xbf16>
    %cst_124 = arith.constant dense<0.000000e+00> : vector<8x512xf32>
    %358 = tpu.matmul %356, %357, %cst_124 {dimension_numbers = #tpu.dot_dimension_numbers<[1], [0], [0], [1], [0, 0, 1, 1], [], []>} : vector<8x128xbf16>, vector<128x512xbf16>, vector<8x512xf32> -> vector<8x512xf32>
    %c0_125 = arith.constant 0 : index
    %c0_126 = arith.constant 0 : index
    %359 = vector.load %arg14[%c0_125, %c0_126] : memref<8x512xf32, #tpu.memory_space<vmem>>, vector<8x512xf32>
    %360 = arith.addf %358, %359 : vector<8x512xf32>
    %361 = vector.extract_strided_slice %360 {offsets = [0, 0], sizes = [8, 128], strides = [1, 1]} : vector<8x512xf32> to vector<8x128xf32>
    %362 = arith.negf %361 : vector<8x128xf32>
    %363 = math.exp %362 : vector<8x128xf32>
    %cst_127 = arith.constant 1.000000e+00 : f32
    %364 = vector.broadcast %cst_127 : f32 to vector<8x128xf32>
    %365 = arith.addf %364, %363 : vector<8x128xf32>
    %366 = arith.divf %364, %365 : vector<8x128xf32>
    %367 = vector.extract_strided_slice %360 {offsets = [0, 128], sizes = [8, 128], strides = [1, 1]} : vector<8x512xf32> to vector<8x128xf32>
    %368 = arith.negf %367 : vector<8x128xf32>
    %369 = math.exp %368 : vector<8x128xf32>
    %cst_128 = arith.constant 1.000000e+00 : f32
    %370 = vector.broadcast %cst_128 : f32 to vector<8x128xf32>
    %371 = arith.addf %370, %369 : vector<8x128xf32>
    %372 = arith.divf %370, %371 : vector<8x128xf32>
    %373 = vector.extract_strided_slice %360 {offsets = [0, 256], sizes = [8, 128], strides = [1, 1]} : vector<8x512xf32> to vector<8x128xf32>
    %374 = math.tanh %373 : vector<8x128xf32>
    %375 = vector.extract_strided_slice %360 {offsets = [0, 384], sizes = [8, 128], strides = [1, 1]} : vector<8x512xf32> to vector<8x128xf32>
    %376 = arith.negf %375 : vector<8x128xf32>
    %377 = math.exp %376 : vector<8x128xf32>
    %cst_129 = arith.constant 1.000000e+00 : f32
    %378 = vector.broadcast %cst_129 : f32 to vector<8x128xf32>
    %379 = arith.addf %378, %377 : vector<8x128xf32>
    %380 = arith.divf %378, %379 : vector<8x128xf32>
    %381 = arith.mulf %372, %334 : vector<8x128xf32>
    %382 = arith.mulf %366, %374 : vector<8x128xf32>
    %383 = arith.addf %381, %382 : vector<8x128xf32>
    %384 = math.tanh %383 : vector<8x128xf32>
    %385 = arith.mulf %380, %384 : vector<8x128xf32>
    %386 = arith.truncf %385 : vector<8x128xf32> to vector<8x128xbf16>
    %c0_130 = arith.constant 0 : index
    %c0_131 = arith.constant 0 : index
    %387 = vector.load %arg15[%c0_130, %c0_131] : memref<128x128xbf16, #tpu.memory_space<vmem>>, vector<128x128xbf16>
    %cst_132 = arith.constant dense<0.000000e+00> : vector<8x128xf32>
    %388 = tpu.matmul %386, %387, %cst_132 {dimension_numbers = #tpu.dot_dimension_numbers<[1], [0], [0], [1], [0, 0, 1, 1], [], []>} : vector<8x128xbf16>, vector<128x128xbf16>, vector<8x128xf32> -> vector<8x128xf32>
    %c0_133 = arith.constant 0 : index
    %c0_134 = arith.constant 0 : index
    %389 = vector.load %arg16[%c0_133, %c0_134] : memref<8x128xf32, #tpu.memory_space<vmem>>, vector<8x128xf32>
    %390 = arith.addf %388, %389 : vector<8x128xf32>
    %391 = arith.index_cast %c2_i32_121 : i32 to index
    %c0_135 = arith.constant 0 : index
    %c0_136 = arith.constant 0 : index
    %392 = vector.load %arg10[%391, %c0_135, %c0_136] : memref<8x8x128xf32, #tpu.memory_space<vmem>>, vector<1x8x128xf32>
    %393 = vector.shape_cast %392 : vector<1x8x128xf32> to vector<8x128xf32>
    %394 = vector.shape_cast %390 : vector<8x128xf32> to vector<1x8x128xf32>
    tpu.vector_store %arg10[%391, %c0_135, %c0_136], %394 {strides = array<i32>} : memref<8x8x128xf32, #tpu.memory_space<vmem>>, vector<1x8x128xf32>,
    %395 = arith.index_cast %c2_i32_121 : i32 to index
    %c0_137 = arith.constant 0 : index
    %c0_138 = arith.constant 0 : index
    %396 = vector.load %arg11[%395, %c0_137, %c0_138] : memref<8x8x128xf32, #tpu.memory_space<vmem>>, vector<1x8x128xf32>
    %397 = vector.shape_cast %396 : vector<1x8x128xf32> to vector<8x128xf32>
    %398 = arith.index_cast %c2_i32_121 : i32 to index
    %399 = memref.load %arg0[%398] : memref<8xi32, #tpu.memory_space<smem>>
    %c0_i32_139 = arith.constant 0 : i32
    %400 = arith.cmpi ne, %399, %c0_i32_139 : i32
    %401 = arith.extui %400 : i1 to i32
    %c0_i32_140 = arith.constant 0 : i32
    %402 = arith.cmpi ne, %401, %c0_i32_140 : i32
    %403 = scf.if %402 -> (vector<8x128xf32>) {
      scf.yield %397 : vector<8x128xf32>
    } else {
      %cst_242 = arith.constant dense<0xFF800000> : vector<8xf32>
      %649 = vector.multi_reduction <maximumf>, %390, %cst_242 [1] : vector<8x128xf32> to vector<8xf32>
      %650 = vector.shape_cast %649 : vector<8xf32> to vector<8x1xf32>
      %651 = vector.broadcast %650 : vector<8x1xf32> to vector<8x128xf32>
      %652 = arith.cmpf oeq, %390, %651 : vector<8x128xf32>
      %c128_i32 = arith.constant 128 : i32
      %653 = vector.broadcast %c128_i32 : i32 to vector<8x128xi32>
      %654 = arith.select %652, %302, %653 : vector<8x128xi1>, vector<8x128xi32>
      %cst_243 = arith.constant dense<2147483647> : vector<8xi32>
      %655 = vector.multi_reduction <minsi>, %654, %cst_243 [1] : vector<8x128xi32> to vector<8xi32>
      %656 = vector.shape_cast %655 : vector<8xi32> to vector<8x1xi32>
      %657 = vector.broadcast %656 : vector<8x1xi32> to vector<8x128xi32>
      %658 = arith.cmpi eq, %302, %657 : vector<8x128xi32>
      %659 = arith.extui %658 : vector<8x128xi1> to vector<8x128xi32>
      %660 = arith.sitofp %659 : vector<8x128xi32> to vector<8x128xf32>
      %661 = arith.truncf %660 : vector<8x128xf32> to vector<8x128xbf16>
      %cst_244 = arith.constant dense<0.000000e+00> : vector<8x128xf32>
      %662 = tpu.matmul %661, %303, %cst_244 {dimension_numbers = #tpu.dot_dimension_numbers<[1], [0], [0], [1], [0, 0, 1, 1], [], []>} : vector<8x128xbf16>, vector<128x128xbf16>, vector<8x128xf32> -> vector<8x128xf32>
      scf.yield %662 : vector<8x128xf32>
    }
    %c3_i32_141 = arith.constant 3 : i32
    %404 = arith.addf %403, %385 : vector<8x128xf32>
    %405 = arith.truncf %404 : vector<8x128xf32> to vector<8x128xbf16>
    %c0_142 = arith.constant 0 : index
    %c0_143 = arith.constant 0 : index
    %406 = vector.load %arg13[%c0_142, %c0_143] : memref<128x512xbf16, #tpu.memory_space<vmem>>, vector<128x512xbf16>
    %cst_144 = arith.constant dense<0.000000e+00> : vector<8x512xf32>
    %407 = tpu.matmul %405, %406, %cst_144 {dimension_numbers = #tpu.dot_dimension_numbers<[1], [0], [0], [1], [0, 0, 1, 1], [], []>} : vector<8x128xbf16>, vector<128x512xbf16>, vector<8x512xf32> -> vector<8x512xf32>
    %c0_145 = arith.constant 0 : index
    %c0_146 = arith.constant 0 : index
    %408 = vector.load %arg14[%c0_145, %c0_146] : memref<8x512xf32, #tpu.memory_space<vmem>>, vector<8x512xf32>
    %409 = arith.addf %407, %408 : vector<8x512xf32>
    %410 = vector.extract_strided_slice %409 {offsets = [0, 0], sizes = [8, 128], strides = [1, 1]} : vector<8x512xf32> to vector<8x128xf32>
    %411 = arith.negf %410 : vector<8x128xf32>
    %412 = math.exp %411 : vector<8x128xf32>
    %cst_147 = arith.constant 1.000000e+00 : f32
    %413 = vector.broadcast %cst_147 : f32 to vector<8x128xf32>
    %414 = arith.addf %413, %412 : vector<8x128xf32>
    %415 = arith.divf %413, %414 : vector<8x128xf32>
    %416 = vector.extract_strided_slice %409 {offsets = [0, 128], sizes = [8, 128], strides = [1, 1]} : vector<8x512xf32> to vector<8x128xf32>
    %417 = arith.negf %416 : vector<8x128xf32>
    %418 = math.exp %417 : vector<8x128xf32>
    %cst_148 = arith.constant 1.000000e+00 : f32
    %419 = vector.broadcast %cst_148 : f32 to vector<8x128xf32>
    %420 = arith.addf %419, %418 : vector<8x128xf32>
    %421 = arith.divf %419, %420 : vector<8x128xf32>
    %422 = vector.extract_strided_slice %409 {offsets = [0, 256], sizes = [8, 128], strides = [1, 1]} : vector<8x512xf32> to vector<8x128xf32>
    %423 = math.tanh %422 : vector<8x128xf32>
    %424 = vector.extract_strided_slice %409 {offsets = [0, 384], sizes = [8, 128], strides = [1, 1]} : vector<8x512xf32> to vector<8x128xf32>
    %425 = arith.negf %424 : vector<8x128xf32>
    %426 = math.exp %425 : vector<8x128xf32>
    %cst_149 = arith.constant 1.000000e+00 : f32
    %427 = vector.broadcast %cst_149 : f32 to vector<8x128xf32>
    %428 = arith.addf %427, %426 : vector<8x128xf32>
    %429 = arith.divf %427, %428 : vector<8x128xf32>
    %430 = arith.mulf %421, %383 : vector<8x128xf32>
    %431 = arith.mulf %415, %423 : vector<8x128xf32>
    %432 = arith.addf %430, %431 : vector<8x128xf32>
    %433 = math.tanh %432 : vector<8x128xf32>
    %434 = arith.mulf %429, %433 : vector<8x128xf32>
    %435 = arith.truncf %434 : vector<8x128xf32> to vector<8x128xbf16>
    %c0_150 = arith.constant 0 : index
    %c0_151 = arith.constant 0 : index
    %436 = vector.load %arg15[%c0_150, %c0_151] : memref<128x128xbf16, #tpu.memory_space<vmem>>, vector<128x128xbf16>
    %cst_152 = arith.constant dense<0.000000e+00> : vector<8x128xf32>
    %437 = tpu.matmul %435, %436, %cst_152 {dimension_numbers = #tpu.dot_dimension_numbers<[1], [0], [0], [1], [0, 0, 1, 1], [], []>} : vector<8x128xbf16>, vector<128x128xbf16>, vector<8x128xf32> -> vector<8x128xf32>
    %c0_153 = arith.constant 0 : index
    %c0_154 = arith.constant 0 : index
    %438 = vector.load %arg16[%c0_153, %c0_154] : memref<8x128xf32, #tpu.memory_space<vmem>>, vector<8x128xf32>
    %439 = arith.addf %437, %438 : vector<8x128xf32>
    %440 = arith.index_cast %c3_i32_141 : i32 to index
    %c0_155 = arith.constant 0 : index
    %c0_156 = arith.constant 0 : index
    %441 = vector.load %arg10[%440, %c0_155, %c0_156] : memref<8x8x128xf32, #tpu.memory_space<vmem>>, vector<1x8x128xf32>
    %442 = vector.shape_cast %441 : vector<1x8x128xf32> to vector<8x128xf32>
    %443 = vector.shape_cast %439 : vector<8x128xf32> to vector<1x8x128xf32>
    tpu.vector_store %arg10[%440, %c0_155, %c0_156], %443 {strides = array<i32>} : memref<8x8x128xf32, #tpu.memory_space<vmem>>, vector<1x8x128xf32>,
    %444 = arith.index_cast %c3_i32_141 : i32 to index
    %c0_157 = arith.constant 0 : index
    %c0_158 = arith.constant 0 : index
    %445 = vector.load %arg11[%444, %c0_157, %c0_158] : memref<8x8x128xf32, #tpu.memory_space<vmem>>, vector<1x8x128xf32>
    %446 = vector.shape_cast %445 : vector<1x8x128xf32> to vector<8x128xf32>
    %447 = arith.index_cast %c3_i32_141 : i32 to index
    %448 = memref.load %arg0[%447] : memref<8xi32, #tpu.memory_space<smem>>
    %c0_i32_159 = arith.constant 0 : i32
    %449 = arith.cmpi ne, %448, %c0_i32_159 : i32
    %450 = arith.extui %449 : i1 to i32
    %c0_i32_160 = arith.constant 0 : i32
    %451 = arith.cmpi ne, %450, %c0_i32_160 : i32
    %452 = scf.if %451 -> (vector<8x128xf32>) {
      scf.yield %446 : vector<8x128xf32>
    } else {
      %cst_242 = arith.constant dense<0xFF800000> : vector<8xf32>
      %649 = vector.multi_reduction <maximumf>, %439, %cst_242 [1] : vector<8x128xf32> to vector<8xf32>
      %650 = vector.shape_cast %649 : vector<8xf32> to vector<8x1xf32>
      %651 = vector.broadcast %650 : vector<8x1xf32> to vector<8x128xf32>
      %652 = arith.cmpf oeq, %439, %651 : vector<8x128xf32>
      %c128_i32 = arith.constant 128 : i32
      %653 = vector.broadcast %c128_i32 : i32 to vector<8x128xi32>
      %654 = arith.select %652, %302, %653 : vector<8x128xi1>, vector<8x128xi32>
      %cst_243 = arith.constant dense<2147483647> : vector<8xi32>
      %655 = vector.multi_reduction <minsi>, %654, %cst_243 [1] : vector<8x128xi32> to vector<8xi32>
      %656 = vector.shape_cast %655 : vector<8xi32> to vector<8x1xi32>
      %657 = vector.broadcast %656 : vector<8x1xi32> to vector<8x128xi32>
      %658 = arith.cmpi eq, %302, %657 : vector<8x128xi32>
      %659 = arith.extui %658 : vector<8x128xi1> to vector<8x128xi32>
      %660 = arith.sitofp %659 : vector<8x128xi32> to vector<8x128xf32>
      %661 = arith.truncf %660 : vector<8x128xf32> to vector<8x128xbf16>
      %cst_244 = arith.constant dense<0.000000e+00> : vector<8x128xf32>
      %662 = tpu.matmul %661, %303, %cst_244 {dimension_numbers = #tpu.dot_dimension_numbers<[1], [0], [0], [1], [0, 0, 1, 1], [], []>} : vector<8x128xbf16>, vector<128x128xbf16>, vector<8x128xf32> -> vector<8x128xf32>
      scf.yield %662 : vector<8x128xf32>
    }
    %c4_i32_161 = arith.constant 4 : i32
    %453 = arith.addf %452, %434 : vector<8x128xf32>
    %454 = arith.truncf %453 : vector<8x128xf32> to vector<8x128xbf16>
    %c0_162 = arith.constant 0 : index
    %c0_163 = arith.constant 0 : index
    %455 = vector.load %arg13[%c0_162, %c0_163] : memref<128x512xbf16, #tpu.memory_space<vmem>>, vector<128x512xbf16>
    %cst_164 = arith.constant dense<0.000000e+00> : vector<8x512xf32>
    %456 = tpu.matmul %454, %455, %cst_164 {dimension_numbers = #tpu.dot_dimension_numbers<[1], [0], [0], [1], [0, 0, 1, 1], [], []>} : vector<8x128xbf16>, vector<128x512xbf16>, vector<8x512xf32> -> vector<8x512xf32>
    %c0_165 = arith.constant 0 : index
    %c0_166 = arith.constant 0 : index
    %457 = vector.load %arg14[%c0_165, %c0_166] : memref<8x512xf32, #tpu.memory_space<vmem>>, vector<8x512xf32>
    %458 = arith.addf %456, %457 : vector<8x512xf32>
    %459 = vector.extract_strided_slice %458 {offsets = [0, 0], sizes = [8, 128], strides = [1, 1]} : vector<8x512xf32> to vector<8x128xf32>
    %460 = arith.negf %459 : vector<8x128xf32>
    %461 = math.exp %460 : vector<8x128xf32>
    %cst_167 = arith.constant 1.000000e+00 : f32
    %462 = vector.broadcast %cst_167 : f32 to vector<8x128xf32>
    %463 = arith.addf %462, %461 : vector<8x128xf32>
    %464 = arith.divf %462, %463 : vector<8x128xf32>
    %465 = vector.extract_strided_slice %458 {offsets = [0, 128], sizes = [8, 128], strides = [1, 1]} : vector<8x512xf32> to vector<8x128xf32>
    %466 = arith.negf %465 : vector<8x128xf32>
    %467 = math.exp %466 : vector<8x128xf32>
    %cst_168 = arith.constant 1.000000e+00 : f32
    %468 = vector.broadcast %cst_168 : f32 to vector<8x128xf32>
    %469 = arith.addf %468, %467 : vector<8x128xf32>
    %470 = arith.divf %468, %469 : vector<8x128xf32>
    %471 = vector.extract_strided_slice %458 {offsets = [0, 256], sizes = [8, 128], strides = [1, 1]} : vector<8x512xf32> to vector<8x128xf32>
    %472 = math.tanh %471 : vector<8x128xf32>
    %473 = vector.extract_strided_slice %458 {offsets = [0, 384], sizes = [8, 128], strides = [1, 1]} : vector<8x512xf32> to vector<8x128xf32>
    %474 = arith.negf %473 : vector<8x128xf32>
    %475 = math.exp %474 : vector<8x128xf32>
    %cst_169 = arith.constant 1.000000e+00 : f32
    %476 = vector.broadcast %cst_169 : f32 to vector<8x128xf32>
    %477 = arith.addf %476, %475 : vector<8x128xf32>
    %478 = arith.divf %476, %477 : vector<8x128xf32>
    %479 = arith.mulf %470, %432 : vector<8x128xf32>
    %480 = arith.mulf %464, %472 : vector<8x128xf32>
    %481 = arith.addf %479, %480 : vector<8x128xf32>
    %482 = math.tanh %481 : vector<8x128xf32>
    %483 = arith.mulf %478, %482 : vector<8x128xf32>
    %484 = arith.truncf %483 : vector<8x128xf32> to vector<8x128xbf16>
    %c0_170 = arith.constant 0 : index
    %c0_171 = arith.constant 0 : index
    %485 = vector.load %arg15[%c0_170, %c0_171] : memref<128x128xbf16, #tpu.memory_space<vmem>>, vector<128x128xbf16>
    %cst_172 = arith.constant dense<0.000000e+00> : vector<8x128xf32>
    %486 = tpu.matmul %484, %485, %cst_172 {dimension_numbers = #tpu.dot_dimension_numbers<[1], [0], [0], [1], [0, 0, 1, 1], [], []>} : vector<8x128xbf16>, vector<128x128xbf16>, vector<8x128xf32> -> vector<8x128xf32>
    %c0_173 = arith.constant 0 : index
    %c0_174 = arith.constant 0 : index
    %487 = vector.load %arg16[%c0_173, %c0_174] : memref<8x128xf32, #tpu.memory_space<vmem>>, vector<8x128xf32>
    %488 = arith.addf %486, %487 : vector<8x128xf32>
    %489 = arith.index_cast %c4_i32_161 : i32 to index
    %c0_175 = arith.constant 0 : index
    %c0_176 = arith.constant 0 : index
    %490 = vector.load %arg10[%489, %c0_175, %c0_176] : memref<8x8x128xf32, #tpu.memory_space<vmem>>, vector<1x8x128xf32>
    %491 = vector.shape_cast %490 : vector<1x8x128xf32> to vector<8x128xf32>
    %492 = vector.shape_cast %488 : vector<8x128xf32> to vector<1x8x128xf32>
    tpu.vector_store %arg10[%489, %c0_175, %c0_176], %492 {strides = array<i32>} : memref<8x8x128xf32, #tpu.memory_space<vmem>>, vector<1x8x128xf32>,
    %493 = arith.index_cast %c4_i32_161 : i32 to index
    %c0_177 = arith.constant 0 : index
    %c0_178 = arith.constant 0 : index
    %494 = vector.load %arg11[%493, %c0_177, %c0_178] : memref<8x8x128xf32, #tpu.memory_space<vmem>>, vector<1x8x128xf32>
    %495 = vector.shape_cast %494 : vector<1x8x128xf32> to vector<8x128xf32>
    %496 = arith.index_cast %c4_i32_161 : i32 to index
    %497 = memref.load %arg0[%496] : memref<8xi32, #tpu.memory_space<smem>>
    %c0_i32_179 = arith.constant 0 : i32
    %498 = arith.cmpi ne, %497, %c0_i32_179 : i32
    %499 = arith.extui %498 : i1 to i32
    %c0_i32_180 = arith.constant 0 : i32
    %500 = arith.cmpi ne, %499, %c0_i32_180 : i32
    %501 = scf.if %500 -> (vector<8x128xf32>) {
      scf.yield %495 : vector<8x128xf32>
    } else {
      %cst_242 = arith.constant dense<0xFF800000> : vector<8xf32>
      %649 = vector.multi_reduction <maximumf>, %488, %cst_242 [1] : vector<8x128xf32> to vector<8xf32>
      %650 = vector.shape_cast %649 : vector<8xf32> to vector<8x1xf32>
      %651 = vector.broadcast %650 : vector<8x1xf32> to vector<8x128xf32>
      %652 = arith.cmpf oeq, %488, %651 : vector<8x128xf32>
      %c128_i32 = arith.constant 128 : i32
      %653 = vector.broadcast %c128_i32 : i32 to vector<8x128xi32>
      %654 = arith.select %652, %302, %653 : vector<8x128xi1>, vector<8x128xi32>
      %cst_243 = arith.constant dense<2147483647> : vector<8xi32>
      %655 = vector.multi_reduction <minsi>, %654, %cst_243 [1] : vector<8x128xi32> to vector<8xi32>
      %656 = vector.shape_cast %655 : vector<8xi32> to vector<8x1xi32>
      %657 = vector.broadcast %656 : vector<8x1xi32> to vector<8x128xi32>
      %658 = arith.cmpi eq, %302, %657 : vector<8x128xi32>
      %659 = arith.extui %658 : vector<8x128xi1> to vector<8x128xi32>
      %660 = arith.sitofp %659 : vector<8x128xi32> to vector<8x128xf32>
      %661 = arith.truncf %660 : vector<8x128xf32> to vector<8x128xbf16>
      %cst_244 = arith.constant dense<0.000000e+00> : vector<8x128xf32>
      %662 = tpu.matmul %661, %303, %cst_244 {dimension_numbers = #tpu.dot_dimension_numbers<[1], [0], [0], [1], [0, 0, 1, 1], [], []>} : vector<8x128xbf16>, vector<128x128xbf16>, vector<8x128xf32> -> vector<8x128xf32>
      scf.yield %662 : vector<8x128xf32>
    }
    %c5_i32_181 = arith.constant 5 : i32
    %502 = arith.addf %501, %483 : vector<8x128xf32>
    %503 = arith.truncf %502 : vector<8x128xf32> to vector<8x128xbf16>
    %c0_182 = arith.constant 0 : index
    %c0_183 = arith.constant 0 : index
    %504 = vector.load %arg13[%c0_182, %c0_183] : memref<128x512xbf16, #tpu.memory_space<vmem>>, vector<128x512xbf16>
    %cst_184 = arith.constant dense<0.000000e+00> : vector<8x512xf32>
    %505 = tpu.matmul %503, %504, %cst_184 {dimension_numbers = #tpu.dot_dimension_numbers<[1], [0], [0], [1], [0, 0, 1, 1], [], []>} : vector<8x128xbf16>, vector<128x512xbf16>, vector<8x512xf32> -> vector<8x512xf32>
    %c0_185 = arith.constant 0 : index
    %c0_186 = arith.constant 0 : index
    %506 = vector.load %arg14[%c0_185, %c0_186] : memref<8x512xf32, #tpu.memory_space<vmem>>, vector<8x512xf32>
    %507 = arith.addf %505, %506 : vector<8x512xf32>
    %508 = vector.extract_strided_slice %507 {offsets = [0, 0], sizes = [8, 128], strides = [1, 1]} : vector<8x512xf32> to vector<8x128xf32>
    %509 = arith.negf %508 : vector<8x128xf32>
    %510 = math.exp %509 : vector<8x128xf32>
    %cst_187 = arith.constant 1.000000e+00 : f32
    %511 = vector.broadcast %cst_187 : f32 to vector<8x128xf32>
    %512 = arith.addf %511, %510 : vector<8x128xf32>
    %513 = arith.divf %511, %512 : vector<8x128xf32>
    %514 = vector.extract_strided_slice %507 {offsets = [0, 128], sizes = [8, 128], strides = [1, 1]} : vector<8x512xf32> to vector<8x128xf32>
    %515 = arith.negf %514 : vector<8x128xf32>
    %516 = math.exp %515 : vector<8x128xf32>
    %cst_188 = arith.constant 1.000000e+00 : f32
    %517 = vector.broadcast %cst_188 : f32 to vector<8x128xf32>
    %518 = arith.addf %517, %516 : vector<8x128xf32>
    %519 = arith.divf %517, %518 : vector<8x128xf32>
    %520 = vector.extract_strided_slice %507 {offsets = [0, 256], sizes = [8, 128], strides = [1, 1]} : vector<8x512xf32> to vector<8x128xf32>
    %521 = math.tanh %520 : vector<8x128xf32>
    %522 = vector.extract_strided_slice %507 {offsets = [0, 384], sizes = [8, 128], strides = [1, 1]} : vector<8x512xf32> to vector<8x128xf32>
    %523 = arith.negf %522 : vector<8x128xf32>
    %524 = math.exp %523 : vector<8x128xf32>
    %cst_189 = arith.constant 1.000000e+00 : f32
    %525 = vector.broadcast %cst_189 : f32 to vector<8x128xf32>
    %526 = arith.addf %525, %524 : vector<8x128xf32>
    %527 = arith.divf %525, %526 : vector<8x128xf32>
    %528 = arith.mulf %519, %481 : vector<8x128xf32>
    %529 = arith.mulf %513, %521 : vector<8x128xf32>
    %530 = arith.addf %528, %529 : vector<8x128xf32>
    %531 = math.tanh %530 : vector<8x128xf32>
    %532 = arith.mulf %527, %531 : vector<8x128xf32>
    %533 = arith.truncf %532 : vector<8x128xf32> to vector<8x128xbf16>
    %c0_190 = arith.constant 0 : index
    %c0_191 = arith.constant 0 : index
    %534 = vector.load %arg15[%c0_190, %c0_191] : memref<128x128xbf16, #tpu.memory_space<vmem>>, vector<128x128xbf16>
    %cst_192 = arith.constant dense<0.000000e+00> : vector<8x128xf32>
    %535 = tpu.matmul %533, %534, %cst_192 {dimension_numbers = #tpu.dot_dimension_numbers<[1], [0], [0], [1], [0, 0, 1, 1], [], []>} : vector<8x128xbf16>, vector<128x128xbf16>, vector<8x128xf32> -> vector<8x128xf32>
    %c0_193 = arith.constant 0 : index
    %c0_194 = arith.constant 0 : index
    %536 = vector.load %arg16[%c0_193, %c0_194] : memref<8x128xf32, #tpu.memory_space<vmem>>, vector<8x128xf32>
    %537 = arith.addf %535, %536 : vector<8x128xf32>
    %538 = arith.index_cast %c5_i32_181 : i32 to index
    %c0_195 = arith.constant 0 : index
    %c0_196 = arith.constant 0 : index
    %539 = vector.load %arg10[%538, %c0_195, %c0_196] : memref<8x8x128xf32, #tpu.memory_space<vmem>>, vector<1x8x128xf32>
    %540 = vector.shape_cast %539 : vector<1x8x128xf32> to vector<8x128xf32>
    %541 = vector.shape_cast %537 : vector<8x128xf32> to vector<1x8x128xf32>
    tpu.vector_store %arg10[%538, %c0_195, %c0_196], %541 {strides = array<i32>} : memref<8x8x128xf32, #tpu.memory_space<vmem>>, vector<1x8x128xf32>,
    %542 = arith.index_cast %c5_i32_181 : i32 to index
    %c0_197 = arith.constant 0 : index
    %c0_198 = arith.constant 0 : index
    %543 = vector.load %arg11[%542, %c0_197, %c0_198] : memref<8x8x128xf32, #tpu.memory_space<vmem>>, vector<1x8x128xf32>
    %544 = vector.shape_cast %543 : vector<1x8x128xf32> to vector<8x128xf32>
    %545 = arith.index_cast %c5_i32_181 : i32 to index
    %546 = memref.load %arg0[%545] : memref<8xi32, #tpu.memory_space<smem>>
    %c0_i32_199 = arith.constant 0 : i32
    %547 = arith.cmpi ne, %546, %c0_i32_199 : i32
    %548 = arith.extui %547 : i1 to i32
    %c0_i32_200 = arith.constant 0 : i32
    %549 = arith.cmpi ne, %548, %c0_i32_200 : i32
    %550 = scf.if %549 -> (vector<8x128xf32>) {
      scf.yield %544 : vector<8x128xf32>
    } else {
      %cst_242 = arith.constant dense<0xFF800000> : vector<8xf32>
      %649 = vector.multi_reduction <maximumf>, %537, %cst_242 [1] : vector<8x128xf32> to vector<8xf32>
      %650 = vector.shape_cast %649 : vector<8xf32> to vector<8x1xf32>
      %651 = vector.broadcast %650 : vector<8x1xf32> to vector<8x128xf32>
      %652 = arith.cmpf oeq, %537, %651 : vector<8x128xf32>
      %c128_i32 = arith.constant 128 : i32
      %653 = vector.broadcast %c128_i32 : i32 to vector<8x128xi32>
      %654 = arith.select %652, %302, %653 : vector<8x128xi1>, vector<8x128xi32>
      %cst_243 = arith.constant dense<2147483647> : vector<8xi32>
      %655 = vector.multi_reduction <minsi>, %654, %cst_243 [1] : vector<8x128xi32> to vector<8xi32>
      %656 = vector.shape_cast %655 : vector<8xi32> to vector<8x1xi32>
      %657 = vector.broadcast %656 : vector<8x1xi32> to vector<8x128xi32>
      %658 = arith.cmpi eq, %302, %657 : vector<8x128xi32>
      %659 = arith.extui %658 : vector<8x128xi1> to vector<8x128xi32>
      %660 = arith.sitofp %659 : vector<8x128xi32> to vector<8x128xf32>
      %661 = arith.truncf %660 : vector<8x128xf32> to vector<8x128xbf16>
      %cst_244 = arith.constant dense<0.000000e+00> : vector<8x128xf32>
      %662 = tpu.matmul %661, %303, %cst_244 {dimension_numbers = #tpu.dot_dimension_numbers<[1], [0], [0], [1], [0, 0, 1, 1], [], []>} : vector<8x128xbf16>, vector<128x128xbf16>, vector<8x128xf32> -> vector<8x128xf32>
      scf.yield %662 : vector<8x128xf32>
    }
    %c6_i32_201 = arith.constant 6 : i32
    %551 = arith.addf %550, %532 : vector<8x128xf32>
    %552 = arith.truncf %551 : vector<8x128xf32> to vector<8x128xbf16>
    %c0_202 = arith.constant 0 : index
    %c0_203 = arith.constant 0 : index
    %553 = vector.load %arg13[%c0_202, %c0_203] : memref<128x512xbf16, #tpu.memory_space<vmem>>, vector<128x512xbf16>
    %cst_204 = arith.constant dense<0.000000e+00> : vector<8x512xf32>
    %554 = tpu.matmul %552, %553, %cst_204 {dimension_numbers = #tpu.dot_dimension_numbers<[1], [0], [0], [1], [0, 0, 1, 1], [], []>} : vector<8x128xbf16>, vector<128x512xbf16>, vector<8x512xf32> -> vector<8x512xf32>
    %c0_205 = arith.constant 0 : index
    %c0_206 = arith.constant 0 : index
    %555 = vector.load %arg14[%c0_205, %c0_206] : memref<8x512xf32, #tpu.memory_space<vmem>>, vector<8x512xf32>
    %556 = arith.addf %554, %555 : vector<8x512xf32>
    %557 = vector.extract_strided_slice %556 {offsets = [0, 0], sizes = [8, 128], strides = [1, 1]} : vector<8x512xf32> to vector<8x128xf32>
    %558 = arith.negf %557 : vector<8x128xf32>
    %559 = math.exp %558 : vector<8x128xf32>
    %cst_207 = arith.constant 1.000000e+00 : f32
    %560 = vector.broadcast %cst_207 : f32 to vector<8x128xf32>
    %561 = arith.addf %560, %559 : vector<8x128xf32>
    %562 = arith.divf %560, %561 : vector<8x128xf32>
    %563 = vector.extract_strided_slice %556 {offsets = [0, 128], sizes = [8, 128], strides = [1, 1]} : vector<8x512xf32> to vector<8x128xf32>
    %564 = arith.negf %563 : vector<8x128xf32>
    %565 = math.exp %564 : vector<8x128xf32>
    %cst_208 = arith.constant 1.000000e+00 : f32
    %566 = vector.broadcast %cst_208 : f32 to vector<8x128xf32>
    %567 = arith.addf %566, %565 : vector<8x128xf32>
    %568 = arith.divf %566, %567 : vector<8x128xf32>
    %569 = vector.extract_strided_slice %556 {offsets = [0, 256], sizes = [8, 128], strides = [1, 1]} : vector<8x512xf32> to vector<8x128xf32>
    %570 = math.tanh %569 : vector<8x128xf32>
    %571 = vector.extract_strided_slice %556 {offsets = [0, 384], sizes = [8, 128], strides = [1, 1]} : vector<8x512xf32> to vector<8x128xf32>
    %572 = arith.negf %571 : vector<8x128xf32>
    %573 = math.exp %572 : vector<8x128xf32>
    %cst_209 = arith.constant 1.000000e+00 : f32
    %574 = vector.broadcast %cst_209 : f32 to vector<8x128xf32>
    %575 = arith.addf %574, %573 : vector<8x128xf32>
    %576 = arith.divf %574, %575 : vector<8x128xf32>
    %577 = arith.mulf %568, %530 : vector<8x128xf32>
    %578 = arith.mulf %562, %570 : vector<8x128xf32>
    %579 = arith.addf %577, %578 : vector<8x128xf32>
    %580 = math.tanh %579 : vector<8x128xf32>
    %581 = arith.mulf %576, %580 : vector<8x128xf32>
    %582 = arith.truncf %581 : vector<8x128xf32> to vector<8x128xbf16>
    %c0_210 = arith.constant 0 : index
    %c0_211 = arith.constant 0 : index
    %583 = vector.load %arg15[%c0_210, %c0_211] : memref<128x128xbf16, #tpu.memory_space<vmem>>, vector<128x128xbf16>
    %cst_212 = arith.constant dense<0.000000e+00> : vector<8x128xf32>
    %584 = tpu.matmul %582, %583, %cst_212 {dimension_numbers = #tpu.dot_dimension_numbers<[1], [0], [0], [1], [0, 0, 1, 1], [], []>} : vector<8x128xbf16>, vector<128x128xbf16>, vector<8x128xf32> -> vector<8x128xf32>
    %c0_213 = arith.constant 0 : index
    %c0_214 = arith.constant 0 : index
    %585 = vector.load %arg16[%c0_213, %c0_214] : memref<8x128xf32, #tpu.memory_space<vmem>>, vector<8x128xf32>
    %586 = arith.addf %584, %585 : vector<8x128xf32>
    %587 = arith.index_cast %c6_i32_201 : i32 to index
    %c0_215 = arith.constant 0 : index
    %c0_216 = arith.constant 0 : index
    %588 = vector.load %arg10[%587, %c0_215, %c0_216] : memref<8x8x128xf32, #tpu.memory_space<vmem>>, vector<1x8x128xf32>
    %589 = vector.shape_cast %588 : vector<1x8x128xf32> to vector<8x128xf32>
    %590 = vector.shape_cast %586 : vector<8x128xf32> to vector<1x8x128xf32>
    tpu.vector_store %arg10[%587, %c0_215, %c0_216], %590 {strides = array<i32>} : memref<8x8x128xf32, #tpu.memory_space<vmem>>, vector<1x8x128xf32>,
    %591 = arith.index_cast %c6_i32_201 : i32 to index
    %c0_217 = arith.constant 0 : index
    %c0_218 = arith.constant 0 : index
    %592 = vector.load %arg11[%591, %c0_217, %c0_218] : memref<8x8x128xf32, #tpu.memory_space<vmem>>, vector<1x8x128xf32>
    %593 = vector.shape_cast %592 : vector<1x8x128xf32> to vector<8x128xf32>
    %594 = arith.index_cast %c6_i32_201 : i32 to index
    %595 = memref.load %arg0[%594] : memref<8xi32, #tpu.memory_space<smem>>
    %c0_i32_219 = arith.constant 0 : i32
    %596 = arith.cmpi ne, %595, %c0_i32_219 : i32
    %597 = arith.extui %596 : i1 to i32
    %c0_i32_220 = arith.constant 0 : i32
    %598 = arith.cmpi ne, %597, %c0_i32_220 : i32
    %599 = scf.if %598 -> (vector<8x128xf32>) {
      scf.yield %593 : vector<8x128xf32>
    } else {
      %cst_242 = arith.constant dense<0xFF800000> : vector<8xf32>
      %649 = vector.multi_reduction <maximumf>, %586, %cst_242 [1] : vector<8x128xf32> to vector<8xf32>
      %650 = vector.shape_cast %649 : vector<8xf32> to vector<8x1xf32>
      %651 = vector.broadcast %650 : vector<8x1xf32> to vector<8x128xf32>
      %652 = arith.cmpf oeq, %586, %651 : vector<8x128xf32>
      %c128_i32 = arith.constant 128 : i32
      %653 = vector.broadcast %c128_i32 : i32 to vector<8x128xi32>
      %654 = arith.select %652, %302, %653 : vector<8x128xi1>, vector<8x128xi32>
      %cst_243 = arith.constant dense<2147483647> : vector<8xi32>
      %655 = vector.multi_reduction <minsi>, %654, %cst_243 [1] : vector<8x128xi32> to vector<8xi32>
      %656 = vector.shape_cast %655 : vector<8xi32> to vector<8x1xi32>
      %657 = vector.broadcast %656 : vector<8x1xi32> to vector<8x128xi32>
      %658 = arith.cmpi eq, %302, %657 : vector<8x128xi32>
      %659 = arith.extui %658 : vector<8x128xi1> to vector<8x128xi32>
      %660 = arith.sitofp %659 : vector<8x128xi32> to vector<8x128xf32>
      %661 = arith.truncf %660 : vector<8x128xf32> to vector<8x128xbf16>
      %cst_244 = arith.constant dense<0.000000e+00> : vector<8x128xf32>
      %662 = tpu.matmul %661, %303, %cst_244 {dimension_numbers = #tpu.dot_dimension_numbers<[1], [0], [0], [1], [0, 0, 1, 1], [], []>} : vector<8x128xbf16>, vector<128x128xbf16>, vector<8x128xf32> -> vector<8x128xf32>
      scf.yield %662 : vector<8x128xf32>
    }
    %c7_i32_221 = arith.constant 7 : i32
    %600 = arith.addf %599, %581 : vector<8x128xf32>
    %601 = arith.truncf %600 : vector<8x128xf32> to vector<8x128xbf16>
    %c0_222 = arith.constant 0 : index
    %c0_223 = arith.constant 0 : index
    %602 = vector.load %arg13[%c0_222, %c0_223] : memref<128x512xbf16, #tpu.memory_space<vmem>>, vector<128x512xbf16>
    %cst_224 = arith.constant dense<0.000000e+00> : vector<8x512xf32>
    %603 = tpu.matmul %601, %602, %cst_224 {dimension_numbers = #tpu.dot_dimension_numbers<[1], [0], [0], [1], [0, 0, 1, 1], [], []>} : vector<8x128xbf16>, vector<128x512xbf16>, vector<8x512xf32> -> vector<8x512xf32>
    %c0_225 = arith.constant 0 : index
    %c0_226 = arith.constant 0 : index
    %604 = vector.load %arg14[%c0_225, %c0_226] : memref<8x512xf32, #tpu.memory_space<vmem>>, vector<8x512xf32>
    %605 = arith.addf %603, %604 : vector<8x512xf32>
    %606 = vector.extract_strided_slice %605 {offsets = [0, 0], sizes = [8, 128], strides = [1, 1]} : vector<8x512xf32> to vector<8x128xf32>
    %607 = arith.negf %606 : vector<8x128xf32>
    %608 = math.exp %607 : vector<8x128xf32>
    %cst_227 = arith.constant 1.000000e+00 : f32
    %609 = vector.broadcast %cst_227 : f32 to vector<8x128xf32>
    %610 = arith.addf %609, %608 : vector<8x128xf32>
    %611 = arith.divf %609, %610 : vector<8x128xf32>
    %612 = vector.extract_strided_slice %605 {offsets = [0, 128], sizes = [8, 128], strides = [1, 1]} : vector<8x512xf32> to vector<8x128xf32>
    %613 = arith.negf %612 : vector<8x128xf32>
    %614 = math.exp %613 : vector<8x128xf32>
    %cst_228 = arith.constant 1.000000e+00 : f32
    %615 = vector.broadcast %cst_228 : f32 to vector<8x128xf32>
    %616 = arith.addf %615, %614 : vector<8x128xf32>
    %617 = arith.divf %615, %616 : vector<8x128xf32>
    %618 = vector.extract_strided_slice %605 {offsets = [0, 256], sizes = [8, 128], strides = [1, 1]} : vector<8x512xf32> to vector<8x128xf32>
    %619 = math.tanh %618 : vector<8x128xf32>
    %620 = vector.extract_strided_slice %605 {offsets = [0, 384], sizes = [8, 128], strides = [1, 1]} : vector<8x512xf32> to vector<8x128xf32>
    %621 = arith.negf %620 : vector<8x128xf32>
    %622 = math.exp %621 : vector<8x128xf32>
    %cst_229 = arith.constant 1.000000e+00 : f32
    %623 = vector.broadcast %cst_229 : f32 to vector<8x128xf32>
    %624 = arith.addf %623, %622 : vector<8x128xf32>
    %625 = arith.divf %623, %624 : vector<8x128xf32>
    %626 = arith.mulf %617, %579 : vector<8x128xf32>
    %627 = arith.mulf %611, %619 : vector<8x128xf32>
    %628 = arith.addf %626, %627 : vector<8x128xf32>
    %629 = math.tanh %628 : vector<8x128xf32>
    %630 = arith.mulf %625, %629 : vector<8x128xf32>
    %631 = arith.truncf %630 : vector<8x128xf32> to vector<8x128xbf16>
    %c0_230 = arith.constant 0 : index
    %c0_231 = arith.constant 0 : index
    %632 = vector.load %arg15[%c0_230, %c0_231] : memref<128x128xbf16, #tpu.memory_space<vmem>>, vector<128x128xbf16>
    %cst_232 = arith.constant dense<0.000000e+00> : vector<8x128xf32>
    %633 = tpu.matmul %631, %632, %cst_232 {dimension_numbers = #tpu.dot_dimension_numbers<[1], [0], [0], [1], [0, 0, 1, 1], [], []>} : vector<8x128xbf16>, vector<128x128xbf16>, vector<8x128xf32> -> vector<8x128xf32>
    %c0_233 = arith.constant 0 : index
    %c0_234 = arith.constant 0 : index
    %634 = vector.load %arg16[%c0_233, %c0_234] : memref<8x128xf32, #tpu.memory_space<vmem>>, vector<8x128xf32>
    %635 = arith.addf %633, %634 : vector<8x128xf32>
    %636 = arith.index_cast %c7_i32_221 : i32 to index
    %c0_235 = arith.constant 0 : index
    %c0_236 = arith.constant 0 : index
    %637 = vector.load %arg10[%636, %c0_235, %c0_236] : memref<8x8x128xf32, #tpu.memory_space<vmem>>, vector<1x8x128xf32>
    %638 = vector.shape_cast %637 : vector<1x8x128xf32> to vector<8x128xf32>
    %639 = vector.shape_cast %635 : vector<8x128xf32> to vector<1x8x128xf32>
    tpu.vector_store %arg10[%636, %c0_235, %c0_236], %639 {strides = array<i32>} : memref<8x8x128xf32, #tpu.memory_space<vmem>>, vector<1x8x128xf32>,
    %640 = arith.index_cast %c7_i32_221 : i32 to index
    %c0_237 = arith.constant 0 : index
    %c0_238 = arith.constant 0 : index
    %641 = vector.load %arg11[%640, %c0_237, %c0_238] : memref<8x8x128xf32, #tpu.memory_space<vmem>>, vector<1x8x128xf32>
    %642 = vector.shape_cast %641 : vector<1x8x128xf32> to vector<8x128xf32>
    %643 = arith.index_cast %c7_i32_221 : i32 to index
    %644 = memref.load %arg0[%643] : memref<8xi32, #tpu.memory_space<smem>>
    %c0_i32_239 = arith.constant 0 : i32
    %645 = arith.cmpi ne, %644, %c0_i32_239 : i32
    %646 = arith.extui %645 : i1 to i32
    %c0_i32_240 = arith.constant 0 : i32
    %647 = arith.cmpi ne, %646, %c0_i32_240 : i32
    %648 = scf.if %647 -> (vector<8x128xf32>) {
      scf.yield %642 : vector<8x128xf32>
    } else {
      %cst_242 = arith.constant dense<0xFF800000> : vector<8xf32>
      %649 = vector.multi_reduction <maximumf>, %635, %cst_242 [1] : vector<8x128xf32> to vector<8xf32>
      %650 = vector.shape_cast %649 : vector<8xf32> to vector<8x1xf32>
      %651 = vector.broadcast %650 : vector<8x1xf32> to vector<8x128xf32>
      %652 = arith.cmpf oeq, %635, %651 : vector<8x128xf32>
      %c128_i32 = arith.constant 128 : i32
      %653 = vector.broadcast %c128_i32 : i32 to vector<8x128xi32>
      %654 = arith.select %652, %302, %653 : vector<8x128xi1>, vector<8x128xi32>
      %cst_243 = arith.constant dense<2147483647> : vector<8xi32>
      %655 = vector.multi_reduction <minsi>, %654, %cst_243 [1] : vector<8x128xi32> to vector<8xi32>
      %656 = vector.shape_cast %655 : vector<8xi32> to vector<8x1xi32>
      %657 = vector.broadcast %656 : vector<8x1xi32> to vector<8x128xi32>
      %658 = arith.cmpi eq, %302, %657 : vector<8x128xi32>
      %659 = arith.extui %658 : vector<8x128xi1> to vector<8x128xi32>
      %660 = arith.sitofp %659 : vector<8x128xi32> to vector<8x128xf32>
      %661 = arith.truncf %660 : vector<8x128xf32> to vector<8x128xbf16>
      %cst_244 = arith.constant dense<0.000000e+00> : vector<8x128xf32>
      %662 = tpu.matmul %661, %303, %cst_244 {dimension_numbers = #tpu.dot_dimension_numbers<[1], [0], [0], [1], [0, 0, 1, 1], [], []>} : vector<8x128xbf16>, vector<128x128xbf16>, vector<8x128xf32> -> vector<8x128xf32>
      scf.yield %662 : vector<8x128xf32>
    }
    %c7_i32_241 = arith.constant 7 : i32
    return
  }
}

</mosaic_0001>

<bundles_post_ra>
// kernel: seq2seq_forward.1
= control target key start
LH: loop header
LB: loop body
LE: loop exit
PB: predicated region body
PF: predicated region fallthrough
CT: control target
= control target key end

     0   :  { %15 = vsyncpa [#allocation10], 0  ;;  %s5320_s0 = inlined_call_operand.vmem [shape: s32[8], index: 0, kind: input, shape index: {}]   ;;  %s5321_s1 = inlined_call_operand.vmem [shape: f32[8,8,128], index: 1, kind: input, shape index: {}]   ;;  %s5322_s2 = inlined_call_operand.vmem [shape: bf16[128,512], index: 2, kind: input, shape index: {}]   ;;  %s5323_s3 = inlined_call_operand.vmem [shape: f32[8,512], index: 3, kind: input, shape index: {}]   ;;  %s5324_s4 = inlined_call_operand.vmem [shape: f32[8,8,128], index: 4, kind: input, shape index: {}]   ;;  %s5325_s5 = inlined_call_operand.vmem [shape: bf16[128,128], index: 5, kind: input, shape index: {}]   ;;  %s5326_s6 = inlined_call_operand.hbm [shape: bf16[128,512], index: 6, kind: input, shape index: {}]   ;;  %s5327_s7 = inlined_call_operand.vmem [shape: f32[8,512], index: 7, kind: input, shape index: {}]   ;;  %s5328_s8 = inlined_call_operand.vmem [shape: bf16[128,128], index: 8, kind: input, shape index: {}]   ;;  %s5329_s9 = inlined_call_operand.vmem [shape: f32[8,128], index: 9, kind: input, shape index: {}]   ;;  %s5330_s10 = inlined_call_operand.vmem [shape: f32[8,8,128], index: 10, kind: output, shape index: {}]  }
   0x1   :  { %s22_s15 = sshll.u32 %s5320_s0, 4  ;;  %s23_s15 = int_to_ptr.vmem [resolvable:$true] %s22_s15 }
   0x2   :  { %s4230_s16 = scalar_lea.vmem %s23_s15, 16  ;;  %p4235_p1 = scmp.lt.s32.totalorder %s23_s15, %s23_s15 }
   0x3   :  { %p4231_p0 = scmp.ne.s32.totalorder %s23_s15, %s4230_s16  ;;  %p4236_p2 = scmp.lt.s32.totalorder %s4230_s16, %s4230_s16 }
   0x5   :  { %p4237_p3 = por %p4236_p2, %p4235_p1 }
   0x7   :  { %p4238_p4 = pnand %p4237_p3, %p4231_p0 }
   0x9   :  { %4241 = shalt.err (!%p4238_p4)
}
   0xa   :  { %s4304_s17 = smov [#allocation9]  }
   0xb   :  { %25 = dma.vmem_to_smem %s23_s15, 16, %s4304_s17, [#allocation10]  }
   0xc   :  { %4266 = dma.done.wait [#allocation10], 16  }
   0xd   :  { %4267 = vsyncadd [#allocation10], 4294967280 }
   0xe   :  { %35 = sfence }
   0xf   :  { %v69_v0 = vld [vmem:[%s5324_s4] sm:$0xff]  ;;  %v71_v1 = vld [vmem:[%s5324_s4 + $0x8] sm:$0xff]  ;;  %v73_v2 = vld [vmem:[%s5324_s4 + $0x10] sm:$0xff] }
  0x10   :  { %70 = vst [vmem:[#allocation2] sm:$0xff] %v69_v0  ;;  %72 = vst [vmem:[#allocation2 + $0x8] sm:$0xff] %v71_v1  ;;  %v75_v3 = vld [vmem:[%s5324_s4 + $0x18] sm:$0xff]  ;;  %v77_v4 = vld [vmem:[%s5324_s4 + $0x20] sm:$0xff] }
  0x11   :  { %74 = vst [vmem:[#allocation2 + $0x10] sm:$0xff] %v73_v2  ;;  %v79_v5 = vld [vmem:[%s5324_s4 + $0x28] sm:$0xff]  ;;  %76 = vst [vmem:[#allocation2 + $0x18] sm:$0xff] %v75_v3  ;;  %v81_v6 = vld [vmem:[%s5324_s4 + $0x30] sm:$0xff] }
  0x12   :  { %78 = vst [vmem:[#allocation2 + $0x20] sm:$0xff] %v77_v4  ;;  %80 = vst [vmem:[#allocation2 + $0x28] sm:$0xff] %v79_v5 }
  0x13   :  { %82 = vst [vmem:[#allocation2 + $0x30] sm:$0xff] %v81_v6 }
  0x14   :  { %92 = vsyncadd [#allocation8], 1024  ;;  %v4417_v7 = vld [vmem:[%s5325_s5] sm:$0xff]  ;;  %v4422_v8 = vld [vmem:[%s5325_s5 + $0x8] sm:$0xff] }
  0x15   :  { %v4427_v9 = vld [vmem:[%s5325_s5 + $0x10] sm:$0xff]  ;;  %v4432_v10 = vld [vmem:[%s5325_s5 + $0x18] sm:$0xff]  ;;  %v4437_v11 = vld [vmem:[%s5325_s5 + $0x20] sm:$0xff] }
  0x16   :  { %v4442_v12 = vld [vmem:[%s5325_s5 + $0x28] sm:$0xff]  ;;  %v4447_v13 = vld [vmem:[%s5325_s5 + $0x30] sm:$0xff]  ;;  %v4452_v14 = vld [vmem:[%s5325_s5 + $0x38] sm:$0xff] }
  0x17   :  { %149 = vsyncadd [#allocation8 + $0x1], 1024  ;;  %s155_s25 = sld [smem:[#allocation0]]   ;;  %s4305_s26 = smov [#allocation4]  }
  0x18   :  { %s163_s27 = sshll.u32 %s4305_s26, 4  ;;  %s4306_s28 = smov 512   ;;  %s164_s27 = int_to_ptr.vmem [resolvable:$true] %s163_s27 }
  0x19   :  { %167 = sst [smem:[#allocation14]] %s4306_s28  ;;  %s4307_s29 = smov 4  }
  0x1a   :  { %169 = sst [smem:[#allocation14 + $0x1]] %s4306_s28  ;;  %s4308_s30 = smov 64  }
  0x1b   :  { %171 = sst [smem:[#allocation14 + $0x2]] %s4307_s29  ;;  %s4309_s12 = smov 128  }
  0x1c   :  { %173 = sst [smem:[#allocation14 + $0x3]] %s4308_s30  ;;  %s4310_s14 = smov 2  }
  0x1d   :  { %s3337_s11 = sshll.u32 %s155_s25, 26  ;;  %175 = sst [smem:[#allocation14 + $0x4]] %s4309_s12 }
  0x1e   :  { %s3338_s13 = sadd.s32 134217728, %s3337_s11  ;;  %177 = sst [smem:[#allocation14 + $0x5]] %s4310_s14 }
  0x1f   :  { %s4311_s5 = smov 256   ;;  %181 = sst [smem:[#allocation14 + $0x7]] %s4308_s30 }
  0x20   :  { %179 = sst [smem:[#allocation14 + $0x6]] %s4311_s5  ;;  %s4312_s15 = smov [#allocation8 + $0x2]  }
  0x21   :  { %183 = sst [smem:[#allocation14 + $0x8]] %s4307_s29  ;;  %s4313_s16 = smov [#allocation13]  }
  0x22   :  { %185 = dma.general %s5326_s6, 4096, %s164_s27, %s4312_s15, %s4313_s16, [#allocation14], %s3338_s13, 0  }
  0x23   :  { %v219_v15 = vld [vmem:[%s5327_s7] sm:$0xff]  ;;  %v221_v16 = vld [vmem:[%s5327_s7 + $0x8] sm:$0xff]  ;;  %v223_v17 = vld [vmem:[%s5327_s7 + $0x10] sm:$0xff] }
  0x24   :  { %220 = vst [vmem:[#allocation5] sm:$0xff] %v219_v15  ;;  %222 = vst [vmem:[#allocation5 + $0x8] sm:$0xff] %v221_v16  ;;  %v225_v18 = vld [vmem:[%s5327_s7 + $0x18] sm:$0xff] }
  0x25   :  { %224 = vst [vmem:[#allocation5 + $0x10] sm:$0xff] %v223_v17  ;;  %226 = vst [vmem:[#allocation5 + $0x18] sm:$0xff] %v225_v18 }
  0x26   :  { %234 = vsyncadd [#allocation8 + $0x3], 512  ;;  %v268_v19 = vld [vmem:[%s5328_s8] sm:$0xff]  ;;  %v270_v20 = vld [vmem:[%s5328_s8 + $0x8] sm:$0xff] }
  0x27   :  { %269 = vst [vmem:[#allocation6] sm:$0xff] %v268_v19  ;;  %271 = vst [vmem:[#allocation6 + $0x8] sm:$0xff] %v270_v20  ;;  %v272_v21 = vld [vmem:[%s5328_s8 + $0x10] sm:$0xff]  ;;  %v274_v22 = vld [vmem:[%s5328_s8 + $0x18] sm:$0xff] }
  0x28   :  { %v276_v23 = vld [vmem:[%s5328_s8 + $0x20] sm:$0xff]  ;;  %273 = vst [vmem:[#allocation6 + $0x10] sm:$0xff] %v272_v21  ;;  %275 = vst [vmem:[#allocation6 + $0x18] sm:$0xff] %v274_v22  ;;  %v278_v24 = vld [vmem:[%s5328_s8 + $0x28] sm:$0xff] }
  0x29   :  { %277 = vst [vmem:[#allocation6 + $0x20] sm:$0xff] %v276_v23  ;;  %v280_v25 = vld [vmem:[%s5328_s8 + $0x30] sm:$0xff]  ;;  %v282_v26 = vld [vmem:[%s5328_s8 + $0x38] sm:$0xff]  ;;  %279 = vst [vmem:[#allocation6 + $0x28] sm:$0xff] %v278_v24 }
  0x2a   :  { %281 = vst [vmem:[#allocation6 + $0x30] sm:$0xff] %v280_v25  ;;  %283 = vst [vmem:[#allocation6 + $0x38] sm:$0xff] %v282_v26 }
  0x2b   :  { %291 = vsyncadd [#allocation8 + $0x4], 1024  ;;  %v325_v27 = vld [vmem:[%s5329_s9] sm:$0xff] }
  0x2c   :  { %326 = vst [vmem:[#allocation7] sm:$0xff] %v325_v27 }
  0x2d   :  { %334 = vsyncadd [#allocation8 + $0x5], 128  ;;  %v4499_v28 = vld [vmem:[%s5322_s2 + $0x4] ss:$16 sps:$4 sm:$0xff]   ;;  %v4504_v29 = vld [vmem:[%s5322_s2] ss:$16 sps:$4 sm:$0xff]  }
  0x2e   :  { %v4314_v30 = vmov 0   ;;  %v4511_v31 = vld [vmem:[%s5322_s2 + $0x24] ss:$16 sps:$4 sm:$0xff]   ;;  %534 = vmatprep.subr.bf16.mxu0 %v4499_v28  ;;  %v4518_v32 = vld [vmem:[%s5322_s2 + $0x20] ss:$16 sps:$4 sm:$0xff]   ;;  %v4737_v0 = vld [vmem:[%s5323_s3 + $0x8] sm:$0xff] }
  0x2f   :  { %566 = vmatprep.mubr.bf16.mxu0 %v4314_v30  ;;  %607 = vmatprep.mubr.bf16.mxu1 %v4314_v30  ;;  %v4524_v33 = vld [vmem:[%s5322_s2 + $0x44] ss:$16 sps:$4 sm:$0xff]   ;;  %v4529_v34 = vld [vmem:[%s5322_s2 + $0xc] ss:$16 sps:$4 sm:$0xff]   ;;  %v4534_v35 = vld [vmem:[%s5322_s2 + $0x8] ss:$16 sps:$4 sm:$0xff]  }
  0x30   :  { %535 = vmatpush1.bf16.msra.mxu0 %v4504_v29  ;;  %v4539_v36 = vld [vmem:[%s5322_s2 + $0x40] ss:$16 sps:$4 sm:$0xff]   ;;  %575 = vmatprep.subr.bf16.mxu1 %v4529_v34  ;;  %v4546_v37 = vld [vmem:[%s5322_s2 + $0x2c] ss:$16 sps:$4 sm:$0xff]   ;;  %v4552_v38 = vld [vmem:[%s5322_s2 + $0x64] ss:$16 sps:$4 sm:$0xff]  }
  0x31   :  { %536 = vmatprep.subr.bf16.mxu0 %v4511_v31  ;;  %576 = vmatpush1.bf16.msra.mxu1 %v4534_v35  ;;  %v4558_v39 = vld [vmem:[%s5322_s2 + $0x28] ss:$16 sps:$4 sm:$0xff]   ;;  %v4564_v40 = vld [vmem:[%s5322_s2 + $0x60] ss:$16 sps:$4 sm:$0xff]   ;;  %v4569_v41 = vld [vmem:[%s5322_s2 + $0x4c] ss:$16 sps:$4 sm:$0xff]  }
  0x32   :  { %577 = vmatprep.subr.bf16.mxu1 %v4546_v37  ;;  %v4575_v42 = vld [vmem:[%s5322_s2 + $0x84] ss:$16 sps:$4 sm:$0xff]   ;;  %v4582_v43 = vld [vmem:[%s5322_s2 + $0x48] ss:$16 sps:$4 sm:$0xff]   ;;  %v4588_v44 = vld [vmem:[%s5322_s2 + $0x6c] ss:$16 sps:$4 sm:$0xff]  }
  0x33   :  { %v4594_v45 = vld [vmem:[%s5322_s2 + $0x80] ss:$16 sps:$4 sm:$0xff]   ;;  %v4600_v46 = vld [vmem:[%s5322_s2 + $0xa4] ss:$16 sps:$4 sm:$0xff]   ;;  %v4606_v47 = vld [vmem:[%s5322_s2 + $0x68] ss:$16 sps:$4 sm:$0xff]  }
  0x34   :  { %537 = vmatpush1.bf16.msra.mxu0 %v4518_v32  ;;  %v4612_v48 = vld [vmem:[%s5322_s2 + $0x8c] ss:$16 sps:$4 sm:$0xff]   ;;  %v4618_v49 = vld [vmem:[%s5322_s2 + $0xa0] ss:$16 sps:$4 sm:$0xff]   ;;  %v4624_v50 = vld [vmem:[%s5322_s2 + $0xc4] ss:$16 sps:$4 sm:$0xff]  }
  0x35   :  { %538 = vmatprep.subr.bf16.mxu0 %v4524_v33  ;;  %578 = vmatpush1.bf16.msra.mxu1 %v4558_v39  ;;  %v4630_v51 = vld [vmem:[%s5322_s2 + $0x88] ss:$16 sps:$4 sm:$0xff]   ;;  %v4636_v52 = vld [vmem:[%s5322_s2 + $0xac] ss:$16 sps:$4 sm:$0xff]   ;;  %v4642_v53 = vld [vmem:[%s5322_s2 + $0xc0] ss:$16 sps:$4 sm:$0xff]  }
  0x36   :  { %579 = vmatprep.subr.bf16.mxu1 %v4569_v41  ;;  %v4648_v54 = vld [vmem:[%s5322_s2 + $0xe4] ss:$16 sps:$4 sm:$0xff]   ;;  %v4654_v55 = vld [vmem:[%s5322_s2 + $0xa8] ss:$16 sps:$4 sm:$0xff]   ;;  %v4660_v56 = vld [vmem:[%s5322_s2 + $0xcc] ss:$16 sps:$4 sm:$0xff]  }
  0x37   :  { %v4666_v57 = vld [vmem:[%s5322_s2 + $0xe0] ss:$16 sps:$4 sm:$0xff]   ;;  %v4676_v59 = vld [vmem:[%s5322_s2 + $0xc8] ss:$16 sps:$4 sm:$0xff]   ;;  %v4682_v60 = vld [vmem:[%s5322_s2 + $0xec] ss:$16 sps:$4 sm:$0xff]  }
  0x38   :  { %539 = vmatpush1.bf16.msra.mxu0 %v4539_v36  ;;  %v335_v58 = vld [vmem:[%s5321_s1] sm:$0xff]  ;;  %v4689_v62 = vld [vmem:[%s5322_s2 + $0xe8] ss:$16 sps:$4 sm:$0xff]   ;;  %v4750_v23 = vld [vmem:[%s5323_s3 + $0x10] sm:$0xff] }
  0x39   :  { %540 = vmatprep.subr.bf16.mxu0 %v4552_v38  ;;  %580 = vmatpush1.bf16.msra.mxu1 %v4582_v43  ;;  %v337_v61 = vpack.c.bf16 %v335_v58, %v335_v58  ;;  %v4732_v63 = vld [vmem:[%s5323_s3] sm:$0xff]  ;;  %v4744_v17 = vld [vmem:[%s5323_s3 + $0x18] sm:$0xff] }
  0x3a   :  { %581 = vmatprep.subr.bf16.mxu1 %v4588_v44 }
  0x3c   :  { %541 = vmatpush1.bf16.msra.mxu0 %v4564_v40 }
  0x3d   :  { %542 = vmatprep.subr.bf16.mxu0 %v4575_v42  ;;  %582 = vmatpush1.bf16.msra.mxu1 %v4606_v47 }
  0x3e   :  { %583 = vmatprep.subr.bf16.mxu1 %v4612_v48 }
  0x40   :  { %543 = vmatpush1.bf16.msra.mxu0 %v4594_v45 }
  0x41   :  { %544 = vmatprep.subr.bf16.mxu0 %v4600_v46  ;;  %584 = vmatpush1.bf16.msra.mxu1 %v4630_v51 }
  0x42   :  { %585 = vmatprep.subr.bf16.mxu1 %v4636_v52 }
  0x44   :  { %545 = vmatpush1.bf16.msra.mxu0 %v4618_v49 }
  0x45   :  { %546 = vmatprep.subr.bf16.mxu0 %v4624_v50  ;;  %586 = vmatpush1.bf16.msra.mxu1 %v4654_v55 }
  0x46   :  { %587 = vmatprep.subr.bf16.mxu1 %v4660_v56 }
  0x48   :  { %547 = vmatpush1.bf16.msra.mxu0 %v4642_v53 }
  0x49   :  { %548 = vmatprep.subr.bf16.mxu0 %v4648_v54  ;;  %588 = vmatpush1.bf16.msra.mxu1 %v4676_v59 }
  0x4a   :  { %589 = vmatprep.subr.bf16.mxu1 %v4682_v60 }
  0x4c   :  { %549 = vmatpush1.bf16.msra.mxu0 %v4666_v57 }
  0x4d   :  { %644 = vmatprep.subr.bf16.mxu0 %v4499_v28  ;;  %590 = vmatpush1.bf16.msra.mxu1 %v4689_v62 }
  0x4e   :  { %685 = vmatprep.subr.bf16.mxu1 %v4529_v34 }
  0x4f   :  { %567 = vmatmul.mubr.bf16.vlgmr.msra.gmra.mrb[0].mxu0 %v337_v61 }
  0x50   :  { %645 = vmatpush1.bf16.msra.mxu0 %v4504_v29  ;;  %676 = vmatprep.mubr.bf16.mxu0 %v4314_v30 }
  0x51   :  { %646 = vmatprep.subr.bf16.mxu0 %v4511_v31  ;;  %608 = vmatmul.mubr.bf16.vlgmr.msra.gmra.mrb[0].mxu1 %v337_v61 }
  0x52   :  { %686 = vmatpush1.bf16.msra.mxu1 %v4534_v35  ;;  %717 = vmatprep.mubr.bf16.mxu1 %v4314_v30 }
  0x53   :  { %687 = vmatprep.subr.bf16.mxu1 %v4546_v37 }
  0x54   :  { %647 = vmatpush1.bf16.msra.mxu0 %v4518_v32 }
  0x55   :  { %648 = vmatprep.subr.bf16.mxu0 %v4524_v33 }
  0x56   :  { %688 = vmatpush1.bf16.msra.mxu1 %v4558_v39 }
  0x57   :  { %689 = vmatprep.subr.bf16.mxu1 %v4569_v41 }
  0x58   :  { %649 = vmatpush1.bf16.msra.mxu0 %v4539_v36 }
  0x59   :  { %650 = vmatprep.subr.bf16.mxu0 %v4552_v38 }
  0x5a   :  { %690 = vmatpush1.bf16.msra.mxu1 %v4582_v43 }
  0x5b   :  { %691 = vmatprep.subr.bf16.mxu1 %v4588_v44 }
  0x5c   :  { %651 = vmatpush1.bf16.msra.mxu0 %v4564_v40 }
  0x5d   :  { %652 = vmatprep.subr.bf16.mxu0 %v4575_v42 }
  0x5e   :  { %692 = vmatpush1.bf16.msra.mxu1 %v4606_v47 }
  0x5f   :  { %693 = vmatprep.subr.bf16.mxu1 %v4612_v48 }
  0x60   :  { %653 = vmatpush1.bf16.msra.mxu0 %v4594_v45 }
  0x61   :  { %654 = vmatprep.subr.bf16.mxu0 %v4600_v46 }
  0x62   :  { %694 = vmatpush1.bf16.msra.mxu1 %v4630_v51 }
  0x63   :  { %695 = vmatprep.subr.bf16.mxu1 %v4636_v52 }
  0x64   :  { %655 = vmatpush1.bf16.msra.mxu0 %v4618_v49 }
  0x65   :  { %656 = vmatprep.subr.bf16.mxu0 %v4624_v50 }
  0x66   :  { %696 = vmatpush1.bf16.msra.mxu1 %v4654_v55 }
  0x67   :  { %697 = vmatprep.subr.bf16.mxu1 %v4660_v56 }
  0x68   :  { %657 = vmatpush1.bf16.msra.mxu0 %v4642_v53 }
  0x69   :  { %658 = vmatprep.subr.bf16.mxu0 %v4648_v54 }
  0x6a   :  { %698 = vmatpush1.bf16.msra.mxu1 %v4676_v59 }
  0x6b   :  { %699 = vmatprep.subr.bf16.mxu1 %v4682_v60 }
  0x6c   :  { %659 = vmatpush1.bf16.msra.mxu0 %v4666_v57 }
  0x6d   :  { %754 = vmatprep.subr.bf16.mxu0 %v4499_v28 }
  0x6e   :  { %700 = vmatpush1.bf16.msra.mxu1 %v4689_v62 }
  0x6f   :  { %795 = vmatprep.subr.bf16.mxu1 %v4529_v34 }
 0x122   :  { %v568_v1 = vpop.f32.mrb[0].mxu0 }
 0x123   :  { %v569_v2 = vadd.f32 %v568_v1, %v4732_v63  ;;  %v570_v3 = vpop.f32.mrb[1].mxu0 }
 0x124   :  { %v571_v4 = vadd.f32 %v570_v3, %v4737_v0  ;;  %v572_v5 = vpop.f32.mrb[2].mxu0  ;;  %v609_v18 = vpop.f32.mrb[0].mxu1 }
 0x125   :  { %v3371_v6 = vmul.f32 -1.442695, %v569_v2  ;;  %v573_v15 = vpop.f32.mrb[3].mxu0  ;;  %v611_v19 = vpop.f32.mrb[1].mxu1  ;;  %v610_v25 = vadd.f32 %v609_v18, %v4750_v23 }
 0x126   :  { %v3372_v16 = vmul.f32 -1.442695, %v571_v4  ;;  %v612_v20 = vadd.f32 %v611_v19, %v4744_v17  ;;  %v613_v21 = vpop.f32.mrb[2].mxu1 }
 0x127   :  { %3964 = vpow2.f32 %v3371_v6  ;;  %v614_v22 = vpop.f32.mrb[3].mxu1 }
 0x128   :  { %3966 = vpow2.f32 %v3372_v16  ;;  %v3373_v24 = vmul.f32 -1.442695, %v612_v20  ;;  %v3374_v20 = vld [vmem:[%s5321_s1 + $0x8] sm:$0xff] }
 0x12a   :  { %3968 = vpow2.f32 %v3373_v24 }
 0x12b   :  { %3970 = vtanh.f32 %v610_v25 }
 0x131   :  { %v3965_v26 = vpop.eup %3964 }
 0x132   :  { %v3967_v27 = vpop.eup %3966  ;;  %v619_v58 = vadd.f32 1.0, %v3965_v26 }
 0x133   :  { %v625_v61 = vadd.f32 1.0, %v3967_v27 }
 0x134   :  { %3972 = vrcp.f32 %v619_v58  ;;  %v3969_v1 = vpop.eup %3968 }
 0x135   :  { %3974 = vrcp.f32 %v625_v61  ;;  %v3971_v2 = vpop.eup %3970  ;;  %v632_v4 = vadd.f32 1.0, %v3969_v1 }
 0x137   :  { %3976 = vrcp.f32 %v632_v4 }
 0x13e   :  { %v3973_v3 = vpop.eup %3972 }
 0x13f   :  { %v3975_v5 = vpop.eup %3974  ;;  %v636_v6 = vmul.f32 %v3973_v3, %v3971_v2 }
 0x140   :  { %v635_v15 = vmul.f32 0.0, %v3975_v5 }
 0x141   :  { %v3977_v18 = vpop.eup %3976 }
 0x142   :  { %v4753_v16 = vadd.f32 %v636_v6, %v635_v15 }
 0x144   :  { %3978 = vtanh.f32 %v4753_v16 }
 0x14e   :  { %v3979_v19 = vpop.eup %3978 }
 0x14f   :  { %v639_v21 = vmul.f32 %v3979_v19, %v3977_v18 }
 0x151   :  { %v642_v22 = vadd.f32 %v3374_v20, %v639_v21 }
 0x153   :  { %v643_v24 = vpack.c.bf16 %v642_v22, %v642_v22 }
 0x155   :  { %677 = vmatmul.mubr.bf16.vlgmr.msra.gmra.mrb[4].mxu0 %v643_v24  ;;  %718 = vmatmul.mubr.bf16.vlgmr.msra.gmra.mrb[4].mxu1 %v643_v24 }
 0x156   :  { %755 = vmatpush1.bf16.msra.mxu0 %v4504_v29  ;;  %796 = vmatpush1.bf16.msra.mxu1 %v4534_v35 }
 0x157   :  { %756 = vmatprep.subr.bf16.mxu0 %v4511_v31  ;;  %797 = vmatprep.subr.bf16.mxu1 %v4546_v37 }
 0x158   :  { %786 = vmatprep.mubr.bf16.mxu0 %v4314_v30  ;;  %827 = vmatprep.mubr.bf16.mxu1 %v4314_v30 }
 0x15a   :  { %757 = vmatpush1.bf16.msra.mxu0 %v4518_v32  ;;  %798 = vmatpush1.bf16.msra.mxu1 %v4558_v39 }
 0x15b   :  { %758 = vmatprep.subr.bf16.mxu0 %v4524_v33  ;;  %799 = vmatprep.subr.bf16.mxu1 %v4569_v41 }
 0x15e   :  { %759 = vmatpush1.bf16.msra.mxu0 %v4539_v36  ;;  %800 = vmatpush1.bf16.msra.mxu1 %v4582_v43 }
 0x15f   :  { %760 = vmatprep.subr.bf16.mxu0 %v4552_v38  ;;  %801 = vmatprep.subr.bf16.mxu1 %v4588_v44 }
 0x162   :  { %761 = vmatpush1.bf16.msra.mxu0 %v4564_v40  ;;  %802 = vmatpush1.bf16.msra.mxu1 %v4606_v47 }
 0x163   :  { %762 = vmatprep.subr.bf16.mxu0 %v4575_v42  ;;  %803 = vmatprep.subr.bf16.mxu1 %v4612_v48 }
 0x166   :  { %763 = vmatpush1.bf16.msra.mxu0 %v4594_v45  ;;  %804 = vmatpush1.bf16.msra.mxu1 %v4630_v51 }
 0x167   :  { %764 = vmatprep.subr.bf16.mxu0 %v4600_v46  ;;  %805 = vmatprep.subr.bf16.mxu1 %v4636_v52 }
 0x16a   :  { %765 = vmatpush1.bf16.msra.mxu0 %v4618_v49  ;;  %806 = vmatpush1.bf16.msra.mxu1 %v4654_v55 }
 0x16b   :  { %766 = vmatprep.subr.bf16.mxu0 %v4624_v50  ;;  %807 = vmatprep.subr.bf16.mxu1 %v4660_v56 }
 0x16e   :  { %767 = vmatpush1.bf16.msra.mxu0 %v4642_v53  ;;  %808 = vmatpush1.bf16.msra.mxu1 %v4676_v59 }
 0x16f   :  { %768 = vmatprep.subr.bf16.mxu0 %v4648_v54  ;;  %809 = vmatprep.subr.bf16.mxu1 %v4682_v60 }
 0x172   :  { %769 = vmatpush1.bf16.msra.mxu0 %v4666_v57  ;;  %810 = vmatpush1.bf16.msra.mxu1 %v4689_v62 }
 0x173   :  { %864 = vmatprep.subr.bf16.mxu0 %v4499_v28  ;;  %905 = vmatprep.subr.bf16.mxu1 %v4529_v34 }
 0x228   :  { %v678_v25 = vpop.f32.mrb[4].mxu0  ;;  %v719_v26 = vpop.f32.mrb[4].mxu1 }
 0x229   :  { %v679_v27 = vadd.f32 %v678_v25, %v4732_v63  ;;  %v680_v58 = vpop.f32.mrb[5].mxu0  ;;  %v721_v61 = vpop.f32.mrb[5].mxu1  ;;  %v720_v20 = vadd.f32 %v719_v26, %v4750_v23 }
 0x22a   :  { %v681_v1 = vadd.f32 %v680_v58, %v4737_v0  ;;  %v682_v2 = vpop.f32.mrb[6].mxu0  ;;  %v723_v3 = vpop.f32.mrb[6].mxu1  ;;  %v722_v18 = vadd.f32 %v721_v61, %v4744_v17 }
 0x22b   :  { %v3375_v4 = vmul.f32 -1.442695, %v679_v27  ;;  %v683_v5 = vpop.f32.mrb[7].mxu0  ;;  %v724_v6 = vpop.f32.mrb[7].mxu1 }
 0x22c   :  { %v3376_v15 = vmul.f32 -1.442695, %v681_v1  ;;  %v3377_v19 = vmul.f32 -1.442695, %v722_v18 }
 0x22d   :  { %3980 = vpow2.f32 %v3375_v4 }
 0x22e   :  { %3982 = vpow2.f32 %v3376_v15  ;;  %v3378_v15 = vld [vmem:[%s5321_s1 + $0x10] sm:$0xff] }
 0x22f   :  { %3984 = vpow2.f32 %v3377_v19 }
 0x230   :  { %3986 = vtanh.f32 %v720_v20 }
 0x237   :  { %v3981_v21 = vpop.eup %3980 }
 0x238   :  { %v3983_v22 = vpop.eup %3982  ;;  %v729_v24 = vadd.f32 1.0, %v3981_v21 }
 0x239   :  { %v735_v25 = vadd.f32 1.0, %v3983_v22  ;;  %v3985_v58 = vpop.eup %3984 }
 0x23a   :  { %3988 = vrcp.f32 %v729_v24  ;;  %v3987_v27 = vpop.eup %3986  ;;  %v742_v4 = vadd.f32 1.0, %v3985_v58 }
 0x23b   :  { %3990 = vrcp.f32 %v735_v25 }
 0x23c   :  { %3992 = vrcp.f32 %v742_v4 }
 0x244   :  { %v3989_v2 = vpop.eup %3988 }
 0x245   :  { %v3991_v3 = vpop.eup %3990  ;;  %v746_v1 = vmul.f32 %v3989_v2, %v3987_v27 }
 0x246   :  { %v745_v5 = vmul.f32 %v3991_v3, %v4753_v16  ;;  %v3993_v26 = vpop.eup %3992 }
 0x248   :  { %v4798_v61 = vadd.f32 %v746_v1, %v745_v5 }
 0x24a   :  { %3994 = vtanh.f32 %v4798_v61 }
 0x254   :  { %v3995_v6 = vpop.eup %3994 }
 0x255   :  { %v749_v18 = vmul.f32 %v3995_v6, %v3993_v26 }
 0x257   :  { %v752_v19 = vadd.f32 %v3378_v15, %v749_v18 }
 0x259   :  { %v753_v20 = vpack.c.bf16 %v752_v19, %v752_v19 }
 0x25b   :  { %787 = vmatmul.mubr.bf16.vlgmr.msra.gmra.mrb[8].mxu0 %v753_v20  ;;  %828 = vmatmul.mubr.bf16.vlgmr.msra.gmra.mrb[8].mxu1 %v753_v20 }
 0x25c   :  { %865 = vmatpush1.bf16.msra.mxu0 %v4504_v29  ;;  %906 = vmatpush1.bf16.msra.mxu1 %v4534_v35 }
 0x25d   :  { %866 = vmatprep.subr.bf16.mxu0 %v4511_v31  ;;  %907 = vmatprep.subr.bf16.mxu1 %v4546_v37 }
 0x25e   :  { %896 = vmatprep.mubr.bf16.mxu0 %v4314_v30  ;;  %937 = vmatprep.mubr.bf16.mxu1 %v4314_v30 }
 0x260   :  { %867 = vmatpush1.bf16.msra.mxu0 %v4518_v32  ;;  %908 = vmatpush1.bf16.msra.mxu1 %v4558_v39 }
 0x261   :  { %868 = vmatprep.subr.bf16.mxu0 %v4524_v33  ;;  %909 = vmatprep.subr.bf16.mxu1 %v4569_v41 }
 0x264   :  { %869 = vmatpush1.bf16.msra.mxu0 %v4539_v36  ;;  %910 = vmatpush1.bf16.msra.mxu1 %v4582_v43 }
 0x265   :  { %870 = vmatprep.subr.bf16.mxu0 %v4552_v38  ;;  %911 = vmatprep.subr.bf16.mxu1 %v4588_v44 }
 0x268   :  { %871 = vmatpush1.bf16.msra.mxu0 %v4564_v40  ;;  %912 = vmatpush1.bf16.msra.mxu1 %v4606_v47 }
 0x269   :  { %872 = vmatprep.subr.bf16.mxu0 %v4575_v42  ;;  %913 = vmatprep.subr.bf16.mxu1 %v4612_v48 }
 0x26c   :  { %873 = vmatpush1.bf16.msra.mxu0 %v4594_v45  ;;  %914 = vmatpush1.bf16.msra.mxu1 %v4630_v51 }
 0x26d   :  { %874 = vmatprep.subr.bf16.mxu0 %v4600_v46  ;;  %915 = vmatprep.subr.bf16.mxu1 %v4636_v52 }
 0x270   :  { %875 = vmatpush1.bf16.msra.mxu0 %v4618_v49  ;;  %916 = vmatpush1.bf16.msra.mxu1 %v4654_v55 }
 0x271   :  { %876 = vmatprep.subr.bf16.mxu0 %v4624_v50  ;;  %917 = vmatprep.subr.bf16.mxu1 %v4660_v56 }
 0x274   :  { %877 = vmatpush1.bf16.msra.mxu0 %v4642_v53  ;;  %918 = vmatpush1.bf16.msra.mxu1 %v4676_v59 }
 0x275   :  { %878 = vmatprep.subr.bf16.mxu0 %v4648_v54  ;;  %919 = vmatprep.subr.bf16.mxu1 %v4682_v60 }
 0x278   :  { %879 = vmatpush1.bf16.msra.mxu0 %v4666_v57  ;;  %920 = vmatpush1.bf16.msra.mxu1 %v4689_v62 }
 0x279   :  { %974 = vmatprep.subr.bf16.mxu0 %v4499_v28  ;;  %1015 = vmatprep.subr.bf16.mxu1 %v4529_v34 }
 0x32e   :  { %v788_v16 = vpop.f32.mrb[8].mxu0  ;;  %v829_v21 = vpop.f32.mrb[8].mxu1 }
 0x32f   :  { %v789_v22 = vadd.f32 %v788_v16, %v4732_v63  ;;  %v790_v24 = vpop.f32.mrb[9].mxu0  ;;  %v831_v25 = vpop.f32.mrb[9].mxu1  ;;  %v830_v15 = vadd.f32 %v829_v21, %v4750_v23 }
 0x330   :  { %v791_v58 = vadd.f32 %v790_v24, %v4737_v0  ;;  %v792_v27 = vpop.f32.mrb[10].mxu0  ;;  %v833_v2 = vpop.f32.mrb[10].mxu1  ;;  %v832_v26 = vadd.f32 %v831_v25, %v4744_v17 }
 0x331   :  { %v3379_v3 = vmul.f32 -1.442695, %v789_v22  ;;  %v793_v1 = vpop.f32.mrb[11].mxu0  ;;  %v834_v4 = vpop.f32.mrb[11].mxu1 }
 0x332   :  { %v3380_v5 = vmul.f32 -1.442695, %v791_v58  ;;  %v3381_v6 = vmul.f32 -1.442695, %v832_v26 }
 0x333   :  { %3996 = vpow2.f32 %v3379_v3 }
 0x334   :  { %3998 = vpow2.f32 %v3380_v5  ;;  %v3382_v5 = vld [vmem:[%s5321_s1 + $0x18] sm:$0xff] }
 0x335   :  { %4000 = vpow2.f32 %v3381_v6 }
 0x336   :  { %4002 = vtanh.f32 %v830_v15 }
 0x33d   :  { %v3997_v18 = vpop.eup %3996 }
 0x33e   :  { %v3999_v19 = vpop.eup %3998  ;;  %v839_v20 = vadd.f32 1.0, %v3997_v18 }
 0x33f   :  { %v845_v16 = vadd.f32 1.0, %v3999_v19  ;;  %v4001_v24 = vpop.eup %4000 }
 0x340   :  { %4004 = vrcp.f32 %v839_v20  ;;  %v4003_v22 = vpop.eup %4002  ;;  %v852_v3 = vadd.f32 1.0, %v4001_v24 }
 0x341   :  { %4006 = vrcp.f32 %v845_v16 }
 0x342   :  { %4008 = vrcp.f32 %v852_v3 }
 0x34a   :  { %v4005_v27 = vpop.eup %4004 }
 0x34b   :  { %v4007_v2 = vpop.eup %4006  ;;  %v856_v58 = vmul.f32 %v4005_v27, %v4003_v22 }
 0x34c   :  { %v855_v1 = vmul.f32 %v4007_v2, %v4798_v61  ;;  %v4009_v21 = vpop.eup %4008 }
 0x34e   :  { %v4843_v25 = vadd.f32 %v856_v58, %v855_v1 }
 0x350   :  { %4010 = vtanh.f32 %v4843_v25 }
 0x35a   :  { %v4011_v4 = vpop.eup %4010 }
 0x35b   :  { %v859_v26 = vmul.f32 %v4011_v4, %v4009_v21 }
 0x35d   :  { %v862_v6 = vadd.f32 %v3382_v5, %v859_v26 }
 0x35f   :  { %v863_v15 = vpack.c.bf16 %v862_v6, %v862_v6 }
 0x361   :  { %897 = vmatmul.mubr.bf16.vlgmr.msra.gmra.mrb[12].mxu0 %v863_v15  ;;  %938 = vmatmul.mubr.bf16.vlgmr.msra.gmra.mrb[12].mxu1 %v863_v15 }
 0x362   :  { %975 = vmatpush1.bf16.msra.mxu0 %v4504_v29  ;;  %1016 = vmatpush1.bf16.msra.mxu1 %v4534_v35 }
 0x363   :  { %976 = vmatprep.subr.bf16.mxu0 %v4511_v31  ;;  %1017 = vmatprep.subr.bf16.mxu1 %v4546_v37 }
 0x364   :  { %1006 = vmatprep.mubr.bf16.mxu0 %v4314_v30  ;;  %1047 = vmatprep.mubr.bf16.mxu1 %v4314_v30 }
 0x366   :  { %977 = vmatpush1.bf16.msra.mxu0 %v4518_v32  ;;  %1018 = vmatpush1.bf16.msra.mxu1 %v4558_v39 }
 0x367   :  { %978 = vmatprep.subr.bf16.mxu0 %v4524_v33  ;;  %1019 = vmatprep.subr.bf16.mxu1 %v4569_v41 }
 0x36a   :  { %979 = vmatpush1.bf16.msra.mxu0 %v4539_v36  ;;  %1020 = vmatpush1.bf16.msra.mxu1 %v4582_v43 }
 0x36b   :  { %980 = vmatprep.subr.bf16.mxu0 %v4552_v38  ;;  %1021 = vmatprep.subr.bf16.mxu1 %v4588_v44 }
 0x36e   :  { %981 = vmatpush1.bf16.msra.mxu0 %v4564_v40  ;;  %1022 = vmatpush1.bf16.msra.mxu1 %v4606_v47 }
 0x36f   :  { %982 = vmatprep.subr.bf16.mxu0 %v4575_v42  ;;  %1023 = vmatprep.subr.bf16.mxu1 %v4612_v48 }
 0x372   :  { %983 = vmatpush1.bf16.msra.mxu0 %v4594_v45  ;;  %1024 = vmatpush1.bf16.msra.mxu1 %v4630_v51 }
 0x373   :  { %984 = vmatprep.subr.bf16.mxu0 %v4600_v46  ;;  %1025 = vmatprep.subr.bf16.mxu1 %v4636_v52 }
 0x376   :  { %985 = vmatpush1.bf16.msra.mxu0 %v4618_v49  ;;  %1026 = vmatpush1.bf16.msra.mxu1 %v4654_v55 }
 0x377   :  { %986 = vmatprep.subr.bf16.mxu0 %v4624_v50  ;;  %1027 = vmatprep.subr.bf16.mxu1 %v4660_v56 }
 0x37a   :  { %987 = vmatpush1.bf16.msra.mxu0 %v4642_v53  ;;  %1028 = vmatpush1.bf16.msra.mxu1 %v4676_v59 }
 0x37b   :  { %988 = vmatprep.subr.bf16.mxu0 %v4648_v54  ;;  %1029 = vmatprep.subr.bf16.mxu1 %v4682_v60 }
 0x37e   :  { %989 = vmatpush1.bf16.msra.mxu0 %v4666_v57  ;;  %1030 = vmatpush1.bf16.msra.mxu1 %v4689_v62 }
 0x37f   :  { %1084 = vmatprep.subr.bf16.mxu0 %v4499_v28  ;;  %1125 = vmatprep.subr.bf16.mxu1 %v4529_v34 }
 0x434   :  { %v898_v61 = vpop.f32.mrb[12].mxu0  ;;  %v939_v18 = vpop.f32.mrb[12].mxu1 }
 0x435   :  { %v899_v19 = vadd.f32 %v898_v61, %v4732_v63  ;;  %v900_v20 = vpop.f32.mrb[13].mxu0  ;;  %v941_v16 = vpop.f32.mrb[13].mxu1  ;;  %v940_v5 = vadd.f32 %v939_v18, %v4750_v23 }
 0x436   :  { %v901_v24 = vadd.f32 %v900_v20, %v4737_v0  ;;  %v902_v22 = vpop.f32.mrb[14].mxu0  ;;  %v943_v27 = vpop.f32.mrb[14].mxu1  ;;  %v942_v21 = vadd.f32 %v941_v16, %v4744_v17 }
 0x437   :  { %v3383_v2 = vmul.f32 -1.442695, %v899_v19  ;;  %v903_v58 = vpop.f32.mrb[15].mxu0  ;;  %v944_v3 = vpop.f32.mrb[15].mxu1 }
 0x438   :  { %v3384_v1 = vmul.f32 -1.442695, %v901_v24  ;;  %v3385_v4 = vmul.f32 -1.442695, %v942_v21 }
 0x439   :  { %4012 = vpow2.f32 %v3383_v2 }
 0x43a   :  { %4014 = vpow2.f32 %v3384_v1  ;;  %v3386_v1 = vld [vmem:[%s5321_s1 + $0x20] sm:$0xff] }
 0x43b   :  { %4016 = vpow2.f32 %v3385_v4 }
 0x43c   :  { %4018 = vtanh.f32 %v940_v5 }
 0x443   :  { %v4013_v26 = vpop.eup %4012 }
 0x444   :  { %v4015_v6 = vpop.eup %4014  ;;  %v949_v15 = vadd.f32 1.0, %v4013_v26 }
 0x445   :  { %v955_v61 = vadd.f32 1.0, %v4015_v6  ;;  %v4017_v20 = vpop.eup %4016 }
 0x446   :  { %4020 = vrcp.f32 %v949_v15  ;;  %v4019_v19 = vpop.eup %4018  ;;  %v962_v2 = vadd.f32 1.0, %v4017_v20 }
 0x447   :  { %4022 = vrcp.f32 %v955_v61 }
 0x448   :  { %4024 = vrcp.f32 %v962_v2 }
 0x450   :  { %v4021_v22 = vpop.eup %4020 }
 0x451   :  { %v4023_v27 = vpop.eup %4022  ;;  %v966_v24 = vmul.f32 %v4021_v22, %v4019_v19 }
 0x452   :  { %v965_v58 = vmul.f32 %v4023_v27, %v4843_v25  ;;  %v4025_v18 = vpop.eup %4024 }
 0x454   :  { %v4888_v16 = vadd.f32 %v966_v24, %v965_v58 }
 0x456   :  { %4026 = vtanh.f32 %v4888_v16 }
 0x460   :  { %v4027_v3 = vpop.eup %4026 }
 0x461   :  { %v969_v21 = vmul.f32 %v4027_v3, %v4025_v18 }
 0x463   :  { %v972_v4 = vadd.f32 %v3386_v1, %v969_v21 }
 0x465   :  { %v973_v5 = vpack.c.bf16 %v972_v4, %v972_v4 }
 0x467   :  { %1007 = vmatmul.mubr.bf16.vlgmr.msra.gmra.mrb[16].mxu0 %v973_v5  ;;  %1048 = vmatmul.mubr.bf16.vlgmr.msra.gmra.mrb[16].mxu1 %v973_v5 }
 0x468   :  { %1085 = vmatpush1.bf16.msra.mxu0 %v4504_v29  ;;  %1126 = vmatpush1.bf16.msra.mxu1 %v4534_v35 }
 0x469   :  { %1086 = vmatprep.subr.bf16.mxu0 %v4511_v31  ;;  %1127 = vmatprep.subr.bf16.mxu1 %v4546_v37 }
 0x46a   :  { %1116 = vmatprep.mubr.bf16.mxu0 %v4314_v30  ;;  %1157 = vmatprep.mubr.bf16.mxu1 %v4314_v30 }
 0x46c   :  { %1087 = vmatpush1.bf16.msra.mxu0 %v4518_v32  ;;  %1128 = vmatpush1.bf16.msra.mxu1 %v4558_v39 }
 0x46d   :  { %1088 = vmatprep.subr.bf16.mxu0 %v4524_v33  ;;  %1129 = vmatprep.subr.bf16.mxu1 %v4569_v41 }
 0x470   :  { %1089 = vmatpush1.bf16.msra.mxu0 %v4539_v36  ;;  %1130 = vmatpush1.bf16.msra.mxu1 %v4582_v43 }
 0x471   :  { %1090 = vmatprep.subr.bf16.mxu0 %v4552_v38  ;;  %1131 = vmatprep.subr.bf16.mxu1 %v4588_v44 }
 0x474   :  { %1091 = vmatpush1.bf16.msra.mxu0 %v4564_v40  ;;  %1132 = vmatpush1.bf16.msra.mxu1 %v4606_v47 }
 0x475   :  { %1092 = vmatprep.subr.bf16.mxu0 %v4575_v42  ;;  %1133 = vmatprep.subr.bf16.mxu1 %v4612_v48 }
 0x478   :  { %1093 = vmatpush1.bf16.msra.mxu0 %v4594_v45  ;;  %1134 = vmatpush1.bf16.msra.mxu1 %v4630_v51 }
 0x479   :  { %1094 = vmatprep.subr.bf16.mxu0 %v4600_v46  ;;  %1135 = vmatprep.subr.bf16.mxu1 %v4636_v52 }
 0x47c   :  { %1095 = vmatpush1.bf16.msra.mxu0 %v4618_v49  ;;  %1136 = vmatpush1.bf16.msra.mxu1 %v4654_v55 }
 0x47d   :  { %1096 = vmatprep.subr.bf16.mxu0 %v4624_v50  ;;  %1137 = vmatprep.subr.bf16.mxu1 %v4660_v56 }
 0x480   :  { %1097 = vmatpush1.bf16.msra.mxu0 %v4642_v53  ;;  %1138 = vmatpush1.bf16.msra.mxu1 %v4676_v59 }
 0x481   :  { %1098 = vmatprep.subr.bf16.mxu0 %v4648_v54  ;;  %1139 = vmatprep.subr.bf16.mxu1 %v4682_v60 }
 0x484   :  { %1099 = vmatpush1.bf16.msra.mxu0 %v4666_v57  ;;  %1140 = vmatpush1.bf16.msra.mxu1 %v4689_v62 }
 0x485   :  { %1194 = vmatprep.subr.bf16.mxu0 %v4499_v28  ;;  %1235 = vmatprep.subr.bf16.mxu1 %v4529_v34 }
 0x53a   :  { %v1008_v25 = vpop.f32.mrb[16].mxu0  ;;  %v1049_v26 = vpop.f32.mrb[16].mxu1 }
 0x53b   :  { %v1009_v6 = vadd.f32 %v1008_v25, %v4732_v63  ;;  %v1010_v15 = vpop.f32.mrb[17].mxu0  ;;  %v1051_v61 = vpop.f32.mrb[17].mxu1  ;;  %v1050_v3 = vadd.f32 %v1049_v26, %v4750_v23 }
 0x53c   :  { %v1011_v20 = vadd.f32 %v1010_v15, %v4737_v0  ;;  %v1012_v19 = vpop.f32.mrb[18].mxu0  ;;  %v1053_v22 = vpop.f32.mrb[18].mxu1  ;;  %v1052_v28 = vadd.f32 %v1051_v61, %v4744_v17 }
 0x53d   :  { %v3387_v27 = vmul.f32 -1.442695, %v1009_v6  ;;  %v1013_v24 = vpop.f32.mrb[19].mxu0  ;;  %v1054_v2 = vpop.f32.mrb[19].mxu1 }
 0x53e   :  { %v3388_v58 = vmul.f32 -1.442695, %v1011_v20  ;;  %v3389_v18 = vmul.f32 -1.442695, %v1052_v28  ;;  %v3390_v2 = vld [vmem:[%s5321_s1 + $0x28] sm:$0xff] }
 0x53f   :  { %4028 = vpow2.f32 %v3387_v27 }
 0x540   :  { %4030 = vpow2.f32 %v3388_v58 }
 0x541   :  { %4032 = vpow2.f32 %v3389_v18 }
 0x542   :  { %4034 = vtanh.f32 %v1050_v3 }
 0x549   :  { %v4029_v1 = vpop.eup %4028 }
 0x54a   :  { %v4031_v21 = vpop.eup %4030  ;;  %v1059_v4 = vadd.f32 1.0, %v4029_v1 }
 0x54b   :  { %v1065_v5 = vadd.f32 1.0, %v4031_v21  ;;  %v4033_v25 = vpop.eup %4032 }
 0x54c   :  { %4036 = vrcp.f32 %v1059_v4  ;;  %v4035_v6 = vpop.eup %4034  ;;  %v1072_v22 = vadd.f32 1.0, %v4033_v25  ;;  %v3394_v4 = vld [vmem:[%s5321_s1 + $0x30] sm:$0xff] }
 0x54d   :  { %4038 = vrcp.f32 %v1065_v5 }
 0x54e   :  { %4040 = vrcp.f32 %v1072_v22  ;;  %v4096_v22 = vld [vmem:[%s5322_s2 + $0x2c] ss:$16 sps:$4 sm:$0xff]  }
 0x556   :  { %v4037_v15 = vpop.eup %4036 }
 0x557   :  { %v4039_v19 = vpop.eup %4038  ;;  %v1076_v20 = vmul.f32 %v4037_v15, %v4035_v6  ;;  %v4093_v15 = vld [vmem:[%s5322_s2] ss:$16 sps:$4 sm:$0xff]  }
 0x558   :  { %v1075_v27 = vmul.f32 %v4039_v19, %v4888_v16  ;;  %v4041_v26 = vpop.eup %4040  ;;  %v4094_v19 = vld [vmem:[%s5322_s2 + $0x8] ss:$16 sps:$4 sm:$0xff]  }
 0x55a   :  { %v4933_v61 = vadd.f32 %v1076_v20, %v1075_v27  ;;  %v4095_v20 = vld [vmem:[%s5322_s2 + $0x24] ss:$16 sps:$4 sm:$0xff]   ;;  %v4097_v27 = vld [vmem:[%s5322_s2 + $0x20] ss:$16 sps:$4 sm:$0xff]  }
 0x55c   :  { %4042 = vtanh.f32 %v4933_v61 }
 0x566   :  { %v4043_v24 = vpop.eup %4042 }
 0x567   :  { %v1079_v58 = vmul.f32 %v4043_v24, %v4041_v26  ;;  %v4099_v26 = vld [vmem:[%s5322_s2 + $0x44] ss:$16 sps:$4 sm:$0xff]   ;;  %v4100_v24 = vld [vmem:[%s5322_s2 + $0x4c] ss:$16 sps:$4 sm:$0xff]  }
 0x569   :  { %v1082_v28 = vadd.f32 %v3390_v2, %v1079_v58  ;;  %v4101_v2 = vld [vmem:[%s5322_s2 + $0x40] ss:$16 sps:$4 sm:$0xff]   ;;  %v4102_v58 = vld [vmem:[%s5322_s2 + $0x48] ss:$16 sps:$4 sm:$0xff]  }
 0x56b   :  { %v1083_v18 = vpack.c.bf16 %v1082_v28, %v1082_v28  ;;  %v4103_v28 = vld [vmem:[%s5322_s2 + $0x64] ss:$16 sps:$4 sm:$0xff]  }
 0x56d   :  { %1117 = vmatmul.mubr.bf16.vlgmr.msra.gmra.mrb[20].mxu0 %v1083_v18  ;;  %1158 = vmatmul.mubr.bf16.vlgmr.msra.gmra.mrb[20].mxu1 %v1083_v18  ;;  %v4104_v18 = vld [vmem:[%s5322_s2 + $0x6c] ss:$16 sps:$4 sm:$0xff]  }
 0x56e   :  { %1195 = vmatpush1.bf16.msra.mxu0 %v4504_v29  ;;  %1236 = vmatpush1.bf16.msra.mxu1 %v4534_v35  ;;  %v4092_v29 = vld [vmem:[%s5322_s2 + $0x4] ss:$16 sps:$4 sm:$0xff]  }
 0x56f   :  { %1196 = vmatprep.subr.bf16.mxu0 %v4511_v31  ;;  %1237 = vmatprep.subr.bf16.mxu1 %v4546_v37 }
 0x570   :  { %1226 = vmatprep.mubr.bf16.mxu0 %v4314_v30  ;;  %1267 = vmatprep.mubr.bf16.mxu1 %v4314_v30 }
 0x572   :  { %1197 = vmatpush1.bf16.msra.mxu0 %v4518_v32  ;;  %1238 = vmatpush1.bf16.msra.mxu1 %v4558_v39 }
 0x573   :  { %1198 = vmatprep.subr.bf16.mxu0 %v4524_v33  ;;  %1239 = vmatprep.subr.bf16.mxu1 %v4569_v41 }
 0x576   :  { %1199 = vmatpush1.bf16.msra.mxu0 %v4539_v36  ;;  %1240 = vmatpush1.bf16.msra.mxu1 %v4582_v43 }
 0x577   :  { %1200 = vmatprep.subr.bf16.mxu0 %v4552_v38  ;;  %1241 = vmatprep.subr.bf16.mxu1 %v4588_v44 }
 0x57a   :  { %1201 = vmatpush1.bf16.msra.mxu0 %v4564_v40  ;;  %1242 = vmatpush1.bf16.msra.mxu1 %v4606_v47 }
 0x57b   :  { %1202 = vmatprep.subr.bf16.mxu0 %v4575_v42  ;;  %1243 = vmatprep.subr.bf16.mxu1 %v4612_v48 }
 0x57e   :  { %1203 = vmatpush1.bf16.msra.mxu0 %v4594_v45  ;;  %1244 = vmatpush1.bf16.msra.mxu1 %v4630_v51 }
 0x57f   :  { %1204 = vmatprep.subr.bf16.mxu0 %v4600_v46  ;;  %1245 = vmatprep.subr.bf16.mxu1 %v4636_v52 }
 0x582   :  { %1205 = vmatpush1.bf16.msra.mxu0 %v4618_v49  ;;  %1246 = vmatpush1.bf16.msra.mxu1 %v4654_v55 }
 0x583   :  { %1206 = vmatprep.subr.bf16.mxu0 %v4624_v50  ;;  %1247 = vmatprep.subr.bf16.mxu1 %v4660_v56 }
 0x586   :  { %1207 = vmatpush1.bf16.msra.mxu0 %v4642_v53  ;;  %1248 = vmatpush1.bf16.msra.mxu1 %v4676_v59 }
 0x587   :  { %1208 = vmatprep.subr.bf16.mxu0 %v4648_v54  ;;  %1249 = vmatprep.subr.bf16.mxu1 %v4682_v60 }
 0x58a   :  { %1209 = vmatpush1.bf16.msra.mxu0 %v4666_v57  ;;  %1250 = vmatpush1.bf16.msra.mxu1 %v4689_v62 }
 0x58b   :  { %1304 = vmatprep.subr.bf16.mxu0 %v4092_v29  ;;  %1345 = vmatprep.subr.bf16.mxu1 %v4529_v34  ;;  %v4105_v29 = vld [vmem:[%s5322_s2 + $0x60] ss:$16 sps:$4 sm:$0xff]  }
 0x640   :  { %v1118_v31 = vpop.f32.mrb[20].mxu0  ;;  %v1159_v32 = vpop.f32.mrb[20].mxu1 }
 0x641   :  { %v1119_v33 = vadd.f32 %v1118_v31, %v4732_v63  ;;  %v1120_v35 = vpop.f32.mrb[21].mxu0  ;;  %v1161_v36 = vpop.f32.mrb[21].mxu1  ;;  %v1160_v34 = vadd.f32 %v1159_v32, %v4750_v23  ;;  %v4106_v31 = vld [vmem:[%s5322_s2 + $0x68] ss:$16 sps:$4 sm:$0xff]   ;;  %v4107_v32 = vld [vmem:[%s5322_s2 + $0x84] ss:$16 sps:$4 sm:$0xff]  }
 0x642   :  { %v1121_v37 = vadd.f32 %v1120_v35, %v4737_v0  ;;  %v1122_v38 = vpop.f32.mrb[22].mxu0  ;;  %v1163_v39 = vpop.f32.mrb[22].mxu1  ;;  %v1162_v44 = vadd.f32 %v1161_v36, %v4744_v17  ;;  %v4109_v35 = vld [vmem:[%s5322_s2 + $0x80] ss:$16 sps:$4 sm:$0xff]   ;;  %v4110_v36 = vld [vmem:[%s5322_s2 + $0x88] ss:$16 sps:$4 sm:$0xff]  }
 0x643   :  { %v3391_v40 = vmul.f32 -1.442695, %v1119_v33  ;;  %v1123_v41 = vpop.f32.mrb[23].mxu0  ;;  %v1164_v42 = vpop.f32.mrb[23].mxu1  ;;  %v4108_v33 = vld [vmem:[%s5322_s2 + $0x8c] ss:$16 sps:$4 sm:$0xff]  }
 0x644   :  { %v3392_v43 = vmul.f32 -1.442695, %v1121_v37  ;;  %v3393_v45 = vmul.f32 -1.442695, %v1162_v44  ;;  %v4111_v37 = vld [vmem:[%s5322_s2 + $0xa4] ss:$16 sps:$4 sm:$0xff]  }
 0x645   :  { %4044 = vpow2.f32 %v3391_v40  ;;  %v4112_v38 = vld [vmem:[%s5322_s2 + $0xac] ss:$16 sps:$4 sm:$0xff]   ;;  %v4113_v39 = vld [vmem:[%s5322_s2 + $0xa0] ss:$16 sps:$4 sm:$0xff]   ;;  %v4114_v40 = vld [vmem:[%s5322_s2 + $0xc4] ss:$16 sps:$4 sm:$0xff]  }
 0x646   :  { %4046 = vpow2.f32 %v3392_v43  ;;  %v4115_v41 = vld [vmem:[%s5322_s2 + $0xc0] ss:$16 sps:$4 sm:$0xff]   ;;  %v4116_v42 = vld [vmem:[%s5322_s2 + $0xe4] ss:$16 sps:$4 sm:$0xff]  }
 0x647   :  { %4048 = vpow2.f32 %v3393_v45 }
 0x648   :  { %4050 = vtanh.f32 %v1160_v34 }
 0x64f   :  { %v4045_v46 = vpop.eup %4044 }
 0x650   :  { %v4047_v47 = vpop.eup %4046  ;;  %v1169_v48 = vadd.f32 1.0, %v4045_v46 }
 0x651   :  { %v1175_v49 = vadd.f32 1.0, %v4047_v47  ;;  %v4049_v50 = vpop.eup %4048 }
 0x652   :  { %4052 = vrcp.f32 %v1169_v48  ;;  %v4051_v51 = vpop.eup %4050  ;;  %v1182_v57 = vadd.f32 1.0, %v4049_v50 }
 0x653   :  { %4054 = vrcp.f32 %v1175_v49 }
 0x654   :  { %4056 = vrcp.f32 %v1182_v57 }
 0x65c   :  { %v4053_v52 = vpop.eup %4052 }
 0x65d   :  { %v4055_v53 = vpop.eup %4054  ;;  %v1186_v54 = vmul.f32 %v4053_v52, %v4051_v51 }
 0x65e   :  { %v1185_v16 = vmul.f32 %v4055_v53, %v4933_v61  ;;  %v4057_v1 = vpop.eup %4056  ;;  %v4098_v61 = vld [vmem:[%s5322_s2 + $0x28] ss:$16 sps:$4 sm:$0xff]  }
 0x660   :  { %v4980_v3 = vadd.f32 %v1186_v54, %v1185_v16 }
 0x662   :  { %4058 = vtanh.f32 %v4980_v3 }
 0x66c   :  { %v4059_v21 = vpop.eup %4058 }
 0x66d   :  { %v1189_v5 = vmul.f32 %v4059_v21, %v4057_v1 }
 0x66f   :  { %v1192_v25 = vadd.f32 %v3394_v4, %v1189_v5 }
 0x671   :  { %v1193_v6 = vpack.c.bf16 %v1192_v25, %v1192_v25 }
 0x673   :  { %1227 = vmatmul.mubr.bf16.vlgmr.msra.gmra.mrb[24].mxu0 %v1193_v6  ;;  %1268 = vmatmul.mubr.bf16.vlgmr.msra.gmra.mrb[24].mxu1 %v1193_v6 }
 0x674   :  { %1305 = vmatpush1.bf16.msra.mxu0 %v4093_v15  ;;  %1346 = vmatpush1.bf16.msra.mxu1 %v4094_v19 }
 0x675   :  { %1306 = vmatprep.subr.bf16.mxu0 %v4095_v20  ;;  %1347 = vmatprep.subr.bf16.mxu1 %v4096_v22 }
 0x676   :  { %1336 = vmatprep.mubr.bf16.mxu0 %v4314_v30  ;;  %1377 = vmatprep.mubr.bf16.mxu1 %v4314_v30 }
 0x678   :  { %1307 = vmatpush1.bf16.msra.mxu0 %v4097_v27  ;;  %1348 = vmatpush1.bf16.msra.mxu1 %v4098_v61  ;;  %v3398_v27 = vld [vmem:[%s5321_s1 + $0x38] sm:$0xff] }
 0x679   :  { %1308 = vmatprep.subr.bf16.mxu0 %v4099_v26  ;;  %1349 = vmatprep.subr.bf16.mxu1 %v4100_v24 }
 0x67c   :  { %1309 = vmatpush1.bf16.msra.mxu0 %v4101_v2  ;;  %1350 = vmatpush1.bf16.msra.mxu1 %v4102_v58 }
 0x67d   :  { %1310 = vmatprep.subr.bf16.mxu0 %v4103_v28  ;;  %1351 = vmatprep.subr.bf16.mxu1 %v4104_v18 }
 0x680   :  { %1311 = vmatpush1.bf16.msra.mxu0 %v4105_v29  ;;  %1352 = vmatpush1.bf16.msra.mxu1 %v4106_v31 }
 0x681   :  { %1312 = vmatprep.subr.bf16.mxu0 %v4107_v32  ;;  %1353 = vmatprep.subr.bf16.mxu1 %v4108_v33 }
 0x684   :  { %1313 = vmatpush1.bf16.msra.mxu0 %v4109_v35  ;;  %1354 = vmatpush1.bf16.msra.mxu1 %v4110_v36 }
 0x685   :  { %1314 = vmatprep.subr.bf16.mxu0 %v4111_v37  ;;  %1355 = vmatprep.subr.bf16.mxu1 %v4112_v38 }
 0x688   :  { %1315 = vmatpush1.bf16.msra.mxu0 %v4113_v39  ;;  %1356 = vmatpush1.bf16.msra.mxu1 %v4654_v55  ;;  %v4117_v55 = vld [vmem:[%s5322_s2 + $0xe0] ss:$16 sps:$4 sm:$0xff]  }
 0x689   :  { %1316 = vmatprep.subr.bf16.mxu0 %v4114_v40  ;;  %1357 = vmatprep.subr.bf16.mxu1 %v4660_v56 }
 0x68c   :  { %1317 = vmatpush1.bf16.msra.mxu0 %v4115_v41  ;;  %1358 = vmatpush1.bf16.msra.mxu1 %v4676_v59 }
 0x68d   :  { %1318 = vmatprep.subr.bf16.mxu0 %v4116_v42  ;;  %1359 = vmatprep.subr.bf16.mxu1 %v4682_v60 }
 0x690   :  { %1319 = vmatpush1.bf16.msra.mxu0 %v4117_v55  ;;  %1360 = vmatpush1.bf16.msra.mxu1 %v4689_v62 }
 0x746   :  { %v1228_v56 = vpop.f32.mrb[24].mxu0  ;;  %v1269_v43 = vpop.f32.mrb[24].mxu1 }
 0x747   :  { %v1229_v44 = vadd.f32 %v1228_v56, %v4732_v63  ;;  %v1230_v45 = vpop.f32.mrb[25].mxu0  ;;  %v1271_v59 = vpop.f32.mrb[25].mxu1  ;;  %v1270_v62 = vadd.f32 %v1269_v43, %v4750_v23 }
 0x748   :  { %v1231_v34 = vadd.f32 %v1230_v45, %v4737_v0  ;;  %v1232_v46 = vpop.f32.mrb[26].mxu0  ;;  %v1273_v47 = vpop.f32.mrb[26].mxu1  ;;  %v1272_v51 = vadd.f32 %v1271_v59, %v4744_v17 }
 0x749   :  { %v3395_v48 = vmul.f32 -1.442695, %v1229_v44  ;;  %v1233_v49 = vpop.f32.mrb[27].mxu0  ;;  %v1274_v60 = vpop.f32.mrb[27].mxu1 }
 0x74a   :  { %v3396_v50 = vmul.f32 -1.442695, %v1231_v34  ;;  %v3397_v52 = vmul.f32 -1.442695, %v1272_v51 }
 0x74b   :  { %4060 = vpow2.f32 %v3395_v48 }
 0x74c   :  { %4062 = vpow2.f32 %v3396_v50 }
 0x74d   :  { %4064 = vpow2.f32 %v3397_v52 }
 0x74e   :  { %4066 = vtanh.f32 %v1270_v62 }
 0x755   :  { %v4061_v53 = vpop.eup %4060 }
 0x756   :  { %v4063_v54 = vpop.eup %4062  ;;  %v1279_v57 = vadd.f32 1.0, %v4061_v53 }
 0x757   :  { %v1285_v16 = vadd.f32 1.0, %v4063_v54  ;;  %v4065_v1 = vpop.eup %4064 }
 0x758   :  { %4068 = vrcp.f32 %v1279_v57  ;;  %v4067_v21 = vpop.eup %4066  ;;  %v1292_v6 = vadd.f32 1.0, %v4065_v1 }
 0x759   :  { %4070 = vrcp.f32 %v1285_v16 }
 0x75a   :  { %4072 = vrcp.f32 %v1292_v6 }
 0x762   :  { %v4069_v4 = vpop.eup %4068 }
 0x763   :  { %v4071_v5 = vpop.eup %4070  ;;  %v1296_v25 = vmul.f32 %v4069_v4, %v4067_v21 }
 0x764   :  { %v1295_v15 = vmul.f32 %v4071_v5, %v4980_v3  ;;  %v4073_v20 = vpop.eup %4072 }
 0x766   :  { %v1297_v19 = vadd.f32 %v1296_v25, %v1295_v15 }
 0x768   :  { %4074 = vtanh.f32 %v1297_v19 }
 0x772   :  { %v4075_v22 = vpop.eup %4074 }
 0x773   :  { %v1299_v61 = vmul.f32 %v4075_v22, %v4073_v20 }
 0x775   :  { %v1302_v26 = vadd.f32 %v3398_v27, %v1299_v61 }
 0x777   :  { %v1303_v24 = vpack.c.bf16 %v1302_v26, %v1302_v26 }
 0x779   :  { %1337 = vmatmul.mubr.bf16.vlgmr.msra.gmra.mrb[28].mxu0 %v1303_v24  ;;  %1378 = vmatmul.mubr.bf16.vlgmr.msra.gmra.mrb[28].mxu1 %v1303_v24 }
 0x84c   :  { %v1338_v2 = vpop.f32.mrb[28].mxu0  ;;  %v1379_v58 = vpop.f32.mrb[28].mxu1 }
 0x84d   :  { %v1339_v28 = vadd.f32 %v1338_v2, %v4732_v63  ;;  %v1340_v18 = vpop.f32.mrb[29].mxu0  ;;  %v1381_v3 = vpop.f32.mrb[29].mxu1  ;;  %v1380_v40 = vadd.f32 %v1379_v58, %v4750_v23 }
 0x84e   :  { %v1341_v29 = vadd.f32 %v1340_v18, %v4737_v0  ;;  %v1342_v31 = vpop.f32.mrb[30].mxu0  ;;  %v1383_v32 = vpop.f32.mrb[30].mxu1  ;;  %v1382_v38 = vadd.f32 %v1381_v3, %v4744_v17 }
 0x84f   :  { %v3399_v33 = vmul.f32 -1.442695, %v1339_v28  ;;  %v1343_v35 = vpop.f32.mrb[31].mxu0  ;;  %v1384_v36 = vpop.f32.mrb[31].mxu1 }
 0x850   :  { %v3400_v37 = vmul.f32 -1.442695, %v1341_v29  ;;  %v3401_v39 = vmul.f32 -1.442695, %v1382_v38 }
 0x851   :  { %4076 = vpow2.f32 %v3399_v33 }
 0x852   :  { %4078 = vpow2.f32 %v3400_v37 }
 0x853   :  { %4080 = vpow2.f32 %v3401_v39 }
 0x854   :  { %4082 = vtanh.f32 %v1380_v40 }
 0x85b   :  { %v4077_v41 = vpop.eup %4076 }
 0x85c   :  { %v4079_v42 = vpop.eup %4078  ;;  %v1389_v63 = vadd.f32 1.0, %v4077_v41 }
 0x85d   :  { %v1395_v55 = vadd.f32 1.0, %v4079_v42  ;;  %v4081_v0 = vpop.eup %4080 }
 0x85e   :  { %4084 = vrcp.f32 %v1389_v63  ;;  %v4083_v56 = vpop.eup %4082  ;;  %v1402_v59 = vadd.f32 1.0, %v4081_v0 }
 0x85f   :  { %4086 = vrcp.f32 %v1395_v55 }
 0x860   :  { %4088 = vrcp.f32 %v1402_v59 }
 0x868   :  { %v4085_v43 = vpop.eup %4084 }
 0x869   :  { %v4087_v44 = vpop.eup %4086  ;;  %v1406_v45 = vmul.f32 %v4085_v43, %v4083_v56 }
 0x86a   :  { %v1405_v34 = vmul.f32 %v4087_v44, %v1297_v19  ;;  %v4089_v17 = vpop.eup %4088 }
 0x86c   :  { %v5080_v46 = vadd.f32 %v1406_v45, %v1405_v34 }
 0x86e   :  { %4090 = vtanh.f32 %v5080_v46 }
 0x878   :  { %v4091_v23 = vpop.eup %4090 }
 0x879   :  { %v5083_v47 = vmul.f32 %v4091_v23, %v4089_v17 }
 0x87a   :  { %4268 = dma.done.wait [#allocation8], 1024 }
 0x87b   :  { %4269 = vsyncadd [#allocation8], 4294966272 }
 0x87c   :  { %4270 = dma.done.wait [#allocation8 + $0x1], 1024 }
 0x87d   :  { %4271 = vsyncadd [#allocation8 + $0x1], 4294966272 }
 0x87e   :  { %4272 = dma.done.wait [#allocation8 + $0x2], 4096 }
 0x87f   :  { %4273 = vsyncadd [#allocation8 + $0x2], 4294963200 }
 0x880   :  { %4274 = dma.done.wait [#allocation8 + $0x3], 512 }
 0x881   :  { %4275 = vsyncadd [#allocation8 + $0x3], 4294966784 }
 0x882   :  { %4276 = dma.done.wait [#allocation8 + $0x4], 1024 }
 0x883   :  { %4277 = vsyncadd [#allocation8 + $0x4], 4294966272 }
 0x884   :  { %4278 = dma.done.wait [#allocation8 + $0x5], 128 }
 0x885   :  { %4279 = vsyncadd [#allocation8 + $0x5], 4294967168  ;;  %v1430_v48 = vlaneseq  ;;  %1511 = vmatprep.mubr.bf16.mxu0 %v4314_v30  ;;  %1552 = vmatprep.mubr.bf16.mxu1 %v4314_v30  ;;  %s5087_s1 = sld [smem:[#allocation9 + $0x1]]  ;;  %v5091_v60 = vld [vmem:[#allocation2 + $0x8] sm:$0xff]   ;;  %v1443_v51 = vld [vmem:[#allocation4] sm:$0xff]  ;;  %v4315_v39 = vmov 0.0  }
 0x886   :  { %v1444_v50 = vld [vmem:[#allocation4 + $0x8] sm:$0xff]  ;;  %v1446_v62 = vld [vmem:[#allocation4 + $0x18] sm:$0xff]  ;;  %v1447_v53 = vld [vmem:[#allocation4 + $0x20] sm:$0xff]  ;;  %1429 = vst [vmem:[%s5330_s10] sm:$0xff] %v4315_v39  ;;  %vm4316_vm0 = vmmov 0  }
 0x887   :  { %v5089_v49 = vand.u32 127, %v1430_v48  ;;  %1479 = vmatprep.subr.bf16.mxu0 %v1444_v50  ;;  %v1448_v52 = vld [vmem:[#allocation4 + $0x28] sm:$0xff]  ;;  %1520 = vmatprep.subr.bf16.mxu1 %v1446_v62  ;;  %v1445_v54 = vld [vmem:[#allocation4 + $0x10] sm:$0xff]  ;;  %v1450_v16 = vld [vmem:[#allocation4 + $0x38] sm:$0xff] }
 0x888   :  { %1480 = vmatpush1.bf16.msra.mxu0 %v1443_v51  ;;  %v1452_v57 = vld [vmem:[#allocation4 + $0x48] sm:$0xff]  ;;  %1521 = vmatpush1.bf16.msra.mxu1 %v1445_v54  ;;  %v1449_v1 = vld [vmem:[#allocation4 + $0x30] sm:$0xff]  ;;  %v1454_v21 = vld [vmem:[#allocation4 + $0x58] sm:$0xff] }
 0x889   :  { %1481 = vmatprep.subr.bf16.mxu0 %v1448_v52  ;;  %1522 = vmatprep.subr.bf16.mxu1 %v1450_v16  ;;  %v1451_v4 = vld [vmem:[#allocation4 + $0x40] sm:$0xff]  ;;  %v1456_v5 = vld [vmem:[#allocation4 + $0x68] sm:$0xff]  ;;  %v1453_v25 = vld [vmem:[#allocation4 + $0x50] sm:$0xff] }
 0x88a   :  { %v1458_v6 = vld [vmem:[#allocation4 + $0x78] sm:$0xff]  ;;  %v1455_v15 = vld [vmem:[#allocation4 + $0x60] sm:$0xff]  ;;  %v1460_v19 = vld [vmem:[#allocation4 + $0x88] sm:$0xff] }
 0x88b   :  { %p1640_p5 = scmp.ne.s32.totalorder %s5087_s1, 0  ;;  %v1457_v20 = vld [vmem:[#allocation4 + $0x70] sm:$0xff]  ;;  %v1462_v22 = vld [vmem:[#allocation4 + $0x98] sm:$0xff]  ;;  %v1459_v27 = vld [vmem:[#allocation4 + $0x80] sm:$0xff] }
 0x88c   :  { %1482 = vmatpush1.bf16.msra.mxu0 %v1447_v53  ;;  %1523 = vmatpush1.bf16.msra.mxu1 %v1449_v1  ;;  %v1464_v61 = vld [vmem:[#allocation4 + $0xa8] sm:$0xff]  ;;  %v1461_v26 = vld [vmem:[#allocation4 + $0x90] sm:$0xff]  ;;  %v1466_v24 = vld [vmem:[#allocation4 + $0xb8] sm:$0xff]  ;;  %vm4318_vm3 = vmmov (!%p1640_p5), 0  }
 0x88d   :  { %1483 = vmatprep.subr.bf16.mxu0 %v1452_v57  ;;  %1524 = vmatprep.subr.bf16.mxu1 %v1454_v21  ;;  %v1463_v2 = vld [vmem:[#allocation4 + $0xa0] sm:$0xff]  ;;  %v1468_v58 = vld [vmem:[#allocation4 + $0xc8] sm:$0xff]  ;;  %v1465_v28 = vld [vmem:[#allocation4 + $0xb0] sm:$0xff] }
 0x88e   :  { %v1440_v18 = vld [vmem:[#allocation2] sm:$0xff]  ;;  %v1470_v3 = vld [vmem:[#allocation4 + $0xd8] sm:$0xff]  ;;  %v1472_v31 = vld [vmem:[#allocation4 + $0xe8] sm:$0xff] }
 0x88f   :  { %v1467_v29 = vld [vmem:[#allocation4 + $0xc0] sm:$0xff]  ;;  %v1441_v32 = vadd.f32 %v1440_v18, %v5083_v47  ;;  %v1469_v33 = vld [vmem:[#allocation4 + $0xd0] sm:$0xff]  ;;  %v1474_v35 = vld [vmem:[#allocation4 + $0xf8] sm:$0xff] }
 0x890   :  { %1484 = vmatpush1.bf16.msra.mxu0 %v1451_v4  ;;  %1525 = vmatpush1.bf16.msra.mxu1 %v1453_v25  ;;  %v1471_v36 = vld [vmem:[#allocation4 + $0xe0] sm:$0xff]  ;;  %v1473_v38 = vld [vmem:[#allocation4 + $0xf0] sm:$0xff]  ;;  %v1587_v41 = vld [vmem:[#allocation6 + $0x8] sm:$0xff] }
 0x891   :  { %1485 = vmatprep.subr.bf16.mxu0 %v1456_v5  ;;  %1526 = vmatprep.subr.bf16.mxu1 %v1458_v6  ;;  %v1442_v37 = vpack.c.bf16 %v1441_v32, %v1441_v32  ;;  %v1586_v40 = vld [vmem:[#allocation6] sm:$0xff]  ;;  %v1588_v42 = vld [vmem:[#allocation6 + $0x10] sm:$0xff]  ;;  %v1589_v63 = vld [vmem:[#allocation6 + $0x18] sm:$0xff] }
 0x892   :  { %v1590_v55 = vld [vmem:[#allocation6 + $0x20] sm:$0xff]  ;;  %v1591_v0 = vld [vmem:[#allocation6 + $0x28] sm:$0xff]  ;;  %v1592_v56 = vld [vmem:[#allocation6 + $0x30] sm:$0xff] }
 0x893   :  { %v1593_v43 = vld [vmem:[#allocation6 + $0x38] sm:$0xff]  ;;  %v1475_v44 = vld [vmem:[#allocation5] sm:$0xff]  ;;  %v1476_v45 = vld [vmem:[#allocation5 + $0x8] sm:$0xff] }
 0x894   :  { %1486 = vmatpush1.bf16.msra.mxu0 %v1455_v15  ;;  %1527 = vmatpush1.bf16.msra.mxu1 %v1457_v20  ;;  %v1478_v53 = vld [vmem:[#allocation5 + $0x18] sm:$0xff]  ;;  %v1477_v1 = vld [vmem:[#allocation5 + $0x10] sm:$0xff] }
 0x895   :  { %1487 = vmatprep.subr.bf16.mxu0 %v1460_v19  ;;  %1528 = vmatprep.subr.bf16.mxu1 %v1462_v22 }
 0x898   :  { %1488 = vmatpush1.bf16.msra.mxu0 %v1459_v27  ;;  %1529 = vmatpush1.bf16.msra.mxu1 %v1461_v26 }
 0x899   :  { %1489 = vmatprep.subr.bf16.mxu0 %v1464_v61  ;;  %1530 = vmatprep.subr.bf16.mxu1 %v1466_v24 }
 0x89c   :  { %1490 = vmatpush1.bf16.msra.mxu0 %v1463_v2  ;;  %1531 = vmatpush1.bf16.msra.mxu1 %v1465_v28 }
 0x89d   :  { %1491 = vmatprep.subr.bf16.mxu0 %v1468_v58  ;;  %1532 = vmatprep.subr.bf16.mxu1 %v1470_v3 }
 0x8a0   :  { %1492 = vmatpush1.bf16.msra.mxu0 %v1467_v29  ;;  %1533 = vmatpush1.bf16.msra.mxu1 %v1469_v33  ;;  %v1594_v29 = vld [vmem:[#allocation7] sm:$0xff] }
 0x8a1   :  { %1493 = vmatprep.subr.bf16.mxu0 %v1472_v31  ;;  %1534 = vmatprep.subr.bf16.mxu1 %v1474_v35 }
 0x8a4   :  { %1494 = vmatpush1.bf16.msra.mxu0 %v1471_v36  ;;  %1535 = vmatpush1.bf16.msra.mxu1 %v1473_v38  ;;  %v4280_v36 = vmov %v5091_v60  }
 0x8a5   :  { %3577 = vmatprep.subr.bf16.mxu0 %v4315_v39 }
 0x8a7   :  { %1512 = vmatmul.mubr.bf16.vlgmr.msra.gmra.mrb[32].mxu0 %v1442_v37  ;;  %1553 = vmatmul.mubr.bf16.vlgmr.msra.gmra.mrb[32].mxu1 %v1442_v37 }
 0x8a8   :  { %3578 = vmatpush3.bf16.msra.mxu0 %v1586_v40  ;;  %3593 = vmatprep.mubr.msk.bf16.mxu0 %vm4316_vm0, %v4315_v39 }
 0x8a9   :  { %3579 = vmatprep.subr.bf16.mxu0 %v4315_v39 }
 0x8ac   :  { %3580 = vmatpush3.bf16.msra.mxu0 %v1587_v41 }
 0x8ad   :  { %3581 = vmatprep.subr.bf16.mxu0 %v4315_v39 }
 0x8b0   :  { %3582 = vmatpush3.bf16.msra.mxu0 %v1588_v42  ;;  %v4317_v42 = vmov (!%p1640_p5), 0.0  }
 0x8b1   :  { %3583 = vmatprep.subr.bf16.mxu0 %v4315_v39 }
 0x8b4   :  { %3584 = vmatpush3.bf16.msra.mxu0 %v1589_v63 }
 0x8b5   :  { %3585 = vmatprep.subr.bf16.mxu0 %v4315_v39 }
 0x8b8   :  { %3586 = vmatpush3.bf16.msra.mxu0 %v1590_v55 }
 0x8b9   :  { %3587 = vmatprep.subr.bf16.mxu0 %v4315_v39 }
 0x8bc   :  { %3588 = vmatpush3.bf16.msra.mxu0 %v1591_v0 }
 0x8bd   :  { %3589 = vmatprep.subr.bf16.mxu0 %v4315_v39 }
 0x8c0   :  { %3590 = vmatpush3.bf16.msra.mxu0 %v1592_v56 }
 0x8c1   :  { %3591 = vmatprep.subr.bf16.mxu0 %v4315_v39 }
 0x8c4   :  { %3592 = vmatpush3.bf16.msra.mxu0 %v1593_v43 }
 0x8c5   :  { %3597 = vmatprep.subr.bf16.mxu0 (!%p1640_p5), %v4317_v42 }
 0x97a   :  { %v1513_v59 = vpop.f32.mrb[32].mxu0  ;;  %v1554_v48 = vpop.f32.mrb[32].mxu1 }
 0x97b   :  { %v1514_v34 = vadd.f32 %v1513_v59, %v1475_v44  ;;  %v1515_v17 = vpop.f32.mrb[33].mxu0  ;;  %v1556_v52 = vpop.f32.mrb[33].mxu1  ;;  %v1555_v4 = vadd.f32 %v1554_v48, %v1477_v1 }
 0x97c   :  { %v1516_v23 = vadd.f32 %v1515_v17, %v1476_v45  ;;  %v1517_v47 = vpop.f32.mrb[34].mxu0  ;;  %v1558_v54 = vpop.f32.mrb[34].mxu1  ;;  %v1557_v16 = vadd.f32 %v1556_v52, %v1478_v53 }
 0x97d   :  { %v3402_v50 = vmul.f32 -1.442695, %v1514_v34  ;;  %v1518_v51 = vpop.f32.mrb[35].mxu0  ;;  %v1559_v57 = vpop.f32.mrb[35].mxu1  ;;  %v4319_v34 = vmov (!%p1640_p5), 1.0|1.0  }
 0x97e   :  { %v3403_v62 = vmul.f32 -1.442695, %v1516_v23  ;;  %v3404_v21 = vmul.f32 -1.442695, %v1557_v16 }
 0x97f   :  { %4118 = vpow2.f32 %v3402_v50 }
 0x980   :  { %4120 = vpow2.f32 %v3403_v62 }
 0x981   :  { %4122 = vpow2.f32 %v3404_v21 }
 0x982   :  { %4124 = vtanh.f32 %v1555_v4 }
 0x989   :  { %v4119_v5 = vpop.eup %4118 }
 0x98a   :  { %v4121_v25 = vpop.eup %4120  ;;  %v1564_v6 = vadd.f32 1.0, %v4119_v5 }
 0x98b   :  { %v1570_v15 = vadd.f32 1.0, %v4121_v25  ;;  %v4123_v19 = vpop.eup %4122 }
 0x98c   :  { %4126 = vrcp.f32 %v1564_v6  ;;  %v4125_v20 = vpop.eup %4124  ;;  %v1577_v27 = vadd.f32 1.0, %v4123_v19 }
 0x98d   :  { %4128 = vrcp.f32 %v1570_v15 }
 0x98e   :  { %4130 = vrcp.f32 %v1577_v27 }
 0x996   :  { %v4127_v22 = vpop.eup %4126 }
 0x997   :  { %v4129_v61 = vpop.eup %4128  ;;  %v1581_v26 = vmul.f32 %v4127_v22, %v4125_v20 }
 0x998   :  { %v1580_v24 = vmul.f32 %v4129_v61, %v5080_v46  ;;  %v4131_v58 = vpop.eup %4130 }
 0x99a   :  { %v5110_v2 = vadd.f32 %v1581_v26, %v1580_v24 }
 0x99c   :  { %4132 = vtanh.f32 %v5110_v2 }
 0x9a6   :  { %v4133_v28 = vpop.eup %4132 }
 0x9a7   :  { %v5113_v18 = vmul.f32 %v4133_v28, %v4131_v58 }
 0x9a9   :  { %v1585_v3 = vpack.c.bf16 %v5113_v18, %v5113_v18 }
 0x9ab   :  { %3594 = vmatmul.mubr.bf16.vlgmr.msra.gmra.mrb[36].mxu0 %v1585_v3 }
 0x9ac   :  { %3598 = vmatpush3.bf16.msra.mxu0 (!%p1640_p5), %v4417_v7  ;;  %3613 = vmatprep.mubr.msk.bf16.mxu0 (!%p1640_p5), %vm4318_vm3, %v4317_v42 }
 0x9ad   :  { %3599 = vmatprep.subr.bf16.mxu0 (!%p1640_p5), %v4317_v42 }
 0x9b0   :  { %3600 = vmatpush3.bf16.msra.mxu0 (!%p1640_p5), %v4422_v8 }
 0x9b1   :  { %3601 = vmatprep.subr.bf16.mxu0 (!%p1640_p5), %v4317_v42 }
 0x9b4   :  { %3602 = vmatpush3.bf16.msra.mxu0 (!%p1640_p5), %v4427_v9 }
 0x9b5   :  { %3603 = vmatprep.subr.bf16.mxu0 (!%p1640_p5), %v4317_v42 }
 0x9b8   :  { %3604 = vmatpush3.bf16.msra.mxu0 (!%p1640_p5), %v4432_v10 }
 0x9b9   :  { %3605 = vmatprep.subr.bf16.mxu0 (!%p1640_p5), %v4317_v42 }
 0x9bc   :  { %3606 = vmatpush3.bf16.msra.mxu0 (!%p1640_p5), %v4437_v11 }
 0x9bd   :  { %3607 = vmatprep.subr.bf16.mxu0 (!%p1640_p5), %v4317_v42 }
 0x9c0   :  { %3608 = vmatpush3.bf16.msra.mxu0 (!%p1640_p5), %v4442_v12 }
 0x9c1   :  { %3609 = vmatprep.subr.bf16.mxu0 (!%p1640_p5), %v4317_v42 }
 0x9c4   :  { %3610 = vmatpush3.bf16.msra.mxu0 (!%p1640_p5), %v4447_v13 }
 0x9c5   :  { %3611 = vmatprep.subr.bf16.mxu0 (!%p1640_p5), %v4317_v42 }
 0x9c8   :  { %3612 = vmatpush3.bf16.msra.mxu0 (!%p1640_p5), %v4452_v14 }
 0xa7b   :  { %1646 = sbr.rel (%p1640_p5) target bundleno = 3344 (0xd10), region = 199 }
 0xa7e   :  { %v1629_v31 = vpop.f32.mrb[36].mxu0 }
 0xa7f   :  { %v1630_v32 = vadd.f32 %v1629_v31, %v1594_v29  ;;  %v3595_v33 = vpop.f32.mrb[37].mxu0 }
 0xa80   :  { %v1632_v35 = vpop.f32.mrb[38].mxu0 }
 0xa81   :  { %3405 = vst [vmem:[%s5330_s10 + $0x8] sm:$0xff] %v1630_v32  ;;  %v3596_v46 = vpop.f32.mrb[39].mxu0  ;;  %1647 = vmax.xlane.f32.xlu0 (!%p1640_p5), %v1630_v32 }
 0xb0e   :  { %v1648_v37 = vpop.xlane.xlu0 %1647 }
 0xb0f   :  { %vm1649_vm1 = vcmp.eq.f32.partialorder %v1630_v32, %v1648_v37 }
 0xb10   :  { %v1650_v38 = vsel %vm1649_vm1, %v5089_v49, 128 }
 0xb11   :  { %v1652_v40 = vshra.s32 %v1650_v38, 16  ;;  %v1651_v60 = vand.u32 65535, %v1650_v38 }
 0xb13   :  { %v1654_v41 = vcvt.s32.f32 %v1652_v40  ;;  %v1653_v55 = vcvt.s32.f32 %v1651_v60 }
 0xb15   :  { %1655 = vmin.xlane.f32.xlu0 %v1654_v41 }
 0xba2   :  { %v1656_v63 = vpop.xlane.xlu0 %1655 }
 0xba3   :  { %vm1657_vm2 = vcmp.eq.f32.partialorder %v1654_v41, %v1656_v63  ;;  %v1662_v56 = vcvt.f32.s32 %v1656_v63 }
 0xba4   :  { %v1658_v0 = vsel %vm1657_vm2, %v1653_v55, inf }
 0xba5   :  { %1659 = vmin.xlane.f32.xlu1 %v1658_v0  ;;  %v1663_v44 = vshll.u32 %v1662_v56, 16 }
 0xc32   :  { %v1660_v43 = vpop.xlane.xlu1 %1659 }
 0xc33   :  { %v1661_v45 = vcvt.f32.s32 %v1660_v43 }
 0xc35   :  { %v1664_v59 = vadd.s32 %v1663_v44, %v1661_v45 }
 0xc37   :  { %vm1665_vm4 = vcmp.eq.s32.totalorder %v5089_v49, %v1664_v59 }
 0xc38   :  { %vm3408_vm5 = vmpackc.low %vm1665_vm4, %vm1665_vm4 }
 0xc39   :  { %3614 = vmatmul.mubr.msk.bf16.vlgmr.msra.gmra.mrb[0].mxu0 %vm3408_vm5, %v4319_v34 }
 0xd0c   :  { %v1703_v36 = vpop.f32.mrb[0].mxu0  }
 0xd0d   :  { %v3615_v17 = vpop.f32.mrb[1].mxu0 }
 0xd0e   :  { %v1706_v23 = vpop.f32.mrb[2].mxu0 }
 0xd0f   :  { %v3616_v47 = vpop.f32.mrb[3].mxu0 }
 0xd10 PF:  { %v1713_v48 = vld [vmem:[#allocation4 + $0x8] sm:$0xff]  ;;  %v1712_v50 = vld [vmem:[#allocation4] sm:$0xff]  ;;  %1780 = vmatprep.mubr.bf16.mxu0 %v4314_v30  ;;  %1821 = vmatprep.mubr.bf16.mxu1 %v4314_v30  ;;  %v1715_v52 = vld [vmem:[#allocation4 + $0x18] sm:$0xff]  ;;  %v1710_v32 = vadd.f32 %v4282_v36, %v5113_v18  ;;  %s3414_s22 = sld [smem:[#allocation9 + $0x2]]  ;;  %v4282_v36 = vphi %v4280_v36, %v1703_v36  }
 0xd11   :  { %v1717_v51 = vld [vmem:[#allocation4 + $0x28] sm:$0xff]  ;;  %1748 = vmatprep.subr.bf16.mxu0 %v1713_v48  ;;  %v1716_v62 = vld [vmem:[#allocation4 + $0x20] sm:$0xff]  ;;  %1789 = vmatprep.subr.bf16.mxu1 %v1715_v52  ;;  %v1714_v53 = vld [vmem:[#allocation4 + $0x10] sm:$0xff] }
 0xd12   :  { %1749 = vmatpush1.bf16.msra.mxu0 %v1712_v50  ;;  %v1719_v54 = vld [vmem:[#allocation4 + $0x38] sm:$0xff]  ;;  %v1721_v57 = vld [vmem:[#allocation4 + $0x48] sm:$0xff]  ;;  %1790 = vmatpush1.bf16.msra.mxu1 %v1714_v53  ;;  %v1718_v16 = vld [vmem:[#allocation4 + $0x30] sm:$0xff]  ;;  %v1711_v37 = vpack.c.bf16 %v1710_v32, %v1710_v32 }
 0xd13   :  { %1750 = vmatprep.subr.bf16.mxu0 %v1717_v51  ;;  %1791 = vmatprep.subr.bf16.mxu1 %v1719_v54  ;;  %v1723_v1 = vld [vmem:[#allocation4 + $0x58] sm:$0xff]  ;;  %v1720_v21 = vld [vmem:[#allocation4 + $0x40] sm:$0xff]  ;;  %v1725_v4 = vld [vmem:[#allocation4 + $0x68] sm:$0xff] }
 0xd14   :  { %v1722_v5 = vld [vmem:[#allocation4 + $0x50] sm:$0xff]  ;;  %v1727_v25 = vld [vmem:[#allocation4 + $0x78] sm:$0xff]  ;;  %v1724_v6 = vld [vmem:[#allocation4 + $0x60] sm:$0xff] }
 0xd15   :  { %v1729_v15 = vld [vmem:[#allocation4 + $0x88] sm:$0xff]  ;;  %v1726_v19 = vld [vmem:[#allocation4 + $0x70] sm:$0xff]  ;;  %v1731_v20 = vld [vmem:[#allocation4 + $0x98] sm:$0xff] }
 0xd16   :  { %1751 = vmatpush1.bf16.msra.mxu0 %v1716_v62  ;;  %1792 = vmatpush1.bf16.msra.mxu1 %v1718_v16  ;;  %v1728_v22 = vld [vmem:[#allocation4 + $0x80] sm:$0xff]  ;;  %v1733_v27 = vld [vmem:[#allocation4 + $0xa8] sm:$0xff]  ;;  %v1730_v61 = vld [vmem:[#allocation4 + $0x90] sm:$0xff]  ;;  %p1909_p6 = scmp.ne.s32.totalorder %s3414_s22, 0 }
 0xd17   :  { %1752 = vmatprep.subr.bf16.mxu0 %v1721_v57  ;;  %1793 = vmatprep.subr.bf16.mxu1 %v1723_v1  ;;  %v1735_v26 = vld [vmem:[#allocation4 + $0xb8] sm:$0xff]  ;;  %v1732_v24 = vld [vmem:[#allocation4 + $0xa0] sm:$0xff]  ;;  %v1737_v58 = vld [vmem:[#allocation4 + $0xc8] sm:$0xff]  ;;  %vm4321_vm8 = vmmov (!%p1909_p6), 0  }
 0xd18   :  { %v1734_v28 = vld [vmem:[#allocation4 + $0xb0] sm:$0xff]  ;;  %v1739_v3 = vld [vmem:[#allocation4 + $0xd8] sm:$0xff]  ;;  %v1736_v29 = vld [vmem:[#allocation4 + $0xc0] sm:$0xff] }
 0xd19   :  { %v1741_v31 = vld [vmem:[#allocation4 + $0xe8] sm:$0xff]  ;;  %v1738_v33 = vld [vmem:[#allocation4 + $0xd0] sm:$0xff]  ;;  %v1743_v35 = vld [vmem:[#allocation4 + $0xf8] sm:$0xff] }
 0xd1a   :  { %1753 = vmatpush1.bf16.msra.mxu0 %v1720_v21  ;;  %1794 = vmatpush1.bf16.msra.mxu1 %v1722_v5  ;;  %v1740_v46 = vld [vmem:[#allocation4 + $0xe0] sm:$0xff]  ;;  %v1742_v38 = vld [vmem:[#allocation4 + $0xf0] sm:$0xff]  ;;  %v1856_v36 = vld [vmem:[#allocation6 + $0x8] sm:$0xff] }
 0xd1b   :  { %1754 = vmatprep.subr.bf16.mxu0 %v1725_v4  ;;  %1795 = vmatprep.subr.bf16.mxu1 %v1727_v25  ;;  %v1855_v18 = vld [vmem:[#allocation6] sm:$0xff]  ;;  %v1857_v40 = vld [vmem:[#allocation6 + $0x10] sm:$0xff]  ;;  %v1858_v41 = vld [vmem:[#allocation6 + $0x18] sm:$0xff] }
 0xd1c   :  { %v1859_v42 = vld [vmem:[#allocation6 + $0x20] sm:$0xff]  ;;  %v1860_v60 = vld [vmem:[#allocation6 + $0x28] sm:$0xff]  ;;  %v1861_v63 = vld [vmem:[#allocation6 + $0x30] sm:$0xff] }
 0xd1d   :  { %v1862_v55 = vld [vmem:[#allocation6 + $0x38] sm:$0xff]  ;;  %v1744_v0 = vld [vmem:[#allocation5] sm:$0xff]  ;;  %v1745_v56 = vld [vmem:[#allocation5 + $0x8] sm:$0xff] }
 0xd1e   :  { %1755 = vmatpush1.bf16.msra.mxu0 %v1724_v6  ;;  %1796 = vmatpush1.bf16.msra.mxu1 %v1726_v19  ;;  %v1747_v51 = vld [vmem:[#allocation5 + $0x18] sm:$0xff]  ;;  %v1746_v54 = vld [vmem:[#allocation5 + $0x10] sm:$0xff] }
 0xd1f   :  { %1756 = vmatprep.subr.bf16.mxu0 %v1729_v15  ;;  %1797 = vmatprep.subr.bf16.mxu1 %v1731_v20 }
 0xd22   :  { %1757 = vmatpush1.bf16.msra.mxu0 %v1728_v22  ;;  %1798 = vmatpush1.bf16.msra.mxu1 %v1730_v61 }
 0xd23   :  { %1758 = vmatprep.subr.bf16.mxu0 %v1733_v27  ;;  %1799 = vmatprep.subr.bf16.mxu1 %v1735_v26 }
 0xd26   :  { %1759 = vmatpush1.bf16.msra.mxu0 %v1732_v24  ;;  %1800 = vmatpush1.bf16.msra.mxu1 %v1734_v28 }
 0xd27   :  { %1760 = vmatprep.subr.bf16.mxu0 %v1737_v58  ;;  %1801 = vmatprep.subr.bf16.mxu1 %v1739_v3  ;;  %v1907_v3 = vld [vmem:[#allocation2 + $0x10] sm:$0xff]  }
 0xd2a   :  { %1761 = vmatpush1.bf16.msra.mxu0 %v1736_v29  ;;  %1802 = vmatpush1.bf16.msra.mxu1 %v1738_v33  ;;  %v1863_v29 = vld [vmem:[#allocation7] sm:$0xff] }
 0xd2b   :  { %1762 = vmatprep.subr.bf16.mxu0 %v1741_v31  ;;  %1803 = vmatprep.subr.bf16.mxu1 %v1743_v35 }
 0xd2e   :  { %1763 = vmatpush1.bf16.msra.mxu0 %v1740_v46  ;;  %1804 = vmatpush1.bf16.msra.mxu1 %v1742_v38  ;;  %v4284_v46 = vmov %v1907_v3  }
 0xd2f   :  { %3617 = vmatprep.subr.bf16.mxu0 %v4315_v39 }
 0xd31   :  { %1781 = vmatmul.mubr.bf16.vlgmr.msra.gmra.mrb[0].mxu0 %v1711_v37  ;;  %1822 = vmatmul.mubr.bf16.vlgmr.msra.gmra.mrb[0].mxu1 %v1711_v37 }
 0xd32   :  { %3633 = vmatprep.mubr.msk.bf16.mxu0 %vm4316_vm0, %v4315_v39  ;;  %3618 = vmatpush3.bf16.msra.mxu0 %v1855_v18 }
 0xd33   :  { %3619 = vmatprep.subr.bf16.mxu0 %v4315_v39 }
 0xd36   :  { %3620 = vmatpush3.bf16.msra.mxu0 %v1856_v36 }
 0xd37   :  { %3621 = vmatprep.subr.bf16.mxu0 %v4315_v39 }
 0xd3a   :  { %3622 = vmatpush3.bf16.msra.mxu0 %v1857_v40  ;;  %v4320_v40 = vmov (!%p1909_p6), 0.0  }
 0xd3b   :  { %3623 = vmatprep.subr.bf16.mxu0 %v4315_v39 }
 0xd3e   :  { %3624 = vmatpush3.bf16.msra.mxu0 %v1858_v41 }
 0xd3f   :  { %3625 = vmatprep.subr.bf16.mxu0 %v4315_v39 }
 0xd42   :  { %3626 = vmatpush3.bf16.msra.mxu0 %v1859_v42 }
 0xd43   :  { %3627 = vmatprep.subr.bf16.mxu0 %v4315_v39 }
 0xd46   :  { %3628 = vmatpush3.bf16.msra.mxu0 %v1860_v60 }
 0xd47   :  { %3629 = vmatprep.subr.bf16.mxu0 %v4315_v39 }
 0xd4a   :  { %3630 = vmatpush3.bf16.msra.mxu0 %v1861_v63 }
 0xd4b   :  { %3631 = vmatprep.subr.bf16.mxu0 %v4315_v39 }
 0xd4e   :  { %3632 = vmatpush3.bf16.msra.mxu0 %v1862_v55 }
 0xd4f   :  { %3637 = vmatprep.subr.bf16.mxu0 (!%p1909_p6), %v4320_v40 }
 0xe04   :  { %v1782_v43 = vpop.f32.mrb[0].mxu0  ;;  %v1823_v17 = vpop.f32.mrb[0].mxu1 }
 0xe05   :  { %v1783_v44 = vadd.f32 %v1782_v43, %v1744_v0  ;;  %v1784_v45 = vpop.f32.mrb[1].mxu0  ;;  %v1825_v48 = vpop.f32.mrb[1].mxu1  ;;  %v1824_v16 = vadd.f32 %v1823_v17, %v1746_v54 }
 0xe06   :  { %v1785_v59 = vadd.f32 %v1784_v45, %v1745_v56  ;;  %v1786_v34 = vpop.f32.mrb[2].mxu0  ;;  %v1827_v52 = vpop.f32.mrb[2].mxu1  ;;  %v1826_v53 = vadd.f32 %v1825_v48, %v1747_v51  ;;  %v4322_v45 = vmov (!%p1909_p6), 1.0|1.0  }
 0xe07   :  { %v3410_v23 = vmul.f32 -1.442695, %v1783_v44  ;;  %v1787_v47 = vpop.f32.mrb[3].mxu0  ;;  %v1828_v62 = vpop.f32.mrb[3].mxu1 }
 0xe08   :  { %v3411_v50 = vmul.f32 -1.442695, %v1785_v59  ;;  %v3412_v57 = vmul.f32 -1.442695, %v1826_v53 }
 0xe09   :  { %4134 = vpow2.f32 %v3410_v23 }
 0xe0a   :  { %4136 = vpow2.f32 %v3411_v50 }
 0xe0b   :  { %4138 = vpow2.f32 %v3412_v57 }
 0xe0c   :  { %4140 = vtanh.f32 %v1824_v16 }
 0xe13   :  { %v4135_v1 = vpop.eup %4134 }
 0xe14   :  { %v4137_v21 = vpop.eup %4136  ;;  %v1833_v4 = vadd.f32 1.0, %v4135_v1 }
 0xe15   :  { %v1839_v5 = vadd.f32 1.0, %v4137_v21  ;;  %v4139_v25 = vpop.eup %4138 }
 0xe16   :  { %4142 = vrcp.f32 %v1833_v4  ;;  %v4141_v6 = vpop.eup %4140  ;;  %v1846_v19 = vadd.f32 1.0, %v4139_v25 }
 0xe17   :  { %4144 = vrcp.f32 %v1839_v5 }
 0xe18   :  { %4146 = vrcp.f32 %v1846_v19 }
 0xe20   :  { %v4143_v15 = vpop.eup %4142 }
 0xe21   :  { %v4145_v20 = vpop.eup %4144  ;;  %v1850_v22 = vmul.f32 %v4143_v15, %v4141_v6 }
 0xe22   :  { %v1849_v27 = vmul.f32 %v4145_v20, %v5110_v2  ;;  %v4147_v26 = vpop.eup %4146 }
 0xe24   :  { %v5147_v61 = vadd.f32 %v1850_v22, %v1849_v27 }
 0xe26   :  { %4148 = vtanh.f32 %v5147_v61 }
 0xe30   :  { %v4149_v24 = vpop.eup %4148 }
 0xe31   :  { %v5150_v58 = vmul.f32 %v4149_v24, %v4147_v26 }
 0xe33   :  { %v1854_v28 = vpack.c.bf16 %v5150_v58, %v5150_v58 }
 0xe35   :  { %3634 = vmatmul.mubr.bf16.vlgmr.msra.gmra.mrb[4].mxu0 %v1854_v28 }
 0xe36   :  { %3638 = vmatpush3.bf16.msra.mxu0 (!%p1909_p6), %v4417_v7  ;;  %3653 = vmatprep.mubr.msk.bf16.mxu0 (!%p1909_p6), %vm4321_vm8, %v4320_v40 }
 0xe37   :  { %3639 = vmatprep.subr.bf16.mxu0 (!%p1909_p6), %v4320_v40 }
 0xe3a   :  { %3640 = vmatpush3.bf16.msra.mxu0 (!%p1909_p6), %v4422_v8 }
 0xe3b   :  { %3641 = vmatprep.subr.bf16.mxu0 (!%p1909_p6), %v4320_v40 }
 0xe3e   :  { %3642 = vmatpush3.bf16.msra.mxu0 (!%p1909_p6), %v4427_v9 }
 0xe3f   :  { %3643 = vmatprep.subr.bf16.mxu0 (!%p1909_p6), %v4320_v40 }
 0xe42   :  { %3644 = vmatpush3.bf16.msra.mxu0 (!%p1909_p6), %v4432_v10 }
 0xe43   :  { %3645 = vmatprep.subr.bf16.mxu0 (!%p1909_p6), %v4320_v40 }
 0xe46   :  { %3646 = vmatpush3.bf16.msra.mxu0 (!%p1909_p6), %v4437_v11 }
 0xe47   :  { %3647 = vmatprep.subr.bf16.mxu0 (!%p1909_p6), %v4320_v40 }
 0xe4a   :  { %3648 = vmatpush3.bf16.msra.mxu0 (!%p1909_p6), %v4442_v12 }
 0xe4b   :  { %3649 = vmatprep.subr.bf16.mxu0 (!%p1909_p6), %v4320_v40 }
 0xe4e   :  { %3650 = vmatpush3.bf16.msra.mxu0 (!%p1909_p6), %v4447_v13 }
 0xe4f   :  { %3651 = vmatprep.subr.bf16.mxu0 (!%p1909_p6), %v4320_v40 }
 0xe52   :  { %3652 = vmatpush3.bf16.msra.mxu0 (!%p1909_p6), %v4452_v14 }
 0xf05   :  { %1915 = sbr.rel (%p1909_p6) target bundleno = 4506 (0x119a), region = 207 }
 0xf08   :  { %v1898_v31 = vpop.f32.mrb[4].mxu0 }
 0xf09   :  { %v1899_v32 = vadd.f32 %v1898_v31, %v1863_v29  ;;  %v3635_v2 = vpop.f32.mrb[5].mxu0 }
 0xf0a   :  { %v1901_v33 = vpop.f32.mrb[6].mxu0 }
 0xf0b   :  { %3413 = vst [vmem:[%s5330_s10 + $0x10] sm:$0xff] %v1899_v32  ;;  %v3636_v35 = vpop.f32.mrb[7].mxu0  ;;  %1916 = vmax.xlane.f32.xlu0 (!%p1909_p6), %v1899_v32 }
 0xf98   :  { %v1917_v37 = vpop.xlane.xlu0 %1916 }
 0xf99   :  { %vm1918_vm6 = vcmp.eq.f32.partialorder %v1899_v32, %v1917_v37 }
 0xf9a   :  { %v1919_v38 = vsel %vm1918_vm6, %v5089_v49, 128 }
 0xf9b   :  { %v1921_v18 = vshra.s32 %v1919_v38, 16  ;;  %v1920_v41 = vand.u32 65535, %v1919_v38 }
 0xf9d   :  { %v1923_v36 = vcvt.s32.f32 %v1921_v18  ;;  %v1922_v60 = vcvt.s32.f32 %v1920_v41 }
 0xf9f   :  { %1924 = vmin.xlane.f32.xlu0 %v1923_v36 }
0x102c   :  { %v1925_v42 = vpop.xlane.xlu0 %1924 }
0x102d   :  { %vm1926_vm7 = vcmp.eq.f32.partialorder %v1923_v36, %v1925_v42  ;;  %v1931_v55 = vcvt.f32.s32 %v1925_v42 }
0x102e   :  { %v1927_v63 = vsel %vm1926_vm7, %v1922_v60, inf }
0x102f   :  { %1928 = vmin.xlane.f32.xlu1 %v1927_v63  ;;  %v1932_v56 = vshll.u32 %v1931_v55, 16 }
0x10bc   :  { %v1929_v0 = vpop.xlane.xlu1 %1928 }
0x10bd   :  { %v1930_v43 = vcvt.f32.s32 %v1929_v0 }
0x10bf   :  { %v1933_v44 = vadd.s32 %v1932_v56, %v1930_v43 }
0x10c1   :  { %vm1934_vm9 = vcmp.eq.s32.totalorder %v5089_v49, %v1933_v44 }
0x10c2   :  { %vm3416_vm10 = vmpackc.low %vm1934_vm9, %vm1934_vm9 }
0x10c3   :  { %3654 = vmatmul.mubr.msk.bf16.vlgmr.msra.gmra.mrb[0].mxu0 %vm3416_vm10, %v4322_v45 }
0x1196   :  { %v1972_v46 = vpop.f32.mrb[0].mxu0  }
0x1197   :  { %v3655_v59 = vpop.f32.mrb[1].mxu0 }
0x1198   :  { %v1975_v34 = vpop.f32.mrb[2].mxu0 }
0x1199   :  { %v3656_v17 = vpop.f32.mrb[3].mxu0 }
0x119a PF:  { %v1982_v23 = vld [vmem:[#allocation4 + $0x8] sm:$0xff]  ;;  %v1981_v47 = vld [vmem:[#allocation4] sm:$0xff]  ;;  %2049 = vmatprep.mubr.bf16.mxu0 %v4314_v30  ;;  %2090 = vmatprep.mubr.bf16.mxu1 %v4314_v30  ;;  %v1984_v50 = vld [vmem:[#allocation4 + $0x18] sm:$0xff]  ;;  %v1979_v32 = vadd.f32 %v4286_v46, %v5150_v58  ;;  %s3422_s24 = sld [smem:[#allocation9 + $0x3]]  ;;  %v4286_v46 = vphi %v4284_v46, %v1972_v46  }
0x119b   :  { %v1986_v48 = vld [vmem:[#allocation4 + $0x28] sm:$0xff]  ;;  %2017 = vmatprep.subr.bf16.mxu0 %v1982_v23  ;;  %v1985_v51 = vld [vmem:[#allocation4 + $0x20] sm:$0xff]  ;;  %2058 = vmatprep.subr.bf16.mxu1 %v1984_v50  ;;  %v1983_v52 = vld [vmem:[#allocation4 + $0x10] sm:$0xff] }
0x119c   :  { %2018 = vmatpush1.bf16.msra.mxu0 %v1981_v47  ;;  %v1988_v62 = vld [vmem:[#allocation4 + $0x38] sm:$0xff]  ;;  %v1990_v53 = vld [vmem:[#allocation4 + $0x48] sm:$0xff]  ;;  %2059 = vmatpush1.bf16.msra.mxu1 %v1983_v52  ;;  %v1987_v54 = vld [vmem:[#allocation4 + $0x30] sm:$0xff]  ;;  %v1980_v37 = vpack.c.bf16 %v1979_v32, %v1979_v32 }
0x119d   :  { %2019 = vmatprep.subr.bf16.mxu0 %v1986_v48  ;;  %2060 = vmatprep.subr.bf16.mxu1 %v1988_v62  ;;  %v1992_v57 = vld [vmem:[#allocation4 + $0x58] sm:$0xff]  ;;  %v1989_v16 = vld [vmem:[#allocation4 + $0x40] sm:$0xff]  ;;  %v1994_v1 = vld [vmem:[#allocation4 + $0x68] sm:$0xff] }
0x119e   :  { %v1991_v21 = vld [vmem:[#allocation4 + $0x50] sm:$0xff]  ;;  %v1996_v4 = vld [vmem:[#allocation4 + $0x78] sm:$0xff]  ;;  %v1993_v5 = vld [vmem:[#allocation4 + $0x60] sm:$0xff] }
0x119f   :  { %v1998_v25 = vld [vmem:[#allocation4 + $0x88] sm:$0xff]  ;;  %v1995_v6 = vld [vmem:[#allocation4 + $0x70] sm:$0xff]  ;;  %v2000_v15 = vld [vmem:[#allocation4 + $0x98] sm:$0xff] }
0x11a0   :  { %2020 = vmatpush1.bf16.msra.mxu0 %v1985_v51  ;;  %2061 = vmatpush1.bf16.msra.mxu1 %v1987_v54  ;;  %v1997_v19 = vld [vmem:[#allocation4 + $0x80] sm:$0xff]  ;;  %v2002_v20 = vld [vmem:[#allocation4 + $0xa8] sm:$0xff]  ;;  %v1999_v22 = vld [vmem:[#allocation4 + $0x90] sm:$0xff]  ;;  %p2178_p7 = scmp.ne.s32.totalorder %s3422_s24, 0 }
0x11a1   :  { %2021 = vmatprep.subr.bf16.mxu0 %v1990_v53  ;;  %2062 = vmatprep.subr.bf16.mxu1 %v1992_v57  ;;  %v2004_v27 = vld [vmem:[#allocation4 + $0xb8] sm:$0xff]  ;;  %v2001_v26 = vld [vmem:[#allocation4 + $0xa0] sm:$0xff]  ;;  %v2006_v24 = vld [vmem:[#allocation4 + $0xc8] sm:$0xff]  ;;  %vm4324_vm13 = vmmov (!%p2178_p7), 0  }
0x11a2   :  { %v2003_v28 = vld [vmem:[#allocation4 + $0xb0] sm:$0xff]  ;;  %v2008_v3 = vld [vmem:[#allocation4 + $0xd8] sm:$0xff]  ;;  %v2005_v29 = vld [vmem:[#allocation4 + $0xc0] sm:$0xff] }
0x11a3   :  { %v2010_v31 = vld [vmem:[#allocation4 + $0xe8] sm:$0xff]  ;;  %v2007_v2 = vld [vmem:[#allocation4 + $0xd0] sm:$0xff]  ;;  %v2012_v33 = vld [vmem:[#allocation4 + $0xf8] sm:$0xff] }
0x11a4   :  { %2022 = vmatpush1.bf16.msra.mxu0 %v1989_v16  ;;  %2063 = vmatpush1.bf16.msra.mxu1 %v1991_v21  ;;  %v2009_v35 = vld [vmem:[#allocation4 + $0xe0] sm:$0xff]  ;;  %v2011_v38 = vld [vmem:[#allocation4 + $0xf0] sm:$0xff]  ;;  %v2125_v46 = vld [vmem:[#allocation6 + $0x8] sm:$0xff] }
0x11a5   :  { %2023 = vmatprep.subr.bf16.mxu0 %v1994_v1  ;;  %2064 = vmatprep.subr.bf16.mxu1 %v1996_v4  ;;  %v2124_v58 = vld [vmem:[#allocation6] sm:$0xff]  ;;  %v2126_v18 = vld [vmem:[#allocation6 + $0x10] sm:$0xff]  ;;  %v2127_v36 = vld [vmem:[#allocation6 + $0x18] sm:$0xff] }
0x11a6   :  { %v2128_v40 = vld [vmem:[#allocation6 + $0x20] sm:$0xff]  ;;  %v2129_v41 = vld [vmem:[#allocation6 + $0x28] sm:$0xff]  ;;  %v2130_v42 = vld [vmem:[#allocation6 + $0x30] sm:$0xff] }
0x11a7   :  { %v2131_v60 = vld [vmem:[#allocation6 + $0x38] sm:$0xff]  ;;  %v2013_v63 = vld [vmem:[#allocation5] sm:$0xff]  ;;  %v2014_v55 = vld [vmem:[#allocation5 + $0x8] sm:$0xff] }
0x11a8   :  { %2024 = vmatpush1.bf16.msra.mxu0 %v1993_v5  ;;  %2065 = vmatpush1.bf16.msra.mxu1 %v1995_v6  ;;  %v2016_v48 = vld [vmem:[#allocation5 + $0x18] sm:$0xff]  ;;  %v2015_v62 = vld [vmem:[#allocation5 + $0x10] sm:$0xff] }
0x11a9   :  { %2025 = vmatprep.subr.bf16.mxu0 %v1998_v25  ;;  %2066 = vmatprep.subr.bf16.mxu1 %v2000_v15 }
0x11ac   :  { %2026 = vmatpush1.bf16.msra.mxu0 %v1997_v19  ;;  %2067 = vmatpush1.bf16.msra.mxu1 %v1999_v22 }
0x11ad   :  { %2027 = vmatprep.subr.bf16.mxu0 %v2002_v20  ;;  %2068 = vmatprep.subr.bf16.mxu1 %v2004_v27 }
0x11b0   :  { %2028 = vmatpush1.bf16.msra.mxu0 %v2001_v26  ;;  %2069 = vmatpush1.bf16.msra.mxu1 %v2003_v28 }
0x11b1   :  { %2029 = vmatprep.subr.bf16.mxu0 %v2006_v24  ;;  %2070 = vmatprep.subr.bf16.mxu1 %v2008_v3  ;;  %v2176_v3 = vld [vmem:[#allocation2 + $0x18] sm:$0xff]  }
0x11b4   :  { %2030 = vmatpush1.bf16.msra.mxu0 %v2005_v29  ;;  %2071 = vmatpush1.bf16.msra.mxu1 %v2007_v2  ;;  %v2132_v29 = vld [vmem:[#allocation7] sm:$0xff] }
0x11b5   :  { %2031 = vmatprep.subr.bf16.mxu0 %v2010_v31  ;;  %2072 = vmatprep.subr.bf16.mxu1 %v2012_v33 }
0x11b8   :  { %2032 = vmatpush1.bf16.msra.mxu0 %v2009_v35  ;;  %2073 = vmatpush1.bf16.msra.mxu1 %v2011_v38  ;;  %v4288_v35 = vmov %v2176_v3  }
0x11b9   :  { %3657 = vmatprep.subr.bf16.mxu0 %v4315_v39 }
0x11bb   :  { %2050 = vmatmul.mubr.bf16.vlgmr.msra.gmra.mrb[0].mxu0 %v1980_v37  ;;  %2091 = vmatmul.mubr.bf16.vlgmr.msra.gmra.mrb[0].mxu1 %v1980_v37 }
0x11bc   :  { %3673 = vmatprep.mubr.msk.bf16.mxu0 %vm4316_vm0, %v4315_v39  ;;  %3658 = vmatpush3.bf16.msra.mxu0 %v2124_v58 }
0x11bd   :  { %3659 = vmatprep.subr.bf16.mxu0 %v4315_v39 }
0x11c0   :  { %3660 = vmatpush3.bf16.msra.mxu0 %v2125_v46 }
0x11c1   :  { %3661 = vmatprep.subr.bf16.mxu0 %v4315_v39 }
0x11c4   :  { %3662 = vmatpush3.bf16.msra.mxu0 %v2126_v18  ;;  %v4323_v18 = vmov (!%p2178_p7), 0.0  }
0x11c5   :  { %3663 = vmatprep.subr.bf16.mxu0 %v4315_v39 }
0x11c8   :  { %3664 = vmatpush3.bf16.msra.mxu0 %v2127_v36 }
0x11c9   :  { %3665 = vmatprep.subr.bf16.mxu0 %v4315_v39 }
0x11cc   :  { %3666 = vmatpush3.bf16.msra.mxu0 %v2128_v40 }
0x11cd   :  { %3667 = vmatprep.subr.bf16.mxu0 %v4315_v39 }
0x11d0   :  { %3668 = vmatpush3.bf16.msra.mxu0 %v2129_v41 }
0x11d1   :  { %3669 = vmatprep.subr.bf16.mxu0 %v4315_v39 }
0x11d4   :  { %3670 = vmatpush3.bf16.msra.mxu0 %v2130_v42 }
0x11d5   :  { %3671 = vmatprep.subr.bf16.mxu0 %v4315_v39 }
0x11d8   :  { %3672 = vmatpush3.bf16.msra.mxu0 %v2131_v60 }
0x11d9   :  { %3677 = vmatprep.subr.bf16.mxu0 (!%p2178_p7), %v4323_v18 }
0x128e   :  { %v2051_v0 = vpop.f32.mrb[0].mxu0  ;;  %v2092_v59 = vpop.f32.mrb[0].mxu1 }
0x128f   :  { %v2052_v56 = vadd.f32 %v2051_v0, %v2013_v63  ;;  %v2053_v43 = vpop.f32.mrb[1].mxu0  ;;  %v2094_v23 = vpop.f32.mrb[1].mxu1  ;;  %v2093_v54 = vadd.f32 %v2092_v59, %v2015_v62 }
0x1290   :  { %v2054_v44 = vadd.f32 %v2053_v43, %v2014_v55  ;;  %v2055_v45 = vpop.f32.mrb[2].mxu0  ;;  %v2096_v50 = vpop.f32.mrb[2].mxu1  ;;  %v2095_v52 = vadd.f32 %v2094_v23, %v2016_v48  ;;  %v4325_v43 = vmov (!%p2178_p7), 1.0|1.0  }
0x1291   :  { %v3418_v34 = vmul.f32 -1.442695, %v2052_v56  ;;  %v2056_v17 = vpop.f32.mrb[3].mxu0  ;;  %v2097_v51 = vpop.f32.mrb[3].mxu1 }
0x1292   :  { %v3419_v47 = vmul.f32 -1.442695, %v2054_v44  ;;  %v3420_v53 = vmul.f32 -1.442695, %v2095_v52 }
0x1293   :  { %4150 = vpow2.f32 %v3418_v34 }
0x1294   :  { %4152 = vpow2.f32 %v3419_v47 }
0x1295   :  { %4154 = vpow2.f32 %v3420_v53 }
0x1296   :  { %4156 = vtanh.f32 %v2093_v54 }
0x129d   :  { %v4151_v57 = vpop.eup %4150 }
0x129e   :  { %v4153_v16 = vpop.eup %4152  ;;  %v2102_v1 = vadd.f32 1.0, %v4151_v57 }
0x129f   :  { %v2108_v21 = vadd.f32 1.0, %v4153_v16  ;;  %v4155_v4 = vpop.eup %4154 }
0x12a0   :  { %4158 = vrcp.f32 %v2102_v1  ;;  %v4157_v5 = vpop.eup %4156  ;;  %v2115_v6 = vadd.f32 1.0, %v4155_v4 }
0x12a1   :  { %4160 = vrcp.f32 %v2108_v21 }
0x12a2   :  { %4162 = vrcp.f32 %v2115_v6 }
0x12aa   :  { %v4159_v25 = vpop.eup %4158 }
0x12ab   :  { %v4161_v15 = vpop.eup %4160  ;;  %v2119_v19 = vmul.f32 %v4159_v25, %v4157_v5 }
0x12ac   :  { %v2118_v20 = vmul.f32 %v4161_v15, %v5147_v61  ;;  %v4163_v27 = vpop.eup %4162 }
0x12ae   :  { %v5181_v22 = vadd.f32 %v2119_v19, %v2118_v20 }
0x12b0   :  { %4164 = vtanh.f32 %v5181_v22 }
0x12ba   :  { %v4165_v26 = vpop.eup %4164 }
0x12bb   :  { %v5184_v24 = vmul.f32 %v4165_v26, %v4163_v27 }
0x12bd   :  { %v2123_v28 = vpack.c.bf16 %v5184_v24, %v5184_v24 }
0x12bf   :  { %3674 = vmatmul.mubr.bf16.vlgmr.msra.gmra.mrb[4].mxu0 %v2123_v28 }
0x12c0   :  { %3678 = vmatpush3.bf16.msra.mxu0 (!%p2178_p7), %v4417_v7  ;;  %3693 = vmatprep.mubr.msk.bf16.mxu0 (!%p2178_p7), %vm4324_vm13, %v4323_v18 }
0x12c1   :  { %3679 = vmatprep.subr.bf16.mxu0 (!%p2178_p7), %v4323_v18 }
0x12c4   :  { %3680 = vmatpush3.bf16.msra.mxu0 (!%p2178_p7), %v4422_v8 }
0x12c5   :  { %3681 = vmatprep.subr.bf16.mxu0 (!%p2178_p7), %v4323_v18 }
0x12c8   :  { %3682 = vmatpush3.bf16.msra.mxu0 (!%p2178_p7), %v4427_v9 }
0x12c9   :  { %3683 = vmatprep.subr.bf16.mxu0 (!%p2178_p7), %v4323_v18 }
0x12cc   :  { %3684 = vmatpush3.bf16.msra.mxu0 (!%p2178_p7), %v4432_v10 }
0x12cd   :  { %3685 = vmatprep.subr.bf16.mxu0 (!%p2178_p7), %v4323_v18 }
0x12d0   :  { %3686 = vmatpush3.bf16.msra.mxu0 (!%p2178_p7), %v4437_v11 }
0x12d1   :  { %3687 = vmatprep.subr.bf16.mxu0 (!%p2178_p7), %v4323_v18 }
0x12d4   :  { %3688 = vmatpush3.bf16.msra.mxu0 (!%p2178_p7), %v4442_v12 }
0x12d5   :  { %3689 = vmatprep.subr.bf16.mxu0 (!%p2178_p7), %v4323_v18 }
0x12d8   :  { %3690 = vmatpush3.bf16.msra.mxu0 (!%p2178_p7), %v4447_v13 }
0x12d9   :  { %3691 = vmatprep.subr.bf16.mxu0 (!%p2178_p7), %v4323_v18 }
0x12dc   :  { %3692 = vmatpush3.bf16.msra.mxu0 (!%p2178_p7), %v4452_v14 }
0x138f   :  { %2184 = sbr.rel (%p2178_p7) target bundleno = 5668 (0x1624), region = 215 }
0x1392   :  { %v2167_v31 = vpop.f32.mrb[4].mxu0 }
0x1393   :  { %v2168_v32 = vadd.f32 %v2167_v31, %v2132_v29  ;;  %v3675_v61 = vpop.f32.mrb[5].mxu0 }
0x1394   :  { %v2170_v2 = vpop.f32.mrb[6].mxu0 }
0x1395   :  { %3421 = vst [vmem:[%s5330_s10 + $0x18] sm:$0xff] %v2168_v32  ;;  %v3676_v33 = vpop.f32.mrb[7].mxu0  ;;  %2185 = vmax.xlane.f32.xlu0 (!%p2178_p7), %v2168_v32 }
0x1422   :  { %v2186_v37 = vpop.xlane.xlu0 %2185 }
0x1423   :  { %vm2187_vm11 = vcmp.eq.f32.partialorder %v2168_v32, %v2186_v37 }
0x1424   :  { %v2188_v38 = vsel %vm2187_vm11, %v5089_v49, 128 }
0x1425   :  { %v2190_v58 = vshra.s32 %v2188_v38, 16  ;;  %v2189_v36 = vand.u32 65535, %v2188_v38 }
0x1427   :  { %v2192_v46 = vcvt.s32.f32 %v2190_v58  ;;  %v2191_v41 = vcvt.s32.f32 %v2189_v36 }
0x1429   :  { %2193 = vmin.xlane.f32.xlu0 %v2192_v46 }
0x14b6   :  { %v2194_v40 = vpop.xlane.xlu0 %2193 }
0x14b7   :  { %vm2195_vm12 = vcmp.eq.f32.partialorder %v2192_v46, %v2194_v40  ;;  %v2200_v60 = vcvt.f32.s32 %v2194_v40 }
0x14b8   :  { %v2196_v42 = vsel %vm2195_vm12, %v2191_v41, inf }
0x14b9   :  { %2197 = vmin.xlane.f32.xlu1 %v2196_v42  ;;  %v2201_v55 = vshll.u32 %v2200_v60, 16 }
0x1546   :  { %v2198_v63 = vpop.xlane.xlu1 %2197 }
0x1547   :  { %v2199_v0 = vcvt.f32.s32 %v2198_v63 }
0x1549   :  { %v2202_v56 = vadd.s32 %v2201_v55, %v2199_v0 }
0x154b   :  { %vm2203_vm14 = vcmp.eq.s32.totalorder %v5089_v49, %v2202_v56 }
0x154c   :  { %vm3424_vm15 = vmpackc.low %vm2203_vm14, %vm2203_vm14 }
0x154d   :  { %3694 = vmatmul.mubr.msk.bf16.vlgmr.msra.gmra.mrb[0].mxu0 %vm3424_vm15, %v4325_v43 }
0x1620   :  { %v2241_v35 = vpop.f32.mrb[0].mxu0  }
0x1621   :  { %v3695_v44 = vpop.f32.mrb[1].mxu0 }
0x1622   :  { %v2244_v45 = vpop.f32.mrb[2].mxu0 }
0x1623   :  { %v3696_v59 = vpop.f32.mrb[3].mxu0 }
0x1624 PF:  { %v2251_v34 = vld [vmem:[#allocation4 + $0x8] sm:$0xff]  ;;  %v2250_v17 = vld [vmem:[#allocation4] sm:$0xff]  ;;  %2318 = vmatprep.mubr.bf16.mxu0 %v4314_v30  ;;  %2359 = vmatprep.mubr.bf16.mxu1 %v4314_v30  ;;  %v2253_v47 = vld [vmem:[#allocation4 + $0x18] sm:$0xff]  ;;  %v2248_v32 = vadd.f32 %v4290_v35, %v5184_v24  ;;  %s3430_s26 = sld [smem:[#allocation9 + $0x4]]  ;;  %v4290_v35 = vphi %v4288_v35, %v2241_v35  }
0x1625   :  { %v2255_v23 = vld [vmem:[#allocation4 + $0x28] sm:$0xff]  ;;  %2286 = vmatprep.subr.bf16.mxu0 %v2251_v34  ;;  %v2254_v48 = vld [vmem:[#allocation4 + $0x20] sm:$0xff]  ;;  %2327 = vmatprep.subr.bf16.mxu1 %v2253_v47  ;;  %v2252_v50 = vld [vmem:[#allocation4 + $0x10] sm:$0xff] }
0x1626   :  { %2287 = vmatpush1.bf16.msra.mxu0 %v2250_v17  ;;  %v2257_v51 = vld [vmem:[#allocation4 + $0x38] sm:$0xff]  ;;  %v2259_v52 = vld [vmem:[#allocation4 + $0x48] sm:$0xff]  ;;  %2328 = vmatpush1.bf16.msra.mxu1 %v2252_v50  ;;  %v2256_v62 = vld [vmem:[#allocation4 + $0x30] sm:$0xff]  ;;  %v2249_v37 = vpack.c.bf16 %v2248_v32, %v2248_v32 }
0x1627   :  { %2288 = vmatprep.subr.bf16.mxu0 %v2255_v23  ;;  %2329 = vmatprep.subr.bf16.mxu1 %v2257_v51  ;;  %v2261_v53 = vld [vmem:[#allocation4 + $0x58] sm:$0xff]  ;;  %v2258_v54 = vld [vmem:[#allocation4 + $0x40] sm:$0xff]  ;;  %v2263_v57 = vld [vmem:[#allocation4 + $0x68] sm:$0xff] }
0x1628   :  { %v2260_v16 = vld [vmem:[#allocation4 + $0x50] sm:$0xff]  ;;  %v2265_v1 = vld [vmem:[#allocation4 + $0x78] sm:$0xff]  ;;  %v2262_v21 = vld [vmem:[#allocation4 + $0x60] sm:$0xff] }
0x1629   :  { %v2267_v4 = vld [vmem:[#allocation4 + $0x88] sm:$0xff]  ;;  %v2264_v5 = vld [vmem:[#allocation4 + $0x70] sm:$0xff]  ;;  %v2269_v25 = vld [vmem:[#allocation4 + $0x98] sm:$0xff] }
0x162a   :  { %2289 = vmatpush1.bf16.msra.mxu0 %v2254_v48  ;;  %2330 = vmatpush1.bf16.msra.mxu1 %v2256_v62  ;;  %v2266_v6 = vld [vmem:[#allocation4 + $0x80] sm:$0xff]  ;;  %v2271_v15 = vld [vmem:[#allocation4 + $0xa8] sm:$0xff]  ;;  %v2268_v19 = vld [vmem:[#allocation4 + $0x90] sm:$0xff]  ;;  %p2447_p8 = scmp.ne.s32.totalorder %s3430_s26, 0 }
0x162b   :  { %2290 = vmatprep.subr.bf16.mxu0 %v2259_v52  ;;  %2331 = vmatprep.subr.bf16.mxu1 %v2261_v53  ;;  %v2273_v20 = vld [vmem:[#allocation4 + $0xb8] sm:$0xff]  ;;  %v2270_v27 = vld [vmem:[#allocation4 + $0xa0] sm:$0xff]  ;;  %v2275_v26 = vld [vmem:[#allocation4 + $0xc8] sm:$0xff]  ;;  %vm4327_vm3 = vmmov (!%p2447_p8), 0  }
0x162c   :  { %v2272_v28 = vld [vmem:[#allocation4 + $0xb0] sm:$0xff]  ;;  %v2277_v3 = vld [vmem:[#allocation4 + $0xd8] sm:$0xff]  ;;  %v2274_v29 = vld [vmem:[#allocation4 + $0xc0] sm:$0xff] }
0x162d   :  { %v2279_v31 = vld [vmem:[#allocation4 + $0xe8] sm:$0xff]  ;;  %v2276_v61 = vld [vmem:[#allocation4 + $0xd0] sm:$0xff]  ;;  %v2281_v2 = vld [vmem:[#allocation4 + $0xf8] sm:$0xff] }
0x162e   :  { %2291 = vmatpush1.bf16.msra.mxu0 %v2258_v54  ;;  %2332 = vmatpush1.bf16.msra.mxu1 %v2260_v16  ;;  %v2278_v33 = vld [vmem:[#allocation4 + $0xe0] sm:$0xff]  ;;  %v2280_v38 = vld [vmem:[#allocation4 + $0xf0] sm:$0xff]  ;;  %v2394_v35 = vld [vmem:[#allocation6 + $0x8] sm:$0xff] }
0x162f   :  { %2292 = vmatprep.subr.bf16.mxu0 %v2263_v57  ;;  %2333 = vmatprep.subr.bf16.mxu1 %v2265_v1  ;;  %v2393_v24 = vld [vmem:[#allocation6] sm:$0xff]  ;;  %v2395_v58 = vld [vmem:[#allocation6 + $0x10] sm:$0xff]  ;;  %v2396_v46 = vld [vmem:[#allocation6 + $0x18] sm:$0xff] }
0x1630   :  { %v2397_v18 = vld [vmem:[#allocation6 + $0x20] sm:$0xff]  ;;  %v2398_v36 = vld [vmem:[#allocation6 + $0x28] sm:$0xff]  ;;  %v2399_v40 = vld [vmem:[#allocation6 + $0x30] sm:$0xff] }
0x1631   :  { %v2400_v41 = vld [vmem:[#allocation6 + $0x38] sm:$0xff]  ;;  %v2282_v42 = vld [vmem:[#allocation5] sm:$0xff]  ;;  %v2283_v60 = vld [vmem:[#allocation5 + $0x8] sm:$0xff] }
0x1632   :  { %2293 = vmatpush1.bf16.msra.mxu0 %v2262_v21  ;;  %2334 = vmatpush1.bf16.msra.mxu1 %v2264_v5  ;;  %v2285_v23 = vld [vmem:[#allocation5 + $0x18] sm:$0xff]  ;;  %v2284_v51 = vld [vmem:[#allocation5 + $0x10] sm:$0xff] }
0x1633   :  { %2294 = vmatprep.subr.bf16.mxu0 %v2267_v4  ;;  %2335 = vmatprep.subr.bf16.mxu1 %v2269_v25 }
0x1636   :  { %2295 = vmatpush1.bf16.msra.mxu0 %v2266_v6  ;;  %2336 = vmatpush1.bf16.msra.mxu1 %v2268_v19 }
0x1637   :  { %2296 = vmatprep.subr.bf16.mxu0 %v2271_v15  ;;  %2337 = vmatprep.subr.bf16.mxu1 %v2273_v20 }
0x163a   :  { %2297 = vmatpush1.bf16.msra.mxu0 %v2270_v27  ;;  %2338 = vmatpush1.bf16.msra.mxu1 %v2272_v28 }
0x163b   :  { %2298 = vmatprep.subr.bf16.mxu0 %v2275_v26  ;;  %2339 = vmatprep.subr.bf16.mxu1 %v2277_v3  ;;  %v2445_v3 = vld [vmem:[#allocation2 + $0x20] sm:$0xff]  }
0x163e   :  { %2299 = vmatpush1.bf16.msra.mxu0 %v2274_v29  ;;  %2340 = vmatpush1.bf16.msra.mxu1 %v2276_v61  ;;  %v2401_v29 = vld [vmem:[#allocation7] sm:$0xff] }
0x163f   :  { %2300 = vmatprep.subr.bf16.mxu0 %v2279_v31  ;;  %2341 = vmatprep.subr.bf16.mxu1 %v2281_v2 }
0x1642   :  { %2301 = vmatpush1.bf16.msra.mxu0 %v2278_v33  ;;  %2342 = vmatpush1.bf16.msra.mxu1 %v2280_v38  ;;  %v4292_v33 = vmov %v2445_v3  }
0x1643   :  { %3697 = vmatprep.subr.bf16.mxu0 %v4315_v39 }
0x1645   :  { %2319 = vmatmul.mubr.bf16.vlgmr.msra.gmra.mrb[0].mxu0 %v2249_v37  ;;  %2360 = vmatmul.mubr.bf16.vlgmr.msra.gmra.mrb[0].mxu1 %v2249_v37 }
0x1646   :  { %3713 = vmatprep.mubr.msk.bf16.mxu0 %vm4316_vm0, %v4315_v39  ;;  %3698 = vmatpush3.bf16.msra.mxu0 %v2393_v24 }
0x1647   :  { %3699 = vmatprep.subr.bf16.mxu0 %v4315_v39 }
0x164a   :  { %3700 = vmatpush3.bf16.msra.mxu0 %v2394_v35 }
0x164b   :  { %3701 = vmatprep.subr.bf16.mxu0 %v4315_v39 }
0x164e   :  { %3702 = vmatpush3.bf16.msra.mxu0 %v2395_v58  ;;  %v4326_v58 = vmov (!%p2447_p8), 0.0  }
0x164f   :  { %3703 = vmatprep.subr.bf16.mxu0 %v4315_v39 }
0x1652   :  { %3704 = vmatpush3.bf16.msra.mxu0 %v2396_v46 }
0x1653   :  { %3705 = vmatprep.subr.bf16.mxu0 %v4315_v39 }
0x1656   :  { %3706 = vmatpush3.bf16.msra.mxu0 %v2397_v18 }
0x1657   :  { %3707 = vmatprep.subr.bf16.mxu0 %v4315_v39 }
0x165a   :  { %3708 = vmatpush3.bf16.msra.mxu0 %v2398_v36 }
0x165b   :  { %3709 = vmatprep.subr.bf16.mxu0 %v4315_v39 }
0x165e   :  { %3710 = vmatpush3.bf16.msra.mxu0 %v2399_v40 }
0x165f   :  { %3711 = vmatprep.subr.bf16.mxu0 %v4315_v39 }
0x1662   :  { %3712 = vmatpush3.bf16.msra.mxu0 %v2400_v41 }
0x1663   :  { %3717 = vmatprep.subr.bf16.mxu0 (!%p2447_p8), %v4326_v58 }
0x1718   :  { %v2320_v63 = vpop.f32.mrb[0].mxu0  ;;  %v2361_v44 = vpop.f32.mrb[0].mxu1 }
0x1719   :  { %v2321_v55 = vadd.f32 %v2320_v63, %v2282_v42  ;;  %v2322_v0 = vpop.f32.mrb[1].mxu0  ;;  %v2363_v34 = vpop.f32.mrb[1].mxu1  ;;  %v2362_v62 = vadd.f32 %v2361_v44, %v2284_v51 }
0x171a   :  { %v2323_v56 = vadd.f32 %v2322_v0, %v2283_v60  ;;  %v2324_v43 = vpop.f32.mrb[2].mxu0  ;;  %v2365_v47 = vpop.f32.mrb[2].mxu1  ;;  %v2364_v50 = vadd.f32 %v2363_v34, %v2285_v23  ;;  %v4328_v0 = vmov (!%p2447_p8), 1.0|1.0  }
0x171b   :  { %v3426_v45 = vmul.f32 -1.442695, %v2321_v55  ;;  %v2325_v59 = vpop.f32.mrb[3].mxu0  ;;  %v2366_v48 = vpop.f32.mrb[3].mxu1 }
0x171c   :  { %v3427_v17 = vmul.f32 -1.442695, %v2323_v56  ;;  %v3428_v52 = vmul.f32 -1.442695, %v2364_v50 }
0x171d   :  { %4166 = vpow2.f32 %v3426_v45 }
0x171e   :  { %4168 = vpow2.f32 %v3427_v17 }
0x171f   :  { %4170 = vpow2.f32 %v3428_v52 }
0x1720   :  { %4172 = vtanh.f32 %v2362_v62 }
0x1727   :  { %v4167_v53 = vpop.eup %4166 }
0x1728   :  { %v4169_v54 = vpop.eup %4168  ;;  %v2371_v57 = vadd.f32 1.0, %v4167_v53 }
0x1729   :  { %v2377_v16 = vadd.f32 1.0, %v4169_v54  ;;  %v4171_v1 = vpop.eup %4170 }
0x172a   :  { %4174 = vrcp.f32 %v2371_v57  ;;  %v4173_v21 = vpop.eup %4172  ;;  %v2384_v5 = vadd.f32 1.0, %v4171_v1 }
0x172b   :  { %4176 = vrcp.f32 %v2377_v16 }
0x172c   :  { %4178 = vrcp.f32 %v2384_v5 }
0x1734   :  { %v4175_v4 = vpop.eup %4174 }
0x1735   :  { %v4177_v25 = vpop.eup %4176  ;;  %v2388_v6 = vmul.f32 %v4175_v4, %v4173_v21 }
0x1736   :  { %v2387_v15 = vmul.f32 %v4177_v25, %v5181_v22  ;;  %v4179_v20 = vpop.eup %4178 }
0x1738   :  { %v5215_v19 = vadd.f32 %v2388_v6, %v2387_v15 }
0x173a   :  { %4180 = vtanh.f32 %v5215_v19 }
0x1744   :  { %v4181_v27 = vpop.eup %4180 }
0x1745   :  { %v5218_v26 = vmul.f32 %v4181_v27, %v4179_v20 }
0x1747   :  { %v2392_v28 = vpack.c.bf16 %v5218_v26, %v5218_v26 }
0x1749   :  { %3714 = vmatmul.mubr.bf16.vlgmr.msra.gmra.mrb[4].mxu0 %v2392_v28 }
0x174a   :  { %3718 = vmatpush3.bf16.msra.mxu0 (!%p2447_p8), %v4417_v7  ;;  %3733 = vmatprep.mubr.msk.bf16.mxu0 (!%p2447_p8), %vm4327_vm3, %v4326_v58 }
0x174b   :  { %3719 = vmatprep.subr.bf16.mxu0 (!%p2447_p8), %v4326_v58 }
0x174e   :  { %3720 = vmatpush3.bf16.msra.mxu0 (!%p2447_p8), %v4422_v8 }
0x174f   :  { %3721 = vmatprep.subr.bf16.mxu0 (!%p2447_p8), %v4326_v58 }
0x1752   :  { %3722 = vmatpush3.bf16.msra.mxu0 (!%p2447_p8), %v4427_v9 }
0x1753   :  { %3723 = vmatprep.subr.bf16.mxu0 (!%p2447_p8), %v4326_v58 }
0x1756   :  { %3724 = vmatpush3.bf16.msra.mxu0 (!%p2447_p8), %v4432_v10 }
0x1757   :  { %3725 = vmatprep.subr.bf16.mxu0 (!%p2447_p8), %v4326_v58 }
0x175a   :  { %3726 = vmatpush3.bf16.msra.mxu0 (!%p2447_p8), %v4437_v11 }
0x175b   :  { %3727 = vmatprep.subr.bf16.mxu0 (!%p2447_p8), %v4326_v58 }
0x175e   :  { %3728 = vmatpush3.bf16.msra.mxu0 (!%p2447_p8), %v4442_v12 }
0x175f   :  { %3729 = vmatprep.subr.bf16.mxu0 (!%p2447_p8), %v4326_v58 }
0x1762   :  { %3730 = vmatpush3.bf16.msra.mxu0 (!%p2447_p8), %v4447_v13 }
0x1763   :  { %3731 = vmatprep.subr.bf16.mxu0 (!%p2447_p8), %v4326_v58 }
0x1766   :  { %3732 = vmatpush3.bf16.msra.mxu0 (!%p2447_p8), %v4452_v14 }
0x1819   :  { %2453 = sbr.rel (%p2447_p8) target bundleno = 6830 (0x1aae), region = 223 }
0x181c   :  { %v2436_v31 = vpop.f32.mrb[4].mxu0 }
0x181d   :  { %v2437_v32 = vadd.f32 %v2436_v31, %v2401_v29  ;;  %v3715_v22 = vpop.f32.mrb[5].mxu0 }
0x181e   :  { %v2439_v61 = vpop.f32.mrb[6].mxu0 }
0x181f   :  { %3429 = vst [vmem:[%s5330_s10 + $0x20] sm:$0xff] %v2437_v32  ;;  %v3716_v2 = vpop.f32.mrb[7].mxu0  ;;  %2454 = vmax.xlane.f32.xlu0 (!%p2447_p8), %v2437_v32 }
0x18ac   :  { %v2455_v37 = vpop.xlane.xlu0 %2454 }
0x18ad   :  { %vm2456_vm1 = vcmp.eq.f32.partialorder %v2437_v32, %v2455_v37 }
0x18ae   :  { %v2457_v38 = vsel %vm2456_vm1, %v5089_v49, 128 }
0x18af   :  { %v2459_v24 = vshra.s32 %v2457_v38, 16  ;;  %v2458_v46 = vand.u32 65535, %v2457_v38 }
0x18b1   :  { %v2461_v35 = vcvt.s32.f32 %v2459_v24  ;;  %v2460_v36 = vcvt.s32.f32 %v2458_v46 }
0x18b3   :  { %2462 = vmin.xlane.f32.xlu0 %v2461_v35 }
0x1940   :  { %v2463_v18 = vpop.xlane.xlu0 %2462 }
0x1941   :  { %vm2464_vm2 = vcmp.eq.f32.partialorder %v2461_v35, %v2463_v18  ;;  %v2469_v41 = vcvt.f32.s32 %v2463_v18 }
0x1942   :  { %v2465_v40 = vsel %vm2464_vm2, %v2460_v36, inf }
0x1943   :  { %2466 = vmin.xlane.f32.xlu1 %v2465_v40  ;;  %v2470_v60 = vshll.u32 %v2469_v41, 16 }
0x19d0   :  { %v2467_v42 = vpop.xlane.xlu1 %2466 }
0x19d1   :  { %v2468_v63 = vcvt.f32.s32 %v2467_v42 }
0x19d3   :  { %v2471_v55 = vadd.s32 %v2470_v60, %v2468_v63 }
0x19d5   :  { %vm2472_vm4 = vcmp.eq.s32.totalorder %v5089_v49, %v2471_v55 }
0x19d6   :  { %vm3432_vm5 = vmpackc.low %vm2472_vm4, %vm2472_vm4 }
0x19d7   :  { %3734 = vmatmul.mubr.msk.bf16.vlgmr.msra.gmra.mrb[0].mxu0 %vm3432_vm5, %v4328_v0 }
0x1aaa   :  { %v2510_v33 = vpop.f32.mrb[0].mxu0  }
0x1aab   :  { %v3735_v56 = vpop.f32.mrb[1].mxu0 }
0x1aac   :  { %v2513_v43 = vpop.f32.mrb[2].mxu0 }
0x1aad   :  { %v3736_v44 = vpop.f32.mrb[3].mxu0 }
0x1aae PF:  { %v2520_v45 = vld [vmem:[#allocation4 + $0x8] sm:$0xff]  ;;  %v2519_v59 = vld [vmem:[#allocation4] sm:$0xff]  ;;  %2587 = vmatprep.mubr.bf16.mxu0 %v4314_v30  ;;  %2628 = vmatprep.mubr.bf16.mxu1 %v4314_v30  ;;  %v2522_v17 = vld [vmem:[#allocation4 + $0x18] sm:$0xff]  ;;  %v2517_v32 = vadd.f32 %v4294_v33, %v5218_v26  ;;  %s3438_s29 = sld [smem:[#allocation9 + $0x5]]  ;;  %v4294_v33 = vphi %v4292_v33, %v2510_v33  }
0x1aaf   :  { %v2524_v34 = vld [vmem:[#allocation4 + $0x28] sm:$0xff]  ;;  %2555 = vmatprep.subr.bf16.mxu0 %v2520_v45  ;;  %v2523_v23 = vld [vmem:[#allocation4 + $0x20] sm:$0xff]  ;;  %2596 = vmatprep.subr.bf16.mxu1 %v2522_v17  ;;  %v2521_v47 = vld [vmem:[#allocation4 + $0x10] sm:$0xff] }
0x1ab0   :  { %2556 = vmatpush1.bf16.msra.mxu0 %v2519_v59  ;;  %v2526_v48 = vld [vmem:[#allocation4 + $0x38] sm:$0xff]  ;;  %v2528_v50 = vld [vmem:[#allocation4 + $0x48] sm:$0xff]  ;;  %2597 = vmatpush1.bf16.msra.mxu1 %v2521_v47  ;;  %v2525_v51 = vld [vmem:[#allocation4 + $0x30] sm:$0xff]  ;;  %v2518_v37 = vpack.c.bf16 %v2517_v32, %v2517_v32 }
0x1ab1   :  { %2557 = vmatprep.subr.bf16.mxu0 %v2524_v34  ;;  %2598 = vmatprep.subr.bf16.mxu1 %v2526_v48  ;;  %v2530_v52 = vld [vmem:[#allocation4 + $0x58] sm:$0xff]  ;;  %v2527_v62 = vld [vmem:[#allocation4 + $0x40] sm:$0xff]  ;;  %v2532_v53 = vld [vmem:[#allocation4 + $0x68] sm:$0xff] }
0x1ab2   :  { %v2529_v54 = vld [vmem:[#allocation4 + $0x50] sm:$0xff]  ;;  %v2534_v57 = vld [vmem:[#allocation4 + $0x78] sm:$0xff]  ;;  %v2531_v16 = vld [vmem:[#allocation4 + $0x60] sm:$0xff] }
0x1ab3   :  { %v2536_v1 = vld [vmem:[#allocation4 + $0x88] sm:$0xff]  ;;  %v2533_v21 = vld [vmem:[#allocation4 + $0x70] sm:$0xff]  ;;  %v2538_v4 = vld [vmem:[#allocation4 + $0x98] sm:$0xff] }
0x1ab4   :  { %2558 = vmatpush1.bf16.msra.mxu0 %v2523_v23  ;;  %2599 = vmatpush1.bf16.msra.mxu1 %v2525_v51  ;;  %v2535_v5 = vld [vmem:[#allocation4 + $0x80] sm:$0xff]  ;;  %v2540_v25 = vld [vmem:[#allocation4 + $0xa8] sm:$0xff]  ;;  %v2537_v6 = vld [vmem:[#allocation4 + $0x90] sm:$0xff]  ;;  %p2716_p9 = scmp.ne.s32.totalorder %s3438_s29, 0 }
0x1ab5   :  { %2559 = vmatprep.subr.bf16.mxu0 %v2528_v50  ;;  %2600 = vmatprep.subr.bf16.mxu1 %v2530_v52  ;;  %v2542_v15 = vld [vmem:[#allocation4 + $0xb8] sm:$0xff]  ;;  %v2539_v20 = vld [vmem:[#allocation4 + $0xa0] sm:$0xff]  ;;  %v2544_v27 = vld [vmem:[#allocation4 + $0xc8] sm:$0xff]  ;;  %vm4330_vm8 = vmmov (!%p2716_p9), 0  }
0x1ab6   :  { %v2541_v28 = vld [vmem:[#allocation4 + $0xb0] sm:$0xff]  ;;  %v2546_v3 = vld [vmem:[#allocation4 + $0xd8] sm:$0xff]  ;;  %v2543_v29 = vld [vmem:[#allocation4 + $0xc0] sm:$0xff] }
0x1ab7   :  { %v2548_v31 = vld [vmem:[#allocation4 + $0xe8] sm:$0xff]  ;;  %v2545_v22 = vld [vmem:[#allocation4 + $0xd0] sm:$0xff]  ;;  %v2550_v61 = vld [vmem:[#allocation4 + $0xf8] sm:$0xff] }
0x1ab8   :  { %2560 = vmatpush1.bf16.msra.mxu0 %v2527_v62  ;;  %2601 = vmatpush1.bf16.msra.mxu1 %v2529_v54  ;;  %v2547_v2 = vld [vmem:[#allocation4 + $0xe0] sm:$0xff]  ;;  %v2549_v38 = vld [vmem:[#allocation4 + $0xf0] sm:$0xff]  ;;  %v2663_v33 = vld [vmem:[#allocation6 + $0x8] sm:$0xff] }
0x1ab9   :  { %2561 = vmatprep.subr.bf16.mxu0 %v2532_v53  ;;  %2602 = vmatprep.subr.bf16.mxu1 %v2534_v57  ;;  %v2662_v26 = vld [vmem:[#allocation6] sm:$0xff]  ;;  %v2664_v24 = vld [vmem:[#allocation6 + $0x10] sm:$0xff]  ;;  %v2665_v35 = vld [vmem:[#allocation6 + $0x18] sm:$0xff] }
0x1aba   :  { %v2666_v58 = vld [vmem:[#allocation6 + $0x20] sm:$0xff]  ;;  %v2667_v46 = vld [vmem:[#allocation6 + $0x28] sm:$0xff]  ;;  %v2668_v18 = vld [vmem:[#allocation6 + $0x30] sm:$0xff] }
0x1abb   :  { %v2669_v36 = vld [vmem:[#allocation6 + $0x38] sm:$0xff]  ;;  %v2551_v40 = vld [vmem:[#allocation5] sm:$0xff]  ;;  %v2552_v41 = vld [vmem:[#allocation5 + $0x8] sm:$0xff] }
0x1abc   :  { %2562 = vmatpush1.bf16.msra.mxu0 %v2531_v16  ;;  %2603 = vmatpush1.bf16.msra.mxu1 %v2533_v21  ;;  %v2554_v34 = vld [vmem:[#allocation5 + $0x18] sm:$0xff]  ;;  %v2553_v48 = vld [vmem:[#allocation5 + $0x10] sm:$0xff] }
0x1abd   :  { %2563 = vmatprep.subr.bf16.mxu0 %v2536_v1  ;;  %2604 = vmatprep.subr.bf16.mxu1 %v2538_v4 }
0x1ac0   :  { %2564 = vmatpush1.bf16.msra.mxu0 %v2535_v5  ;;  %2605 = vmatpush1.bf16.msra.mxu1 %v2537_v6 }
0x1ac1   :  { %2565 = vmatprep.subr.bf16.mxu0 %v2540_v25  ;;  %2606 = vmatprep.subr.bf16.mxu1 %v2542_v15 }
0x1ac4   :  { %2566 = vmatpush1.bf16.msra.mxu0 %v2539_v20  ;;  %2607 = vmatpush1.bf16.msra.mxu1 %v2541_v28 }
0x1ac5   :  { %2567 = vmatprep.subr.bf16.mxu0 %v2544_v27  ;;  %2608 = vmatprep.subr.bf16.mxu1 %v2546_v3  ;;  %v2714_v3 = vld [vmem:[#allocation2 + $0x28] sm:$0xff]  }
0x1ac8   :  { %2568 = vmatpush1.bf16.msra.mxu0 %v2543_v29  ;;  %2609 = vmatpush1.bf16.msra.mxu1 %v2545_v22  ;;  %v2670_v29 = vld [vmem:[#allocation7] sm:$0xff] }
0x1ac9   :  { %2569 = vmatprep.subr.bf16.mxu0 %v2548_v31  ;;  %2610 = vmatprep.subr.bf16.mxu1 %v2550_v61 }
0x1acc   :  { %2570 = vmatpush1.bf16.msra.mxu0 %v2547_v2  ;;  %2611 = vmatpush1.bf16.msra.mxu1 %v2549_v38  ;;  %v4296_v2 = vmov %v2714_v3  }
0x1acd   :  { %3737 = vmatprep.subr.bf16.mxu0 %v4315_v39 }
0x1acf   :  { %2588 = vmatmul.mubr.bf16.vlgmr.msra.gmra.mrb[0].mxu0 %v2518_v37  ;;  %2629 = vmatmul.mubr.bf16.vlgmr.msra.gmra.mrb[0].mxu1 %v2518_v37 }
0x1ad0   :  { %3753 = vmatprep.mubr.msk.bf16.mxu0 %vm4316_vm0, %v4315_v39  ;;  %3738 = vmatpush3.bf16.msra.mxu0 %v2662_v26 }
0x1ad1   :  { %3739 = vmatprep.subr.bf16.mxu0 %v4315_v39 }
0x1ad4   :  { %3740 = vmatpush3.bf16.msra.mxu0 %v2663_v33 }
0x1ad5   :  { %3741 = vmatprep.subr.bf16.mxu0 %v4315_v39 }
0x1ad8   :  { %3742 = vmatpush3.bf16.msra.mxu0 %v2664_v24  ;;  %v4329_v24 = vmov (!%p2716_p9), 0.0  }
0x1ad9   :  { %3743 = vmatprep.subr.bf16.mxu0 %v4315_v39 }
0x1adc   :  { %3744 = vmatpush3.bf16.msra.mxu0 %v2665_v35 }
0x1add   :  { %3745 = vmatprep.subr.bf16.mxu0 %v4315_v39 }
0x1ae0   :  { %3746 = vmatpush3.bf16.msra.mxu0 %v2666_v58 }
0x1ae1   :  { %3747 = vmatprep.subr.bf16.mxu0 %v4315_v39 }
0x1ae4   :  { %3748 = vmatpush3.bf16.msra.mxu0 %v2667_v46 }
0x1ae5   :  { %3749 = vmatprep.subr.bf16.mxu0 %v4315_v39 }
0x1ae8   :  { %3750 = vmatpush3.bf16.msra.mxu0 %v2668_v18 }
0x1ae9   :  { %3751 = vmatprep.subr.bf16.mxu0 %v4315_v39 }
0x1aec   :  { %3752 = vmatpush3.bf16.msra.mxu0 %v2669_v36 }
0x1aed   :  { %3757 = vmatprep.subr.bf16.mxu0 (!%p2716_p9), %v4329_v24 }
0x1ba2   :  { %v2589_v42 = vpop.f32.mrb[0].mxu0  ;;  %v2630_v56 = vpop.f32.mrb[0].mxu1 }
0x1ba3   :  { %v2590_v60 = vadd.f32 %v2589_v42, %v2551_v40  ;;  %v2591_v63 = vpop.f32.mrb[1].mxu0  ;;  %v2632_v45 = vpop.f32.mrb[1].mxu1  ;;  %v2631_v51 = vadd.f32 %v2630_v56, %v2553_v48 }
0x1ba4   :  { %v2592_v55 = vadd.f32 %v2591_v63, %v2552_v41  ;;  %v2593_v0 = vpop.f32.mrb[2].mxu0  ;;  %v2634_v17 = vpop.f32.mrb[2].mxu1  ;;  %v2633_v47 = vadd.f32 %v2632_v45, %v2554_v34  ;;  %v4331_v63 = vmov (!%p2716_p9), 1.0|1.0  }
0x1ba5   :  { %v3434_v43 = vmul.f32 -1.442695, %v2590_v60  ;;  %v2594_v44 = vpop.f32.mrb[3].mxu0  ;;  %v2635_v23 = vpop.f32.mrb[3].mxu1 }
0x1ba6   :  { %v3435_v59 = vmul.f32 -1.442695, %v2592_v55  ;;  %v3436_v50 = vmul.f32 -1.442695, %v2633_v47 }
0x1ba7   :  { %4182 = vpow2.f32 %v3434_v43 }
0x1ba8   :  { %4184 = vpow2.f32 %v3435_v59 }
0x1ba9   :  { %4186 = vpow2.f32 %v3436_v50 }
0x1baa   :  { %4188 = vtanh.f32 %v2631_v51 }
0x1bb1   :  { %v4183_v52 = vpop.eup %4182 }
0x1bb2   :  { %v4185_v62 = vpop.eup %4184  ;;  %v2640_v53 = vadd.f32 1.0, %v4183_v52 }
0x1bb3   :  { %v2646_v54 = vadd.f32 1.0, %v4185_v62  ;;  %v4187_v57 = vpop.eup %4186 }
0x1bb4   :  { %4190 = vrcp.f32 %v2640_v53  ;;  %v4189_v16 = vpop.eup %4188  ;;  %v2653_v21 = vadd.f32 1.0, %v4187_v57 }
0x1bb5   :  { %4192 = vrcp.f32 %v2646_v54 }
0x1bb6   :  { %4194 = vrcp.f32 %v2653_v21 }
0x1bbe   :  { %v4191_v1 = vpop.eup %4190 }
0x1bbf   :  { %v4193_v4 = vpop.eup %4192  ;;  %v2657_v5 = vmul.f32 %v4191_v1, %v4189_v16 }
0x1bc0   :  { %v2656_v25 = vmul.f32 %v4193_v4, %v5215_v19  ;;  %v4195_v15 = vpop.eup %4194 }
0x1bc2   :  { %v5249_v6 = vadd.f32 %v2657_v5, %v2656_v25 }
0x1bc4   :  { %4196 = vtanh.f32 %v5249_v6 }
0x1bce   :  { %v4197_v20 = vpop.eup %4196 }
0x1bcf   :  { %v5252_v27 = vmul.f32 %v4197_v20, %v4195_v15 }
0x1bd1   :  { %v2661_v28 = vpack.c.bf16 %v5252_v27, %v5252_v27 }
0x1bd3   :  { %3754 = vmatmul.mubr.bf16.vlgmr.msra.gmra.mrb[4].mxu0 %v2661_v28 }
0x1bd4   :  { %3758 = vmatpush3.bf16.msra.mxu0 (!%p2716_p9), %v4417_v7  ;;  %3773 = vmatprep.mubr.msk.bf16.mxu0 (!%p2716_p9), %vm4330_vm8, %v4329_v24 }
0x1bd5   :  { %3759 = vmatprep.subr.bf16.mxu0 (!%p2716_p9), %v4329_v24 }
0x1bd8   :  { %3760 = vmatpush3.bf16.msra.mxu0 (!%p2716_p9), %v4422_v8 }
0x1bd9   :  { %3761 = vmatprep.subr.bf16.mxu0 (!%p2716_p9), %v4329_v24 }
0x1bdc   :  { %3762 = vmatpush3.bf16.msra.mxu0 (!%p2716_p9), %v4427_v9 }
0x1bdd   :  { %3763 = vmatprep.subr.bf16.mxu0 (!%p2716_p9), %v4329_v24 }
0x1be0   :  { %3764 = vmatpush3.bf16.msra.mxu0 (!%p2716_p9), %v4432_v10 }
0x1be1   :  { %3765 = vmatprep.subr.bf16.mxu0 (!%p2716_p9), %v4329_v24 }
0x1be4   :  { %3766 = vmatpush3.bf16.msra.mxu0 (!%p2716_p9), %v4437_v11 }
0x1be5   :  { %3767 = vmatprep.subr.bf16.mxu0 (!%p2716_p9), %v4329_v24 }
0x1be8   :  { %3768 = vmatpush3.bf16.msra.mxu0 (!%p2716_p9), %v4442_v12 }
0x1be9   :  { %3769 = vmatprep.subr.bf16.mxu0 (!%p2716_p9), %v4329_v24 }
0x1bec   :  { %3770 = vmatpush3.bf16.msra.mxu0 (!%p2716_p9), %v4447_v13 }
0x1bed   :  { %3771 = vmatprep.subr.bf16.mxu0 (!%p2716_p9), %v4329_v24 }
0x1bf0   :  { %3772 = vmatpush3.bf16.msra.mxu0 (!%p2716_p9), %v4452_v14 }
0x1ca3   :  { %2722 = sbr.rel (%p2716_p9) target bundleno = 7992 (0x1f38), region = 231 }
0x1ca6   :  { %v2705_v31 = vpop.f32.mrb[4].mxu0 }
0x1ca7   :  { %v2706_v32 = vadd.f32 %v2705_v31, %v2670_v29  ;;  %v3755_v19 = vpop.f32.mrb[5].mxu0 }
0x1ca8   :  { %v2708_v22 = vpop.f32.mrb[6].mxu0 }
0x1ca9   :  { %3437 = vst [vmem:[%s5330_s10 + $0x28] sm:$0xff] %v2706_v32  ;;  %v3756_v61 = vpop.f32.mrb[7].mxu0  ;;  %2723 = vmax.xlane.f32.xlu0 (!%p2716_p9), %v2706_v32 }
0x1d36   :  { %v2724_v37 = vpop.xlane.xlu0 %2723 }
0x1d37   :  { %vm2725_vm6 = vcmp.eq.f32.partialorder %v2706_v32, %v2724_v37 }
0x1d38   :  { %v2726_v38 = vsel %vm2725_vm6, %v5089_v49, 128 }
0x1d39   :  { %v2728_v26 = vshra.s32 %v2726_v38, 16  ;;  %v2727_v35 = vand.u32 65535, %v2726_v38 }
0x1d3b   :  { %v2730_v33 = vcvt.s32.f32 %v2728_v26  ;;  %v2729_v46 = vcvt.s32.f32 %v2727_v35 }
0x1d3d   :  { %2731 = vmin.xlane.f32.xlu0 %v2730_v33 }
0x1dca   :  { %v2732_v58 = vpop.xlane.xlu0 %2731 }
0x1dcb   :  { %vm2733_vm7 = vcmp.eq.f32.partialorder %v2730_v33, %v2732_v58  ;;  %v2738_v36 = vcvt.f32.s32 %v2732_v58 }
0x1dcc   :  { %v2734_v18 = vsel %vm2733_vm7, %v2729_v46, inf }
0x1dcd   :  { %2735 = vmin.xlane.f32.xlu1 %v2734_v18  ;;  %v2739_v41 = vshll.u32 %v2738_v36, 16 }
0x1e5a   :  { %v2736_v40 = vpop.xlane.xlu1 %2735 }
0x1e5b   :  { %v2737_v42 = vcvt.f32.s32 %v2736_v40 }
0x1e5d   :  { %v2740_v60 = vadd.s32 %v2739_v41, %v2737_v42 }
0x1e5f   :  { %vm2741_vm9 = vcmp.eq.s32.totalorder %v5089_v49, %v2740_v60 }
0x1e60   :  { %vm3440_vm10 = vmpackc.low %vm2741_vm9, %vm2741_vm9 }
0x1e61   :  { %3774 = vmatmul.mubr.msk.bf16.vlgmr.msra.gmra.mrb[0].mxu0 %vm3440_vm10, %v4331_v63 }
0x1f34   :  { %v2779_v2 = vpop.f32.mrb[0].mxu0  }
0x1f35   :  { %v3775_v55 = vpop.f32.mrb[1].mxu0 }
0x1f36   :  { %v2782_v0 = vpop.f32.mrb[2].mxu0 }
0x1f37   :  { %v3776_v56 = vpop.f32.mrb[3].mxu0 }
0x1f38 PF:  { %v2789_v43 = vld [vmem:[#allocation4 + $0x8] sm:$0xff]  ;;  %v2788_v44 = vld [vmem:[#allocation4] sm:$0xff]  ;;  %2856 = vmatprep.mubr.bf16.mxu0 %v4314_v30  ;;  %2897 = vmatprep.mubr.bf16.mxu1 %v4314_v30  ;;  %v2791_v59 = vld [vmem:[#allocation4 + $0x18] sm:$0xff]  ;;  %v2786_v32 = vadd.f32 %v4298_v2, %v5252_v27  ;;  %s3446_s7 = sld [smem:[#allocation9 + $0x6]]  ;;  %v4298_v2 = vphi %v4296_v2, %v2779_v2  }
0x1f39   :  { %v2793_v45 = vld [vmem:[#allocation4 + $0x28] sm:$0xff]  ;;  %2824 = vmatprep.subr.bf16.mxu0 %v2789_v43  ;;  %v2792_v34 = vld [vmem:[#allocation4 + $0x20] sm:$0xff]  ;;  %2865 = vmatprep.subr.bf16.mxu1 %v2791_v59  ;;  %v2790_v17 = vld [vmem:[#allocation4 + $0x10] sm:$0xff] }
0x1f3a   :  { %2825 = vmatpush1.bf16.msra.mxu0 %v2788_v44  ;;  %v2795_v23 = vld [vmem:[#allocation4 + $0x38] sm:$0xff]  ;;  %v2797_v47 = vld [vmem:[#allocation4 + $0x48] sm:$0xff]  ;;  %2866 = vmatpush1.bf16.msra.mxu1 %v2790_v17  ;;  %v2794_v48 = vld [vmem:[#allocation4 + $0x30] sm:$0xff]  ;;  %v2787_v37 = vpack.c.bf16 %v2786_v32, %v2786_v32 }
0x1f3b   :  { %2826 = vmatprep.subr.bf16.mxu0 %v2793_v45  ;;  %2867 = vmatprep.subr.bf16.mxu1 %v2795_v23  ;;  %v2799_v50 = vld [vmem:[#allocation4 + $0x58] sm:$0xff]  ;;  %v2796_v51 = vld [vmem:[#allocation4 + $0x40] sm:$0xff]  ;;  %v2801_v52 = vld [vmem:[#allocation4 + $0x68] sm:$0xff] }
0x1f3c   :  { %v2798_v62 = vld [vmem:[#allocation4 + $0x50] sm:$0xff]  ;;  %v2803_v53 = vld [vmem:[#allocation4 + $0x78] sm:$0xff]  ;;  %v2800_v54 = vld [vmem:[#allocation4 + $0x60] sm:$0xff] }
0x1f3d   :  { %v2805_v57 = vld [vmem:[#allocation4 + $0x88] sm:$0xff]  ;;  %v2802_v16 = vld [vmem:[#allocation4 + $0x70] sm:$0xff]  ;;  %v2807_v1 = vld [vmem:[#allocation4 + $0x98] sm:$0xff] }
0x1f3e   :  { %2827 = vmatpush1.bf16.msra.mxu0 %v2792_v34  ;;  %2868 = vmatpush1.bf16.msra.mxu1 %v2794_v48  ;;  %v2804_v21 = vld [vmem:[#allocation4 + $0x80] sm:$0xff]  ;;  %v2809_v4 = vld [vmem:[#allocation4 + $0xa8] sm:$0xff]  ;;  %v2806_v5 = vld [vmem:[#allocation4 + $0x90] sm:$0xff]  ;;  %p2985_p10 = scmp.ne.s32.totalorder %s3446_s7, 0 }
0x1f3f   :  { %2828 = vmatprep.subr.bf16.mxu0 %v2797_v47  ;;  %2869 = vmatprep.subr.bf16.mxu1 %v2799_v50  ;;  %v2811_v25 = vld [vmem:[#allocation4 + $0xb8] sm:$0xff]  ;;  %v2808_v15 = vld [vmem:[#allocation4 + $0xa0] sm:$0xff]  ;;  %v2813_v20 = vld [vmem:[#allocation4 + $0xc8] sm:$0xff]  ;;  %vm4333_vm13 = vmmov (!%p2985_p10), 0  }
0x1f40   :  { %v2810_v28 = vld [vmem:[#allocation4 + $0xb0] sm:$0xff]  ;;  %v2815_v3 = vld [vmem:[#allocation4 + $0xd8] sm:$0xff]  ;;  %v2812_v29 = vld [vmem:[#allocation4 + $0xc0] sm:$0xff] }
0x1f41   :  { %v2817_v31 = vld [vmem:[#allocation4 + $0xe8] sm:$0xff]  ;;  %v2814_v19 = vld [vmem:[#allocation4 + $0xd0] sm:$0xff]  ;;  %v2819_v22 = vld [vmem:[#allocation4 + $0xf8] sm:$0xff] }
0x1f42   :  { %2829 = vmatpush1.bf16.msra.mxu0 %v2796_v51  ;;  %2870 = vmatpush1.bf16.msra.mxu1 %v2798_v62  ;;  %v2816_v61 = vld [vmem:[#allocation4 + $0xe0] sm:$0xff]  ;;  %v2818_v38 = vld [vmem:[#allocation4 + $0xf0] sm:$0xff]  ;;  %v2932_v2 = vld [vmem:[#allocation6 + $0x8] sm:$0xff] }
0x1f43   :  { %2830 = vmatprep.subr.bf16.mxu0 %v2801_v52  ;;  %2871 = vmatprep.subr.bf16.mxu1 %v2803_v53  ;;  %v2931_v27 = vld [vmem:[#allocation6] sm:$0xff]  ;;  %v2933_v26 = vld [vmem:[#allocation6 + $0x10] sm:$0xff]  ;;  %v2934_v33 = vld [vmem:[#allocation6 + $0x18] sm:$0xff] }
0x1f44   :  { %v2935_v24 = vld [vmem:[#allocation6 + $0x20] sm:$0xff]  ;;  %v2936_v35 = vld [vmem:[#allocation6 + $0x28] sm:$0xff]  ;;  %v2937_v58 = vld [vmem:[#allocation6 + $0x30] sm:$0xff] }
0x1f45   :  { %v2938_v46 = vld [vmem:[#allocation6 + $0x38] sm:$0xff]  ;;  %v2820_v18 = vld [vmem:[#allocation5] sm:$0xff]  ;;  %v2821_v36 = vld [vmem:[#allocation5 + $0x8] sm:$0xff] }
0x1f46   :  { %2831 = vmatpush1.bf16.msra.mxu0 %v2800_v54  ;;  %2872 = vmatpush1.bf16.msra.mxu1 %v2802_v16  ;;  %v2823_v45 = vld [vmem:[#allocation5 + $0x18] sm:$0xff]  ;;  %v2822_v23 = vld [vmem:[#allocation5 + $0x10] sm:$0xff] }
0x1f47   :  { %2832 = vmatprep.subr.bf16.mxu0 %v2805_v57  ;;  %2873 = vmatprep.subr.bf16.mxu1 %v2807_v1 }
0x1f4a   :  { %2833 = vmatpush1.bf16.msra.mxu0 %v2804_v21  ;;  %2874 = vmatpush1.bf16.msra.mxu1 %v2806_v5 }
0x1f4b   :  { %2834 = vmatprep.subr.bf16.mxu0 %v2809_v4  ;;  %2875 = vmatprep.subr.bf16.mxu1 %v2811_v25 }
0x1f4e   :  { %2835 = vmatpush1.bf16.msra.mxu0 %v2808_v15  ;;  %2876 = vmatpush1.bf16.msra.mxu1 %v2810_v28 }
0x1f4f   :  { %2836 = vmatprep.subr.bf16.mxu0 %v2813_v20  ;;  %2877 = vmatprep.subr.bf16.mxu1 %v2815_v3  ;;  %v2983_v3 = vld [vmem:[#allocation2 + $0x30] sm:$0xff]  }
0x1f52   :  { %2837 = vmatpush1.bf16.msra.mxu0 %v2812_v29  ;;  %2878 = vmatpush1.bf16.msra.mxu1 %v2814_v19  ;;  %v2939_v29 = vld [vmem:[#allocation7] sm:$0xff] }
0x1f53   :  { %2838 = vmatprep.subr.bf16.mxu0 %v2817_v31  ;;  %2879 = vmatprep.subr.bf16.mxu1 %v2819_v22 }
0x1f56   :  { %2839 = vmatpush1.bf16.msra.mxu0 %v2816_v61  ;;  %2880 = vmatpush1.bf16.msra.mxu1 %v2818_v38  ;;  %v4300_v61 = vmov %v2983_v3  }
0x1f57   :  { %3777 = vmatprep.subr.bf16.mxu0 %v4315_v39 }
0x1f59   :  { %2857 = vmatmul.mubr.bf16.vlgmr.msra.gmra.mrb[0].mxu0 %v2787_v37  ;;  %2898 = vmatmul.mubr.bf16.vlgmr.msra.gmra.mrb[0].mxu1 %v2787_v37 }
0x1f5a   :  { %3793 = vmatprep.mubr.msk.bf16.mxu0 %vm4316_vm0, %v4315_v39  ;;  %3778 = vmatpush3.bf16.msra.mxu0 %v2931_v27 }
0x1f5b   :  { %3779 = vmatprep.subr.bf16.mxu0 %v4315_v39 }
0x1f5e   :  { %3780 = vmatpush3.bf16.msra.mxu0 %v2932_v2 }
0x1f5f   :  { %3781 = vmatprep.subr.bf16.mxu0 %v4315_v39 }
0x1f62   :  { %3782 = vmatpush3.bf16.msra.mxu0 %v2933_v26  ;;  %v4332_v26 = vmov (!%p2985_p10), 0.0  }
0x1f63   :  { %3783 = vmatprep.subr.bf16.mxu0 %v4315_v39 }
0x1f66   :  { %3784 = vmatpush3.bf16.msra.mxu0 %v2934_v33 }
0x1f67   :  { %3785 = vmatprep.subr.bf16.mxu0 %v4315_v39 }
0x1f6a   :  { %3786 = vmatpush3.bf16.msra.mxu0 %v2935_v24 }
0x1f6b   :  { %3787 = vmatprep.subr.bf16.mxu0 %v4315_v39 }
0x1f6e   :  { %3788 = vmatpush3.bf16.msra.mxu0 %v2936_v35 }
0x1f6f   :  { %3789 = vmatprep.subr.bf16.mxu0 %v4315_v39 }
0x1f72   :  { %3790 = vmatpush3.bf16.msra.mxu0 %v2937_v58 }
0x1f73   :  { %3791 = vmatprep.subr.bf16.mxu0 %v4315_v39 }
0x1f76   :  { %3792 = vmatpush3.bf16.msra.mxu0 %v2938_v46 }
0x1f77   :  { %3797 = vmatprep.subr.bf16.mxu0 (!%p2985_p10), %v4332_v26 }
0x202c   :  { %v2858_v40 = vpop.f32.mrb[0].mxu0  ;;  %v2899_v55 = vpop.f32.mrb[0].mxu1 }
0x202d   :  { %v2859_v41 = vadd.f32 %v2858_v40, %v2820_v18  ;;  %v2860_v42 = vpop.f32.mrb[1].mxu0  ;;  %v2901_v43 = vpop.f32.mrb[1].mxu1  ;;  %v2900_v48 = vadd.f32 %v2899_v55, %v2822_v23 }
0x202e   :  { %v2861_v60 = vadd.f32 %v2860_v42, %v2821_v36  ;;  %v2862_v63 = vpop.f32.mrb[2].mxu0  ;;  %v2903_v59 = vpop.f32.mrb[2].mxu1  ;;  %v2902_v17 = vadd.f32 %v2901_v43, %v2823_v45 }
0x202f   :  { %v3442_v0 = vmul.f32 -1.442695, %v2859_v41  ;;  %v2863_v56 = vpop.f32.mrb[3].mxu0  ;;  %v2904_v34 = vpop.f32.mrb[3].mxu1 }
0x2030   :  { %v3443_v44 = vmul.f32 -1.442695, %v2861_v60  ;;  %v3444_v47 = vmul.f32 -1.442695, %v2902_v17 }
0x2031   :  { %4198 = vpow2.f32 %v3442_v0 }
0x2032   :  { %4200 = vpow2.f32 %v3443_v44 }
0x2033   :  { %4202 = vpow2.f32 %v3444_v47 }
0x2034   :  { %4204 = vtanh.f32 %v2900_v48 }
0x203b   :  { %v4199_v50 = vpop.eup %4198 }
0x203c   :  { %v4201_v51 = vpop.eup %4200  ;;  %v2909_v52 = vadd.f32 1.0, %v4199_v50 }
0x203d   :  { %v2915_v62 = vadd.f32 1.0, %v4201_v51  ;;  %v4203_v53 = vpop.eup %4202 }
0x203e   :  { %4206 = vrcp.f32 %v2909_v52  ;;  %v4205_v54 = vpop.eup %4204  ;;  %v2922_v16 = vadd.f32 1.0, %v4203_v53 }
0x203f   :  { %4208 = vrcp.f32 %v2915_v62 }
0x2040   :  { %4210 = vrcp.f32 %v2922_v16 }
0x2048   :  { %v4207_v57 = vpop.eup %4206 }
0x2049   :  { %v4209_v1 = vpop.eup %4208  ;;  %v2926_v21 = vmul.f32 %v4207_v57, %v4205_v54 }
0x204a   :  { %v2925_v4 = vmul.f32 %v4209_v1, %v5249_v6  ;;  %v4211_v25 = vpop.eup %4210 }
0x204c   :  { %v5283_v5 = vadd.f32 %v2926_v21, %v2925_v4 }
0x204e   :  { %4212 = vtanh.f32 %v5283_v5 }
0x2058   :  { %v4213_v15 = vpop.eup %4212 }
0x2059   :  { %v5286_v20 = vmul.f32 %v4213_v15, %v4211_v25 }
0x205b   :  { %v2930_v28 = vpack.c.bf16 %v5286_v20, %v5286_v20 }
0x205d   :  { %3794 = vmatmul.mubr.bf16.vlgmr.msra.gmra.mrb[4].mxu0 %v2930_v28 }
0x205e   :  { %3798 = vmatpush3.bf16.msra.mxu0 (!%p2985_p10), %v4417_v7  ;;  %3813 = vmatprep.mubr.msk.bf16.mxu0 (!%p2985_p10), %vm4333_vm13, %v4332_v26 }
0x205f   :  { %3799 = vmatprep.subr.bf16.mxu0 (!%p2985_p10), %v4332_v26 }
0x2062   :  { %3800 = vmatpush3.bf16.msra.mxu0 (!%p2985_p10), %v4422_v8 }
0x2063   :  { %3801 = vmatprep.subr.bf16.mxu0 (!%p2985_p10), %v4332_v26 }
0x2066   :  { %3802 = vmatpush3.bf16.msra.mxu0 (!%p2985_p10), %v4427_v9 }
0x2067   :  { %3803 = vmatprep.subr.bf16.mxu0 (!%p2985_p10), %v4332_v26 }
0x206a   :  { %3804 = vmatpush3.bf16.msra.mxu0 (!%p2985_p10), %v4432_v10 }
0x206b   :  { %3805 = vmatprep.subr.bf16.mxu0 (!%p2985_p10), %v4332_v26 }
0x206e   :  { %3806 = vmatpush3.bf16.msra.mxu0 (!%p2985_p10), %v4437_v11 }
0x206f   :  { %3807 = vmatprep.subr.bf16.mxu0 (!%p2985_p10), %v4332_v26 }
0x2072   :  { %3808 = vmatpush3.bf16.msra.mxu0 (!%p2985_p10), %v4442_v12  ;;  %v4334_v12 = vmov (!%p2985_p10), 1.0|1.0  }
0x2073   :  { %3809 = vmatprep.subr.bf16.mxu0 (!%p2985_p10), %v4332_v26 }
0x2076   :  { %3810 = vmatpush3.bf16.msra.mxu0 (!%p2985_p10), %v4447_v13 }
0x2077   :  { %3811 = vmatprep.subr.bf16.mxu0 (!%p2985_p10), %v4332_v26 }
0x207a   :  { %3812 = vmatpush3.bf16.msra.mxu0 (!%p2985_p10), %v4452_v14 }
0x212d   :  { %2991 = sbr.rel (%p2985_p10) target bundleno = 9154 (0x23c2), region = 239 }
0x2130   :  { %v2974_v31 = vpop.f32.mrb[4].mxu0 }
0x2131   :  { %v2975_v32 = vadd.f32 %v2974_v31, %v2939_v29  ;;  %v3795_v6 = vpop.f32.mrb[5].mxu0 }
0x2132   :  { %v2977_v19 = vpop.f32.mrb[6].mxu0 }
0x2133   :  { %3445 = vst [vmem:[%s5330_s10 + $0x30] sm:$0xff] %v2975_v32  ;;  %v3796_v22 = vpop.f32.mrb[7].mxu0  ;;  %2992 = vmax.xlane.f32.xlu0 (!%p2985_p10), %v2975_v32 }
0x21c0   :  { %v2993_v37 = vpop.xlane.xlu0 %2992 }
0x21c1   :  { %vm2994_vm11 = vcmp.eq.f32.partialorder %v2975_v32, %v2993_v37 }
0x21c2   :  { %v2995_v38 = vsel %vm2994_vm11, %v5089_v49, 128 }
0x21c3   :  { %v2997_v27 = vshra.s32 %v2995_v38, 16  ;;  %v2996_v7 = vand.u32 65535, %v2995_v38 }
0x21c5   :  { %v2999_v2 = vcvt.s32.f32 %v2997_v27  ;;  %v2998_v33 = vcvt.s32.f32 %v2996_v7 }
0x21c7   :  { %3000 = vmin.xlane.f32.xlu0 %v2999_v2 }
0x2254   :  { %v3001_v8 = vpop.xlane.xlu0 %3000 }
0x2255   :  { %vm3002_vm12 = vcmp.eq.f32.partialorder %v2999_v2, %v3001_v8  ;;  %v3007_v10 = vcvt.f32.s32 %v3001_v8 }
0x2256   :  { %v3003_v9 = vsel %vm3002_vm12, %v2998_v33, inf }
0x2257   :  { %3004 = vmin.xlane.f32.xlu1 %v3003_v9  ;;  %v3008_v11 = vshll.u32 %v3007_v10, 16 }
0x22e4   :  { %v3005_v24 = vpop.xlane.xlu1 %3004 }
0x22e5   :  { %v3006_v35 = vcvt.f32.s32 %v3005_v24 }
0x22e7   :  { %v3009_v58 = vadd.s32 %v3008_v11, %v3006_v35 }
0x22e9   :  { %vm3010_vm14 = vcmp.eq.s32.totalorder %v5089_v49, %v3009_v58 }
0x22ea   :  { %vm3448_vm15 = vmpackc.low %vm3010_vm14, %vm3010_vm14 }
0x22eb   :  { %3814 = vmatmul.mubr.msk.bf16.vlgmr.msra.gmra.mrb[0].mxu0 %vm3448_vm15, %v4334_v12 }
0x23be   :  { %v3048_v61 = vpop.f32.mrb[0].mxu0  }
0x23bf   :  { %v3815_v13 = vpop.f32.mrb[1].mxu0 }
0x23c0   :  { %v3051_v14 = vpop.f32.mrb[2].mxu0 }
0x23c1   :  { %v3816_v46 = vpop.f32.mrb[3].mxu0 }
0x23c2 PF:  { %v3058_v18 = vld [vmem:[#allocation4 + $0x8] sm:$0xff]  ;;  %v3057_v36 = vld [vmem:[#allocation4] sm:$0xff]  ;;  %3125 = vmatprep.mubr.bf16.mxu0 %v4314_v30  ;;  %3166 = vmatprep.mubr.bf16.mxu1 %v4314_v30  ;;  %v3060_v49 = vld [vmem:[#allocation4 + $0x18] sm:$0xff]  ;;  %v3055_v16 = vadd.f32 %v4302_v61, %v5286_v20  ;;  %v4302_v61 = vphi %v4300_v61, %v3048_v61  }
0x23c3   :  { %v3062_v40 = vld [vmem:[#allocation4 + $0x28] sm:$0xff]  ;;  %3093 = vmatprep.subr.bf16.mxu0 %v3058_v18  ;;  %v3061_v41 = vld [vmem:[#allocation4 + $0x20] sm:$0xff]  ;;  %3134 = vmatprep.subr.bf16.mxu1 %v3060_v49  ;;  %v3059_v42 = vld [vmem:[#allocation4 + $0x10] sm:$0xff] }
0x23c4   :  { %3094 = vmatpush1.bf16.msra.mxu0 %v3057_v36  ;;  %v3064_v60 = vld [vmem:[#allocation4 + $0x38] sm:$0xff]  ;;  %v3066_v63 = vld [vmem:[#allocation4 + $0x48] sm:$0xff]  ;;  %3135 = vmatpush1.bf16.msra.mxu1 %v3059_v42  ;;  %v3063_v55 = vld [vmem:[#allocation4 + $0x30] sm:$0xff]  ;;  %v3056_v25 = vpack.c.bf16 %v3055_v16, %v3055_v16 }
0x23c5   :  { %3095 = vmatprep.subr.bf16.mxu0 %v3062_v40  ;;  %3136 = vmatprep.subr.bf16.mxu1 %v3064_v60  ;;  %v3068_v0 = vld [vmem:[#allocation4 + $0x58] sm:$0xff]  ;;  %v3065_v56 = vld [vmem:[#allocation4 + $0x40] sm:$0xff]  ;;  %v3070_v43 = vld [vmem:[#allocation4 + $0x68] sm:$0xff] }
0x23c6   :  { %v3067_v30 = vld [vmem:[#allocation4 + $0x50] sm:$0xff]  ;;  %v3072_v44 = vld [vmem:[#allocation4 + $0x78] sm:$0xff]  ;;  %v3069_v45 = vld [vmem:[#allocation4 + $0x60] sm:$0xff] }
0x23c7   :  { %v3074_v59 = vld [vmem:[#allocation4 + $0x88] sm:$0xff]  ;;  %v3071_v34 = vld [vmem:[#allocation4 + $0x70] sm:$0xff]  ;;  %v3076_v17 = vld [vmem:[#allocation4 + $0x98] sm:$0xff] }
0x23c8   :  { %3096 = vmatpush1.bf16.msra.mxu0 %v3061_v41  ;;  %3137 = vmatpush1.bf16.msra.mxu1 %v3063_v55  ;;  %v3073_v23 = vld [vmem:[#allocation4 + $0x80] sm:$0xff]  ;;  %v3078_v47 = vld [vmem:[#allocation4 + $0xa8] sm:$0xff]  ;;  %v3075_v48 = vld [vmem:[#allocation4 + $0x90] sm:$0xff] }
0x23c9   :  { %3097 = vmatprep.subr.bf16.mxu0 %v3066_v63  ;;  %3138 = vmatprep.subr.bf16.mxu1 %v3068_v0  ;;  %v3080_v50 = vld [vmem:[#allocation4 + $0xb8] sm:$0xff]  ;;  %v3077_v51 = vld [vmem:[#allocation4 + $0xa0] sm:$0xff]  ;;  %v3082_v52 = vld [vmem:[#allocation4 + $0xc8] sm:$0xff] }
0x23ca   :  { %v3079_v62 = vld [vmem:[#allocation4 + $0xb0] sm:$0xff]  ;;  %v3084_v53 = vld [vmem:[#allocation4 + $0xd8] sm:$0xff]  ;;  %v3081_v54 = vld [vmem:[#allocation4 + $0xc0] sm:$0xff] }
0x23cb   :  { %v3086_v57 = vld [vmem:[#allocation4 + $0xe8] sm:$0xff]  ;;  %v3083_v1 = vld [vmem:[#allocation4 + $0xd0] sm:$0xff]  ;;  %v3088_v21 = vld [vmem:[#allocation4 + $0xf8] sm:$0xff] }
0x23cc   :  { %3098 = vmatpush1.bf16.msra.mxu0 %v3065_v56  ;;  %3139 = vmatpush1.bf16.msra.mxu1 %v3067_v30  ;;  %v3085_v4 = vld [vmem:[#allocation4 + $0xe0] sm:$0xff]  ;;  %v3087_v15 = vld [vmem:[#allocation4 + $0xf0] sm:$0xff]  ;;  %v3201_v28 = vld [vmem:[#allocation6 + $0x8] sm:$0xff] }
0x23cd   :  { %3099 = vmatprep.subr.bf16.mxu0 %v3070_v43  ;;  %3140 = vmatprep.subr.bf16.mxu1 %v3072_v44  ;;  %v3200_v20 = vld [vmem:[#allocation6] sm:$0xff]  ;;  %v3202_v3 = vld [vmem:[#allocation6 + $0x10] sm:$0xff]  ;;  %v3203_v29 = vld [vmem:[#allocation6 + $0x18] sm:$0xff] }
0x23ce   :  { %v3204_v31 = vld [vmem:[#allocation6 + $0x20] sm:$0xff]  ;;  %v3205_v32 = vld [vmem:[#allocation6 + $0x28] sm:$0xff]  ;;  %v3206_v6 = vld [vmem:[#allocation6 + $0x30] sm:$0xff] }
0x23cf   :  { %v3207_v19 = vld [vmem:[#allocation6 + $0x38] sm:$0xff]  ;;  %v3089_v22 = vld [vmem:[#allocation5] sm:$0xff]  ;;  %v3090_v61 = vld [vmem:[#allocation5 + $0x8] sm:$0xff] }
0x23d0   :  { %3100 = vmatpush1.bf16.msra.mxu0 %v3069_v45  ;;  %3141 = vmatpush1.bf16.msra.mxu1 %v3071_v34  ;;  %v3092_v24 = vld [vmem:[#allocation5 + $0x18] sm:$0xff]  ;;  %v3091_v58 = vld [vmem:[#allocation5 + $0x10] sm:$0xff]  ;;  %v3208_v45 = vld [vmem:[#allocation7] sm:$0xff] }
0x23d1   :  { %3101 = vmatprep.subr.bf16.mxu0 %v3074_v59  ;;  %3142 = vmatprep.subr.bf16.mxu1 %v3076_v17 }
0x23d4   :  { %3102 = vmatpush1.bf16.msra.mxu0 %v3073_v23  ;;  %3143 = vmatpush1.bf16.msra.mxu1 %v3075_v48 }
0x23d5   :  { %3103 = vmatprep.subr.bf16.mxu0 %v3078_v47  ;;  %3144 = vmatprep.subr.bf16.mxu1 %v3080_v50 }
0x23d8   :  { %3104 = vmatpush1.bf16.msra.mxu0 %v3077_v51  ;;  %3145 = vmatpush1.bf16.msra.mxu1 %v3079_v62 }
0x23d9   :  { %3105 = vmatprep.subr.bf16.mxu0 %v3082_v52  ;;  %3146 = vmatprep.subr.bf16.mxu1 %v3084_v53 }
0x23dc   :  { %3106 = vmatpush1.bf16.msra.mxu0 %v3081_v54  ;;  %3147 = vmatpush1.bf16.msra.mxu1 %v3083_v1 }
0x23dd   :  { %3107 = vmatprep.subr.bf16.mxu0 %v3086_v57  ;;  %3148 = vmatprep.subr.bf16.mxu1 %v3088_v21 }
0x23e0   :  { %3108 = vmatpush1.bf16.msra.mxu0 %v3085_v4  ;;  %3149 = vmatpush1.bf16.msra.mxu1 %v3087_v15 }
0x23e1   :  { %3817 = vmatprep.subr.bf16.mxu0 %v4315_v39 }
0x23e3   :  { %3126 = vmatmul.mubr.bf16.vlgmr.msra.gmra.mrb[0].mxu0 %v3056_v25  ;;  %3167 = vmatmul.mubr.bf16.vlgmr.msra.gmra.mrb[0].mxu1 %v3056_v25 }
0x23e4   :  { %3833 = vmatprep.mubr.msk.bf16.mxu0 %vm4316_vm0, %v4315_v39  ;;  %3818 = vmatpush3.bf16.msra.mxu0 %v3200_v20 }
0x23e5   :  { %3819 = vmatprep.subr.bf16.mxu0 %v4315_v39 }
0x23e8   :  { %3820 = vmatpush3.bf16.msra.mxu0 %v3201_v28 }
0x23e9   :  { %3821 = vmatprep.subr.bf16.mxu0 %v4315_v39 }
0x23ec   :  { %3822 = vmatpush3.bf16.msra.mxu0 %v3202_v3 }
0x23ed   :  { %3823 = vmatprep.subr.bf16.mxu0 %v4315_v39 }
0x23f0   :  { %3824 = vmatpush3.bf16.msra.mxu0 %v3203_v29 }
0x23f1   :  { %3825 = vmatprep.subr.bf16.mxu0 %v4315_v39 }
0x23f4   :  { %3826 = vmatpush3.bf16.msra.mxu0 %v3204_v31 }
0x23f5   :  { %3827 = vmatprep.subr.bf16.mxu0 %v4315_v39 }
0x23f8   :  { %3828 = vmatpush3.bf16.msra.mxu0 %v3205_v32 }
0x23f9   :  { %3829 = vmatprep.subr.bf16.mxu0 %v4315_v39 }
0x23fc   :  { %3830 = vmatpush3.bf16.msra.mxu0 %v3206_v6 }
0x23fd   :  { %3831 = vmatprep.subr.bf16.mxu0 %v4315_v39 }
0x2400   :  { %3832 = vmatpush3.bf16.msra.mxu0 %v3207_v19 }
0x24b6   :  { %v3127_v37 = vpop.f32.mrb[0].mxu0  ;;  %v3168_v7 = vpop.f32.mrb[0].mxu1 }
0x24b7   :  { %v3128_v38 = vadd.f32 %v3127_v37, %v3089_v22  ;;  %v3129_v27 = vpop.f32.mrb[1].mxu0  ;;  %v3170_v9 = vpop.f32.mrb[1].mxu1  ;;  %v3169_v13 = vadd.f32 %v3168_v7, %v3091_v58 }
0x24b8   :  { %v3130_v2 = vadd.f32 %v3129_v27, %v3090_v61  ;;  %v3131_v26 = vpop.f32.mrb[2].mxu0  ;;  %v3172_v11 = vpop.f32.mrb[2].mxu1  ;;  %v3171_v39 = vadd.f32 %v3170_v9, %v3092_v24 }
0x24b9   :  { %v3450_v8 = vmul.f32 -1.442695, %v3128_v38  ;;  %v3132_v33 = vpop.f32.mrb[3].mxu0  ;;  %v3173_v35 = vpop.f32.mrb[3].mxu1 }
0x24ba   :  { %v3451_v10 = vmul.f32 -1.442695, %v3130_v2  ;;  %v3452_v12 = vmul.f32 -1.442695, %v3171_v39 }
0x24bb   :  { %4214 = vpow2.f32 %v3450_v8 }
0x24bc   :  { %4216 = vpow2.f32 %v3451_v10 }
0x24bd   :  { %4218 = vpow2.f32 %v3452_v12 }
0x24be   :  { %4220 = vtanh.f32 %v3169_v13 }
0x24c5   :  { %v4215_v14 = vpop.eup %4214 }
0x24c6   :  { %v4217_v46 = vpop.eup %4216  ;;  %v3178_v18 = vadd.f32 1.0, %v4215_v14 }
0x24c7   :  { %v3184_v36 = vadd.f32 1.0, %v4217_v46  ;;  %v4219_v40 = vpop.eup %4218 }
0x24c8   :  { %4222 = vrcp.f32 %v3178_v18  ;;  %v4221_v49 = vpop.eup %4220  ;;  %v3191_v42 = vadd.f32 1.0, %v4219_v40 }
0x24c9   :  { %4224 = vrcp.f32 %v3184_v36 }
0x24ca   :  { %4226 = vrcp.f32 %v3191_v42 }
0x24d2   :  { %v4223_v41 = vpop.eup %4222 }
0x24d3   :  { %v4225_v60 = vpop.eup %4224  ;;  %v3195_v63 = vmul.f32 %v4223_v41, %v4221_v49 }
0x24d4   :  { %v3194_v55 = vmul.f32 %v4225_v60, %v5283_v5  ;;  %v4227_v56 = vpop.eup %4226 }
0x24d6   :  { %v3196_v0 = vadd.f32 %v3195_v63, %v3194_v55 }
0x24d8   :  { %4228 = vtanh.f32 %v3196_v0 }
0x24e2   :  { %v4229_v43 = vpop.eup %4228 }
0x24e3   :  { %v3198_v30 = vmul.f32 %v4229_v43, %v4227_v56 }
0x24e5   :  { %v3199_v44 = vpack.c.bf16 %v3198_v30, %v3198_v30 }
0x24e7   :  { %3834 = vmatmul.mubr.bf16.vlgmr.msra.gmra.mrb[4].mxu0 %v3199_v44 }
0x25ba   :  { %v3243_v59 = vpop.f32.mrb[4].mxu0 }
0x25bb   :  { %v3244_v34 = vadd.f32 %v3243_v59, %v3208_v45  ;;  %v3835_v17 = vpop.f32.mrb[5].mxu0 }
0x25bc   :  { %v3246_v23 = vpop.f32.mrb[6].mxu0 }
0x25bd   :  { %3453 = vst [vmem:[%s5330_s10 + $0x38] sm:$0xff] %v3244_v34  ;;  %v3836_v47 = vpop.f32.mrb[7].mxu0 }
0x25be   :  { %3255 = vsyncpa [#allocation10], 1 }
0x25bf   :  { %3256 = vsyncmov [#allocation8] }
0x25c2   :  { %s3257_s5 = vpop.sfrf %3256 }
0x25c3   :  { %p3454_p11 = scmp.ne.s32.totalorder %s3257_s5, 0 }
0x25c5   :  { %3261 = shalt.err (%p3454_p11)  }
0x25c6   :  { %3263 = vsyncmov [#allocation8 + $0x1] }
0x25c9   :  { %s3264_s15 = vpop.sfrf %3263 }
0x25ca   :  { %p3455_p12 = scmp.ne.s32.totalorder %s3264_s15, 0 }
0x25cc   :  { %3268 = shalt.err (%p3455_p12)  }
0x25cd   :  { %3270 = vsyncmov [#allocation8 + $0x2] }
0x25d0   :  { %s3271_s16 = vpop.sfrf %3270 }
0x25d1   :  { %p3456_p13 = scmp.ne.s32.totalorder %s3271_s16, 0 }
0x25d3   :  { %3275 = shalt.err (%p3456_p13)  }
0x25d4   :  { %3277 = vsyncmov [#allocation8 + $0x3] }
0x25d7   :  { %s3278_s17 = vpop.sfrf %3277 }
0x25d8   :  { %p3457_p0 = scmp.ne.s32.totalorder %s3278_s17, 0 }
0x25da   :  { %3282 = shalt.err (%p3457_p0)  }
0x25db   :  { %3284 = vsyncmov [#allocation8 + $0x4] }
0x25de   :  { %s3285_s10 = vpop.sfrf %3284 }
0x25df   :  { %p3458_p1 = scmp.ne.s32.totalorder %s3285_s10, 0 }
0x25e1   :  { %3289 = shalt.err (%p3458_p1)  }
0x25e2   :  { %3291 = vsyncmov [#allocation8 + $0x5] }
0x25e5   :  { %s3292_s18 = vpop.sfrf %3291 }
0x25e6   :  { %p3459_p2 = scmp.ne.s32.totalorder %s3292_s18, 0 }
0x25e8   :  { %3296 = shalt.err (%p3459_p2)  }

</bundles_post_ra>
